<compile_context>
chip_gen: v7x
topology: tpu7x:2x2x1
jax: 0.10.0
libtpu: 0.0.40
codegen_flags: <defaults>
</compile_context>

<pallas_src>
import functools

import jax
import jax.numpy as jnp
from jax import lax
from jax.experimental import pallas as pl
from jax.experimental.pallas import tpu as pltpu

GROUPS = 32        # GroupNorm(32, C) hard-coded by convbn(gn=True) / hourglass2d
GN_EPS = 1e-5


def _round_up(x, m):
    return (x + m - 1) // m * m


def _pick_row_tile(L, target=512):
    """Largest tile <= target that divides L exactly (multiple of 8 if < L)."""
    if L <= target:
        return L
    for t in range(target, 7, -1):
        if L % t == 0 and t % 8 == 0:
            return t
    return L


# --------------------------- Pallas kernels ---------------------------------

def _matmul_kernel(a_ref, b_ref, o_ref):
    o_ref[...] = jnp.dot(a_ref[...], b_ref[...],
                         preferred_element_type=jnp.float32)


def pallas_matmul(a_bf16, b_bf16, tm=512):
    """(M, K) bf16 @ (K, N) bf16 -> (M, N) f32, tiled over M, f32 accumulate."""
    M, K = a_bf16.shape
    K2, N = b_bf16.shape
    assert K == K2
    Mp = _round_up(M, 16)
    tm = min(tm, Mp)
    Mp = _round_up(Mp, tm)
    if Mp != M:
        a_bf16 = jnp.pad(a_bf16, ((0, Mp - M), (0, 0)))
    out = pl.pallas_call(
        _matmul_kernel,
        out_shape=jax.ShapeDtypeStruct((Mp, N), jnp.float32),
        grid=(Mp // tm,),
        in_specs=[pl.BlockSpec((tm, K), lambda i: (i, 0)),
                  pl.BlockSpec((K, N), lambda i: (0, 0))],
        out_specs=pl.BlockSpec((tm, N), lambda i: (i, 0)),
        compiler_params=pltpu.CompilerParams(
            dimension_semantics=("parallel",)),
    )(a_bf16, b_bf16)
    return out[:M] if Mp != M else out


def _gn_stats_kernel(x_ref, sum_ref, ssq_ref):
    @pl.when(pl.program_id(1) == 0)
    def _init():
        sum_ref[...] = jnp.zeros_like(sum_ref)
        ssq_ref[...] = jnp.zeros_like(ssq_ref)
    x = x_ref[...]                                           # (1, tl, 128) f32
    sum_ref[...] = sum_ref[...] + jnp.sum(x, axis=1, keepdims=True)
    ssq_ref[...] = ssq_ref[...] + jnp.sum(x * x, axis=1, keepdims=True)


def _gn_apply_kernel(*refs, relu, has_res):
    if has_res:
        x_ref, r_ref, sc_ref, sh_ref, o_ref = refs
    else:
        x_ref, sc_ref, sh_ref, o_ref = refs
    y = x_ref[...] * sc_ref[0:1, 0:1, :] + sh_ref[0:1, 0:1, :]
    if has_res:
        y = y + r_ref[...]
    if relu:
        y = jnp.maximum(y, 0.0)
    o_ref[...] = y


# --------------------------- GroupNorm (2-pass, lane-dense) ------------------

def group_norm(x_nhwc, gamma, beta, *, relu=False, residual=None,
               groups=GROUPS, eps=GN_EPS):
    """PyTorch-equivalent GroupNorm(groups, C) (+ optional residual + ReLU)."""
    N, H, W, C = x_nhwc.shape
    assert C % groups == 0, "GroupNorm(32, C) needs C % 32 == 0"
    assert 128 % C == 0, "lane-folded GN stats require C in {32, 64, 128}"
    total = H * W * C
    assert total % 128 == 0
    L = total // 128
    tl = _pick_row_tile(L)
    assert L % tl == 0
    xf = x_nhwc.reshape(N, L, 128)

    # pass 1: tiled per-lane sum / sum-of-squares (accumulated across l-tiles)
    s, q = pl.pallas_call(
        _gn_stats_kernel,
        out_shape=(jax.ShapeDtypeStruct((N, 8, 128), jnp.float32),
                   jax.ShapeDtypeStruct((N, 8, 128), jnp.float32)),
        grid=(N, L // tl),
        in_specs=[pl.BlockSpec((1, tl, 128), lambda n, l: (n, l, 0))],
        out_specs=(pl.BlockSpec((1, 8, 128), lambda n, l: (n, 0, 0)),
                   pl.BlockSpec((1, 8, 128), lambda n, l: (n, 0, 0))),
        compiler_params=pltpu.CompilerParams(
            dimension_semantics=("parallel", "arbitrary")),
    )(xf)
    lane_sum = s[:, 0, :]                                    # (N, 128)
    lane_ssq = q[:, 0, :]

    # tiny host-side fold: lanes -> channels -> groups -> scale/shift
    rep = 128 // C
    cpg = C // groups
    ch_sum = lane_sum.reshape(N, rep, C).sum(axis=1)         # (N, C)
    ch_ssq = lane_ssq.reshape(N, rep, C).sum(axis=1)
    g_sum = ch_sum.reshape(N, groups, cpg).sum(axis=2)       # (N, G)
    g_ssq = ch_ssq.reshape(N, groups, cpg).sum(axis=2)
    cnt = float(H * W * cpg)
    mean = g_sum / cnt
    var = g_ssq / cnt - mean * mean                          # biased (PyTorch GN)
    inv = lax.rsqrt(var + eps)
    mean_c = jnp.repeat(mean, cpg, axis=1)                   # (N, C)
    inv_c = jnp.repeat(inv, cpg, axis=1)
    scale_c = inv_c * gamma[None, :]
    shift_c = beta[None, :] - mean_c * scale_c
    scale_b = jnp.broadcast_to(jnp.tile(scale_c, (1, rep))[:, None, :],
                               (N, 8, 128))
    shift_b = jnp.broadcast_to(jnp.tile(shift_c, (1, rep))[:, None, :],
                               (N, 8, 128))

    # pass 2: normalize + affine (+ fused residual add) (+ fused ReLU)
    blk = pl.BlockSpec((1, tl, 128), lambda n, l: (n, l, 0))
    par = pl.BlockSpec((1, 8, 128), lambda n, l: (n, 0, 0))
    has_res = residual is not None
    ins = [xf]
    in_specs = [blk]
    if has_res:
        ins.append(residual.reshape(N, L, 128))
        in_specs.append(blk)
    ins += [scale_b, shift_b]
    in_specs += [par, par]
    y = pl.pallas_call(
        functools.partial(_gn_apply_kernel, relu=relu, has_res=has_res),
        out_shape=jax.ShapeDtypeStruct((N, L, 128), jnp.float32),
        grid=(N, L // tl),
        in_specs=in_specs,
        out_specs=blk,
        compiler_params=pltpu.CompilerParams(
            dimension_semantics=("parallel", "parallel")),
    )(*ins)
    return y.reshape(N, H, W, C)


# --------------------------- convolutions as bf16 GEMMs ----------------------

def conv3x3(x_nhwc, w, stride=1):
    """3x3 conv, padding=1, bias-free. x: (N,H,W,Cin); w: (Cout,Cin,3,3)."""
    N, H, W, Cin = x_nhwc.shape
    Cout = w.shape[0]
    Ho = (H + 2 - 3) // stride + 1
    Wo = (W + 2 - 3) // stride + 1
    xp = jnp.pad(x_nhwc.astype(jnp.bfloat16), ((0, 0), (1, 1), (1, 1), (0, 0)))
    cols = []
    for a in range(3):
        for b in range(3):
            sl = xp[:, a:a + stride * (Ho - 1) + 1:stride,
                      b:b + stride * (Wo - 1) + 1:stride, :]
            cols.append(sl.reshape(N * Ho * Wo, Cin))
    # TODO(synk): the remaining host-side tap concat could be removed with a
    # manual halo-DMA pipeline (pl.ANY + make_async_copy) to reuse overlapping
    # rows in VMEM instead of streaming a 9x K matrix from HBM.
    A = jnp.concatenate(cols, axis=1)                        # (M, 9*Cin) bf16
    w_mat = jnp.transpose(w, (2, 3, 1, 0)).reshape(9 * Cin, Cout)
    y = pallas_matmul(A, w_mat.astype(jnp.bfloat16))         # (M, Cout) f32
    return y.reshape(N, Ho, Wo, Cout)


def conv_transpose3x3_s2(x_nhwc, w):
    """ConvTranspose2d(Cin, Cout, 3, stride=2, padding=1, output_padding=1),
    bias-free, torch weight layout (Cin, Cout, 3, 3).  Stride-split into the
    4 output phases, all evaluated by ONE dense GEMM (K=4*Cin, N=4*Cout)."""
    N, H, W, Cin = x_nhwc.shape
    Cout = w.shape[1]
    xp = jnp.pad(x_nhwc.astype(jnp.bfloat16), ((0, 0), (0, 1), (0, 1), (0, 0)))
    cols = []
    for dh in (0, 1):
        for dw in (0, 1):
            cols.append(xp[:, dh:dh + H, dw:dw + W, :].reshape(N * H * W, Cin))
    A = jnp.concatenate(cols, axis=1)                        # (M, 4*Cin) bf16

    # W_all[(dh*2+dw)*Cin + ci, (ph*2+pw)*Cout + co] maps x[m+dh, j+dw, ci]
    # to out[2m+ph, 2j+pw, co];  derived from oh = 2*ih - 1 + kh (pad=1, s=2).
    Wm = jnp.zeros((4, Cin, 4, Cout), jnp.float32)
    wk = lambda kh, kw: w[:, :, kh, kw]                      # (Cin, Cout)
    Wm = Wm.at[0, :, 0, :].set(wk(1, 1))                     # even row / even col
    Wm = Wm.at[1, :, 1, :].set(wk(1, 0))                     # even row / odd col
    Wm = Wm.at[0, :, 1, :].set(wk(1, 2))
    Wm = Wm.at[2, :, 2, :].set(wk(0, 1))                     # odd row / even col
    Wm = Wm.at[0, :, 2, :].set(wk(2, 1))
    Wm = Wm.at[3, :, 3, :].set(wk(0, 0))                     # odd row / odd col
    Wm = Wm.at[2, :, 3, :].set(wk(0, 2))
    Wm = Wm.at[1, :, 3, :].set(wk(2, 0))
    Wm = Wm.at[0, :, 3, :].set(wk(2, 2))
    w_mat = Wm.reshape(4 * Cin, 4 * Cout).astype(jnp.bfloat16)

    y = pallas_matmul(A, w_mat)                              # (M, 4*Cout) f32
    y = y.reshape(N, H, W, 2, 2, Cout)                       # (..., ph, pw, co)
    y = jnp.transpose(y, (0, 1, 3, 2, 4, 5))                 # (N, H, ph, W, pw, co)
    return y.reshape(N, 2 * H, 2 * W, Cout)


# --------------------------- module forward ----------------------------------

def convbn_gn(x, w, gamma, beta, *, stride=1, relu=True):
    return group_norm(conv3x3(x, w, stride=stride), gamma, beta, relu=relu)


def hourglass2d_forward(x, p):
    """hourglass2d.forward(x, presqu=None, postsqu=None)."""
    out = convbn_gn(x, p['c1_w'], *p['c1_gn'], stride=2, relu=True)      # conv1
    pre = convbn_gn(out, p['c2_w'], *p['c2_gn'], stride=1, relu=True)    # conv2 (+ReLU, postsqu=None)
    out = convbn_gn(pre, p['c3_w'], *p['c3_gn'], stride=2, relu=True)    # conv3
    out = convbn_gn(out, p['c4_w'], *p['c4_gn'], stride=1, relu=True)    # conv4
    c5 = conv_transpose3x3_s2(out, p['c5_w'])                            # conv5
    post = group_norm(c5, *p['c5_gn'], relu=True, residual=pre)          # relu(GN(c5)+pre)
    c6 = conv_transpose3x3_s2(post, p['c6_w'])                           # conv6
    out = group_norm(c6, *p['c6_gn'], relu=False)
    return out, pre, post


def hourglass_bev_neck_forward(spatial_features, params):
    """spatial_features: (N, C_in, H, W) NCHW, same as the PyTorch module."""
    x = jnp.transpose(spatial_features, (0, 2, 3, 1))        # one-time NCHW->NHWC
    x = convbn_gn(x, params['rpn_w'], *params['rpn_gn'], stride=1, relu=True)
    prehg = x
    out, _, _ = hourglass2d_forward(x, params['hg'])
    return {
        'spatial_features': spatial_features,
        'spatial_features_2d_prehg': jnp.transpose(prehg, (0, 3, 1, 2)),
        'spatial_features_2d': jnp.transpose(out, (0, 3, 1, 2)),
    }


# --------------------------- parameter init ----------------------------------

def init_params(key, input_channels, num_channels):
    C, C2 = num_channels, 2 * num_channels
    ks = iter(jax.random.split(key, 32))

    def conv_w(cout, cin):
        return 0.05 * jax.random.normal(next(ks), (cout, cin, 3, 3), jnp.float32)

    def convT_w(cin, cout):
        return 0.05 * jax.random.normal(next(ks), (cin, cout, 3, 3), jnp.float32)

    def gn(c):
        g = 1.0 + 0.1 * jax.random.normal(next(ks), (c,), jnp.float32)
        b = 0.1 * jax.random.normal(next(ks), (c,), jnp.float32)
        return g, b

    return {
        'rpn_w': conv_w(C, input_channels), 'rpn_gn': gn(C),
        'hg': {
            'c1_w': conv_w(C2, C), 'c1_gn': gn(C2),
            'c2_w': conv_w(C2, C2), 'c2_gn': gn(C2),
            'c3_w': conv_w(C2, C2), 'c3_gn': gn(C2),
            'c4_w': conv_w(C2, C2), 'c4_gn': gn(C2),
            'c5_w': convT_w(C2, C2), 'c5_gn': gn(C2),
            'c6_w': convT_w(C2, C), 'c6_gn': gn(C),
        },
    }


if __name__ == "__main__":
    key = jax.random.PRNGKey(0)
    kx, kp = jax.random.split(key)

    # num_channels must be a multiple of 32 (GroupNorm(32, C) hard-coded)
    N, input_channels, num_channels = 2, 16, 32
    H = W = 16

    spatial_features = jax.random.normal(
        kx, (N, input_channels, H, W), jnp.float32)
    params = init_params(kp, input_channels, num_channels)

    fwd = jax.jit(hourglass_bev_neck_forward)
    out = fwd(spatial_features, params)
    out = jax.block_until_ready(out)

    prehg = out['spatial_features_2d_prehg']
    y = out['spatial_features_2d']
    assert prehg.shape == (N, num_channels, H, W)
    assert y.shape == (N, num_channels, H, W)
    assert y.dtype == jnp.float32
    assert bool(jnp.all(jnp.isfinite(prehg)))
    assert bool(jnp.all(jnp.isfinite(y)))
    print("KERNEL_OK")
</pallas_src>

<mosaic_0001>
module attributes {stable_mosaic.version = 11 : i64} {
  func.func @_matmul_kernel(%arg0: i32, %arg1: memref<512x144xbf16, #tpu.memory_space<vmem>>, %arg2: memref<144x32xbf16, #tpu.memory_space<vmem>>, %arg3: memref<512x32xf32, #tpu.memory_space<vmem>>) attributes {dimension_semantics = [#tpu.dimension_semantics<parallel>], iteration_bounds = array<i64: 1>, scalar_prefetch = 0 : i64, scratch_operands = 0 : i64, tpu.core_type = #tpu.core_type<tc>, window_params = [{transform_indices = @transform_0, window_bounds = array<i64: 512, 144>}, {pipeline_mode = #tpu.pipeline_mode<synchronous>, transform_indices = @transform_1, window_bounds = array<i64: 144, 32>}, {transform_indices = @transform_2, window_bounds = array<i64: 512, 32>}]} {
    %c0 = arith.constant 0 : index
    %c0_0 = arith.constant 0 : index
    %0 = vector.load %arg1[%c0, %c0_0] : memref<512x144xbf16, #tpu.memory_space<vmem>>, vector<512x144xbf16>
    %c0_1 = arith.constant 0 : index
    %c0_2 = arith.constant 0 : index
    %1 = vector.load %arg2[%c0_1, %c0_2] : memref<144x32xbf16, #tpu.memory_space<vmem>>, vector<144x32xbf16>
    %cst = arith.constant dense<0.000000e+00> : vector<512x32xf32>
    %2 = tpu.matmul %0, %1, %cst {dimension_numbers = #tpu.dot_dimension_numbers<[1], [0], [0], [1], [0, 0, 1, 1], [], []>} : vector<512x144xbf16>, vector<144x32xbf16>, vector<512x32xf32> -> vector<512x32xf32>
    %c0_3 = arith.constant 0 : index
    %c0_4 = arith.constant 0 : index
    %3 = vector.load %arg3[%c0_3, %c0_4] : memref<512x32xf32, #tpu.memory_space<vmem>>, vector<512x32xf32>
    tpu.vector_store %arg3[%c0_3, %c0_4], %2 {strides = array<i32>} : memref<512x32xf32, #tpu.memory_space<vmem>>, vector<512x32xf32>,
    return
  }
  func.func @transform_0(%arg0: i32) -> (i32, i32) {
    %c0_i32 = arith.constant 0 : i32
    %c0_i32_0 = arith.constant 0 : i32
    return %arg0, %c0_i32 : i32, i32
  }
  func.func @transform_1(%arg0: i32) -> (i32, i32) {
    %c0_i32 = arith.constant 0 : i32
    %c0_i32_0 = arith.constant 0 : i32
    %c0_i32_1 = arith.constant 0 : i32
    return %c0_i32, %c0_i32_0 : i32, i32
  }
  func.func @transform_2(%arg0: i32) -> (i32, i32) {
    %c0_i32 = arith.constant 0 : i32
    %c0_i32_0 = arith.constant 0 : i32
    return %arg0, %c0_i32 : i32, i32
  }
}

module attributes {stable_mosaic.version = 11 : i64} {
  func.func @_gn_stats_kernel(%arg0: i32, %arg1: i32, %arg2: memref<1x64x128xf32, #tpu.memory_space<vmem>>, %arg3: memref<1x8x128xf32, #tpu.memory_space<vmem>>, %arg4: memref<1x8x128xf32, #tpu.memory_space<vmem>>) attributes {dimension_semantics = [#tpu.dimension_semantics<parallel>, #tpu.dimension_semantics<arbitrary>], iteration_bounds = array<i64: 2, 1>, scalar_prefetch = 0 : i64, scratch_operands = 0 : i64, tpu.core_type = #tpu.core_type<tc>, window_params = [{transform_indices = @transform_0, window_bounds = array<i64: 1, 64, 128>}, {transform_indices = @transform_1, window_bounds = array<i64: 1, 8, 128>}, {transform_indices = @transform_2, window_bounds = array<i64: 1, 8, 128>}]} {
    %c0_i32 = arith.constant 0 : i32
    %0 = arith.cmpi eq, %arg1, %c0_i32 : i32
    %1 = arith.extui %0 : i1 to i32
    %c0_i32_0 = arith.constant 0 : i32
    %2 = arith.cmpi ne, %1, %c0_i32_0 : i32
    scf.if %2 {
      %cst_16 = arith.constant 0.000000e+00 : f32
      %17 = vector.broadcast %cst_16 : f32 to vector<1x8x128xf32>
      %c0_17 = arith.constant 0 : index
      %c0_18 = arith.constant 0 : index
      %c0_19 = arith.constant 0 : index
      %18 = vector.load %arg3[%c0_17, %c0_18, %c0_19] : memref<1x8x128xf32, #tpu.memory_space<vmem>>, vector<1x8x128xf32>
      tpu.vector_store %arg3[%c0_17, %c0_18, %c0_19], %17 {strides = array<i32>} : memref<1x8x128xf32, #tpu.memory_space<vmem>>, vector<1x8x128xf32>,
      %cst_20 = arith.constant 0.000000e+00 : f32
      %19 = vector.broadcast %cst_20 : f32 to vector<1x8x128xf32>
      %c0_21 = arith.constant 0 : index
      %c0_22 = arith.constant 0 : index
      %c0_23 = arith.constant 0 : index
      %20 = vector.load %arg4[%c0_21, %c0_22, %c0_23] : memref<1x8x128xf32, #tpu.memory_space<vmem>>, vector<1x8x128xf32>
      tpu.vector_store %arg4[%c0_21, %c0_22, %c0_23], %19 {strides = array<i32>} : memref<1x8x128xf32, #tpu.memory_space<vmem>>, vector<1x8x128xf32>,
    } else {
    }
    %c0 = arith.constant 0 : index
    %c0_1 = arith.constant 0 : index
    %c0_2 = arith.constant 0 : index
    %3 = vector.load %arg2[%c0, %c0_1, %c0_2] : memref<1x64x128xf32, #tpu.memory_space<vmem>>, vector<1x64x128xf32>
    %c0_3 = arith.constant 0 : index
    %c0_4 = arith.constant 0 : index
    %c0_5 = arith.constant 0 : index
    %4 = vector.load %arg3[%c0_3, %c0_4, %c0_5] : memref<1x8x128xf32, #tpu.memory_space<vmem>>, vector<1x8x128xf32>
    %cst = arith.constant dense<0.000000e+00> : vector<1x128xf32>
    %5 = vector.multi_reduction <add>, %3, %cst [1] : vector<1x64x128xf32> to vector<1x128xf32>
    %6 = vector.shape_cast %5 : vector<1x128xf32> to vector<1x1x128xf32>
    %7 = vector.broadcast %6 : vector<1x1x128xf32> to vector<1x8x128xf32>
    %8 = arith.addf %4, %7 : vector<1x8x128xf32>
    %c0_6 = arith.constant 0 : index
    %c0_7 = arith.constant 0 : index
    %c0_8 = arith.constant 0 : index
    %9 = vector.load %arg3[%c0_6, %c0_7, %c0_8] : memref<1x8x128xf32, #tpu.memory_space<vmem>>, vector<1x8x128xf32>
    tpu.vector_store %arg3[%c0_6, %c0_7, %c0_8], %8 {strides = array<i32>} : memref<1x8x128xf32, #tpu.memory_space<vmem>>, vector<1x8x128xf32>,
    %c0_9 = arith.constant 0 : index
    %c0_10 = arith.constant 0 : index
    %c0_11 = arith.constant 0 : index
    %10 = vector.load %arg4[%c0_9, %c0_10, %c0_11] : memref<1x8x128xf32, #tpu.memory_space<vmem>>, vector<1x8x128xf32>
    %11 = arith.mulf %3, %3 : vector<1x64x128xf32>
    %cst_12 = arith.constant dense<0.000000e+00> : vector<1x128xf32>
    %12 = vector.multi_reduction <add>, %11, %cst_12 [1] : vector<1x64x128xf32> to vector<1x128xf32>
    %13 = vector.shape_cast %12 : vector<1x128xf32> to vector<1x1x128xf32>
    %14 = vector.broadcast %13 : vector<1x1x128xf32> to vector<1x8x128xf32>
    %15 = arith.addf %10, %14 : vector<1x8x128xf32>
    %c0_13 = arith.constant 0 : index
    %c0_14 = arith.constant 0 : index
    %c0_15 = arith.constant 0 : index
    %16 = vector.load %arg4[%c0_13, %c0_14, %c0_15] : memref<1x8x128xf32, #tpu.memory_space<vmem>>, vector<1x8x128xf32>
    tpu.vector_store %arg4[%c0_13, %c0_14, %c0_15], %15 {strides = array<i32>} : memref<1x8x128xf32, #tpu.memory_space<vmem>>, vector<1x8x128xf32>,
    return
  }
  func.func @transform_0(%arg0: i32, %arg1: i32) -> (i32, i32, i32) {
    %c0_i32 = arith.constant 0 : i32
    %c0_i32_0 = arith.constant 0 : i32
    return %arg0, %arg1, %c0_i32 : i32, i32, i32
  }
  func.func @transform_1(%arg0: i32, %arg1: i32) -> (i32, i32, i32) {
    %c0_i32 = arith.constant 0 : i32
    %c0_i32_0 = arith.constant 0 : i32
    %c0_i32_1 = arith.constant 0 : i32
    return %arg0, %c0_i32, %c0_i32_0 : i32, i32, i32
  }
  func.func @transform_2(%arg0: i32, %arg1: i32) -> (i32, i32, i32) {
    %c0_i32 = arith.constant 0 : i32
    %c0_i32_0 = arith.constant 0 : i32
    %c0_i32_1 = arith.constant 0 : i32
    return %arg0, %c0_i32, %c0_i32_0 : i32, i32, i32
  }
}

module attributes {stable_mosaic.version = 11 : i64} {
  func.func @_gn_apply_kernel(%arg0: i32, %arg1: i32, %arg2: memref<1x64x128xf32, #tpu.memory_space<vmem>>, %arg3: memref<1x8x128xf32, #tpu.memory_space<vmem>>, %arg4: memref<1x8x128xf32, #tpu.memory_space<vmem>>, %arg5: memref<1x64x128xf32, #tpu.memory_space<vmem>>) attributes {dimension_semantics = [#tpu.dimension_semantics<parallel>, #tpu.dimension_semantics<parallel>], iteration_bounds = array<i64: 2, 1>, scalar_prefetch = 0 : i64, scratch_operands = 0 : i64, tpu.core_type = #tpu.core_type<tc>, window_params = [{transform_indices = @transform_0, window_bounds = array<i64: 1, 64, 128>}, {transform_indices = @transform_1, window_bounds = array<i64: 1, 8, 128>}, {transform_indices = @transform_2, window_bounds = array<i64: 1, 8, 128>}, {transform_indices = @transform_3, window_bounds = array<i64: 1, 64, 128>}]} {
    %c0 = arith.constant 0 : index
    %c0_0 = arith.constant 0 : index
    %c0_1 = arith.constant 0 : index
    %0 = vector.load %arg2[%c0, %c0_0, %c0_1] : memref<1x64x128xf32, #tpu.memory_space<vmem>>, vector<1x64x128xf32>
    %c0_2 = arith.constant 0 : index
    %c0_3 = arith.constant 0 : index
    %c0_4 = arith.constant 0 : index
    %1 = vector.load %arg3[%c0_2, %c0_3, %c0_4] : memref<1x8x128xf32, #tpu.memory_space<vmem>>, vector<1x1x128xf32>
    %2 = vector.broadcast %1 : vector<1x1x128xf32> to vector<1x64x128xf32>
    %3 = arith.mulf %0, %2 : vector<1x64x128xf32>
    %c0_5 = arith.constant 0 : index
    %c0_6 = arith.constant 0 : index
    %c0_7 = arith.constant 0 : index
    %4 = vector.load %arg4[%c0_5, %c0_6, %c0_7] : memref<1x8x128xf32, #tpu.memory_space<vmem>>, vector<1x1x128xf32>
    %5 = vector.broadcast %4 : vector<1x1x128xf32> to vector<1x64x128xf32>
    %6 = arith.addf %3, %5 : vector<1x64x128xf32>
    %cst = arith.constant 0.000000e+00 : f32
    %7 = vector.broadcast %cst : f32 to vector<1x64x128xf32>
    %8 = arith.maximumf %6, %7 : vector<1x64x128xf32>
    %c0_8 = arith.constant 0 : index
    %c0_9 = arith.constant 0 : index
    %c0_10 = arith.constant 0 : index
    %9 = vector.load %arg5[%c0_8, %c0_9, %c0_10] : memref<1x64x128xf32, #tpu.memory_space<vmem>>, vector<1x64x128xf32>
    tpu.vector_store %arg5[%c0_8, %c0_9, %c0_10], %8 {strides = array<i32>} : memref<1x64x128xf32, #tpu.memory_space<vmem>>, vector<1x64x128xf32>,
    return
  }
  func.func @transform_0(%arg0: i32, %arg1: i32) -> (i32, i32, i32) {
    %c0_i32 = arith.constant 0 : i32
    %c0_i32_0 = arith.constant 0 : i32
    return %arg0, %arg1, %c0_i32 : i32, i32, i32
  }
  func.func @transform_1(%arg0: i32, %arg1: i32) -> (i32, i32, i32) {
    %c0_i32 = arith.constant 0 : i32
    %c0_i32_0 = arith.constant 0 : i32
    %c0_i32_1 = arith.constant 0 : i32
    return %arg0, %c0_i32, %c0_i32_0 : i32, i32, i32
  }
  func.func @transform_2(%arg0: i32, %arg1: i32) -> (i32, i32, i32) {
    %c0_i32 = arith.constant 0 : i32
    %c0_i32_0 = arith.constant 0 : i32
    %c0_i32_1 = arith.constant 0 : i32
    return %arg0, %c0_i32, %c0_i32_0 : i32, i32, i32
  }
  func.func @transform_3(%arg0: i32, %arg1: i32) -> (i32, i32, i32) {
    %c0_i32 = arith.constant 0 : i32
    %c0_i32_0 = arith.constant 0 : i32
    return %arg0, %arg1, %c0_i32 : i32, i32, i32
  }
}

module attributes {stable_mosaic.version = 11 : i64} {
  func.func @_matmul_kernel(%arg0: i32, %arg1: memref<128x288xbf16, #tpu.memory_space<vmem>>, %arg2: memref<288x64xbf16, #tpu.memory_space<vmem>>, %arg3: memref<128x64xf32, #tpu.memory_space<vmem>>) attributes {dimension_semantics = [#tpu.dimension_semantics<parallel>], iteration_bounds = array<i64: 1>, scalar_prefetch = 0 : i64, scratch_operands = 0 : i64, tpu.core_type = #tpu.core_type<tc>, window_params = [{transform_indices = @transform_0, window_bounds = array<i64: 128, 288>}, {pipeline_mode = #tpu.pipeline_mode<synchronous>, transform_indices = @transform_1, window_bounds = array<i64: 288, 64>}, {transform_indices = @transform_2, window_bounds = array<i64: 128, 64>}]} {
    %c0 = arith.constant 0 : index
    %c0_0 = arith.constant 0 : index
    %0 = vector.load %arg1[%c0, %c0_0] : memref<128x288xbf16, #tpu.memory_space<vmem>>, vector<128x288xbf16>
    %c0_1 = arith.constant 0 : index
    %c0_2 = arith.constant 0 : index
    %1 = vector.load %arg2[%c0_1, %c0_2] : memref<288x64xbf16, #tpu.memory_space<vmem>>, vector<288x64xbf16>
    %cst = arith.constant dense<0.000000e+00> : vector<128x64xf32>
    %2 = tpu.matmul %0, %1, %cst {dimension_numbers = #tpu.dot_dimension_numbers<[1], [0], [0], [1], [0, 0, 1, 1], [], []>} : vector<128x288xbf16>, vector<288x64xbf16>, vector<128x64xf32> -> vector<128x64xf32>
    %c0_3 = arith.constant 0 : index
    %c0_4 = arith.constant 0 : index
    %3 = vector.load %arg3[%c0_3, %c0_4] : memref<128x64xf32, #tpu.memory_space<vmem>>, vector<128x64xf32>
    tpu.vector_store %arg3[%c0_3, %c0_4], %2 {strides = array<i32>} : memref<128x64xf32, #tpu.memory_space<vmem>>, vector<128x64xf32>,
    return
  }
  func.func @transform_0(%arg0: i32) -> (i32, i32) {
    %c0_i32 = arith.constant 0 : i32
    %c0_i32_0 = arith.constant 0 : i32
    return %arg0, %c0_i32 : i32, i32
  }
  func.func @transform_1(%arg0: i32) -> (i32, i32) {
    %c0_i32 = arith.constant 0 : i32
    %c0_i32_0 = arith.constant 0 : i32
    %c0_i32_1 = arith.constant 0 : i32
    return %c0_i32, %c0_i32_0 : i32, i32
  }
  func.func @transform_2(%arg0: i32) -> (i32, i32) {
    %c0_i32 = arith.constant 0 : i32
    %c0_i32_0 = arith.constant 0 : i32
    return %arg0, %c0_i32 : i32, i32
  }
}

module attributes {stable_mosaic.version = 11 : i64} {
  func.func @_gn_stats_kernel(%arg0: i32, %arg1: i32, %arg2: memref<1x32x128xf32, #tpu.memory_space<vmem>>, %arg3: memref<1x8x128xf32, #tpu.memory_space<vmem>>, %arg4: memref<1x8x128xf32, #tpu.memory_space<vmem>>) attributes {dimension_semantics = [#tpu.dimension_semantics<parallel>, #tpu.dimension_semantics<arbitrary>], iteration_bounds = array<i64: 2, 1>, scalar_prefetch = 0 : i64, scratch_operands = 0 : i64, tpu.core_type = #tpu.core_type<tc>, window_params = [{transform_indices = @transform_0, window_bounds = array<i64: 1, 32, 128>}, {transform_indices = @transform_1, window_bounds = array<i64: 1, 8, 128>}, {transform_indices = @transform_2, window_bounds = array<i64: 1, 8, 128>}]} {
    %c0_i32 = arith.constant 0 : i32
    %0 = arith.cmpi eq, %arg1, %c0_i32 : i32
    %1 = arith.extui %0 : i1 to i32
    %c0_i32_0 = arith.constant 0 : i32
    %2 = arith.cmpi ne, %1, %c0_i32_0 : i32
    scf.if %2 {
      %cst_16 = arith.constant 0.000000e+00 : f32
      %17 = vector.broadcast %cst_16 : f32 to vector<1x8x128xf32>
      %c0_17 = arith.constant 0 : index
      %c0_18 = arith.constant 0 : index
      %c0_19 = arith.constant 0 : index
      %18 = vector.load %arg3[%c0_17, %c0_18, %c0_19] : memref<1x8x128xf32, #tpu.memory_space<vmem>>, vector<1x8x128xf32>
      tpu.vector_store %arg3[%c0_17, %c0_18, %c0_19], %17 {strides = array<i32>} : memref<1x8x128xf32, #tpu.memory_space<vmem>>, vector<1x8x128xf32>,
      %cst_20 = arith.constant 0.000000e+00 : f32
      %19 = vector.broadcast %cst_20 : f32 to vector<1x8x128xf32>
      %c0_21 = arith.constant 0 : index
      %c0_22 = arith.constant 0 : index
      %c0_23 = arith.constant 0 : index
      %20 = vector.load %arg4[%c0_21, %c0_22, %c0_23] : memref<1x8x128xf32, #tpu.memory_space<vmem>>, vector<1x8x128xf32>
      tpu.vector_store %arg4[%c0_21, %c0_22, %c0_23], %19 {strides = array<i32>} : memref<1x8x128xf32, #tpu.memory_space<vmem>>, vector<1x8x128xf32>,
    } else {
    }
    %c0 = arith.constant 0 : index
    %c0_1 = arith.constant 0 : index
    %c0_2 = arith.constant 0 : index
    %3 = vector.load %arg2[%c0, %c0_1, %c0_2] : memref<1x32x128xf32, #tpu.memory_space<vmem>>, vector<1x32x128xf32>
    %c0_3 = arith.constant 0 : index
    %c0_4 = arith.constant 0 : index
    %c0_5 = arith.constant 0 : index
    %4 = vector.load %arg3[%c0_3, %c0_4, %c0_5] : memref<1x8x128xf32, #tpu.memory_space<vmem>>, vector<1x8x128xf32>
    %cst = arith.constant dense<0.000000e+00> : vector<1x128xf32>
    %5 = vector.multi_reduction <add>, %3, %cst [1] : vector<1x32x128xf32> to vector<1x128xf32>
    %6 = vector.shape_cast %5 : vector<1x128xf32> to vector<1x1x128xf32>
    %7 = vector.broadcast %6 : vector<1x1x128xf32> to vector<1x8x128xf32>
    %8 = arith.addf %4, %7 : vector<1x8x128xf32>
    %c0_6 = arith.constant 0 : index
    %c0_7 = arith.constant 0 : index
    %c0_8 = arith.constant 0 : index
    %9 = vector.load %arg3[%c0_6, %c0_7, %c0_8] : memref<1x8x128xf32, #tpu.memory_space<vmem>>, vector<1x8x128xf32>
    tpu.vector_store %arg3[%c0_6, %c0_7, %c0_8], %8 {strides = array<i32>} : memref<1x8x128xf32, #tpu.memory_space<vmem>>, vector<1x8x128xf32>,
    %c0_9 = arith.constant 0 : index
    %c0_10 = arith.constant 0 : index
    %c0_11 = arith.constant 0 : index
    %10 = vector.load %arg4[%c0_9, %c0_10, %c0_11] : memref<1x8x128xf32, #tpu.memory_space<vmem>>, vector<1x8x128xf32>
    %11 = arith.mulf %3, %3 : vector<1x32x128xf32>
    %cst_12 = arith.constant dense<0.000000e+00> : vector<1x128xf32>
    %12 = vector.multi_reduction <add>, %11, %cst_12 [1] : vector<1x32x128xf32> to vector<1x128xf32>
    %13 = vector.shape_cast %12 : vector<1x128xf32> to vector<1x1x128xf32>
    %14 = vector.broadcast %13 : vector<1x1x128xf32> to vector<1x8x128xf32>
    %15 = arith.addf %10, %14 : vector<1x8x128xf32>
    %c0_13 = arith.constant 0 : index
    %c0_14 = arith.constant 0 : index
    %c0_15 = arith.constant 0 : index
    %16 = vector.load %arg4[%c0_13, %c0_14, %c0_15] : memref<1x8x128xf32, #tpu.memory_space<vmem>>, vector<1x8x128xf32>
    tpu.vector_store %arg4[%c0_13, %c0_14, %c0_15], %15 {strides = array<i32>} : memref<1x8x128xf32, #tpu.memory_space<vmem>>, vector<1x8x128xf32>,
    return
  }
  func.func @transform_0(%arg0: i32, %arg1: i32) -> (i32, i32, i32) {
    %c0_i32 = arith.constant 0 : i32
    %c0_i32_0 = arith.constant 0 : i32
    return %arg0, %arg1, %c0_i32 : i32, i32, i32
  }
  func.func @transform_1(%arg0: i32, %arg1: i32) -> (i32, i32, i32) {
    %c0_i32 = arith.constant 0 : i32
    %c0_i32_0 = arith.constant 0 : i32
    %c0_i32_1 = arith.constant 0 : i32
    return %arg0, %c0_i32, %c0_i32_0 : i32, i32, i32
  }
  func.func @transform_2(%arg0: i32, %arg1: i32) -> (i32, i32, i32) {
    %c0_i32 = arith.constant 0 : i32
    %c0_i32_0 = arith.constant 0 : i32
    %c0_i32_1 = arith.constant 0 : i32
    return %arg0, %c0_i32, %c0_i32_0 : i32, i32, i32
  }
}

module attributes {stable_mosaic.version = 11 : i64} {
  func.func @_gn_apply_kernel(%arg0: i32, %arg1: i32, %arg2: memref<1x32x128xf32, #tpu.memory_space<vmem>>, %arg3: memref<1x8x128xf32, #tpu.memory_space<vmem>>, %arg4: memref<1x8x128xf32, #tpu.memory_space<vmem>>, %arg5: memref<1x32x128xf32, #tpu.memory_space<vmem>>) attributes {dimension_semantics = [#tpu.dimension_semantics<parallel>, #tpu.dimension_semantics<parallel>], iteration_bounds = array<i64: 2, 1>, scalar_prefetch = 0 : i64, scratch_operands = 0 : i64, tpu.core_type = #tpu.core_type<tc>, window_params = [{transform_indices = @transform_0, window_bounds = array<i64: 1, 32, 128>}, {transform_indices = @transform_1, window_bounds = array<i64: 1, 8, 128>}, {transform_indices = @transform_2, window_bounds = array<i64: 1, 8, 128>}, {transform_indices = @transform_3, window_bounds = array<i64: 1, 32, 128>}]} {
    %c0 = arith.constant 0 : index
    %c0_0 = arith.constant 0 : index
    %c0_1 = arith.constant 0 : index
    %0 = vector.load %arg2[%c0, %c0_0, %c0_1] : memref<1x32x128xf32, #tpu.memory_space<vmem>>, vector<1x32x128xf32>
    %c0_2 = arith.constant 0 : index
    %c0_3 = arith.constant 0 : index
    %c0_4 = arith.constant 0 : index
    %1 = vector.load %arg3[%c0_2, %c0_3, %c0_4] : memref<1x8x128xf32, #tpu.memory_space<vmem>>, vector<1x1x128xf32>
    %2 = vector.broadcast %1 : vector<1x1x128xf32> to vector<1x32x128xf32>
    %3 = arith.mulf %0, %2 : vector<1x32x128xf32>
    %c0_5 = arith.constant 0 : index
    %c0_6 = arith.constant 0 : index
    %c0_7 = arith.constant 0 : index
    %4 = vector.load %arg4[%c0_5, %c0_6, %c0_7] : memref<1x8x128xf32, #tpu.memory_space<vmem>>, vector<1x1x128xf32>
    %5 = vector.broadcast %4 : vector<1x1x128xf32> to vector<1x32x128xf32>
    %6 = arith.addf %3, %5 : vector<1x32x128xf32>
    %cst = arith.constant 0.000000e+00 : f32
    %7 = vector.broadcast %cst : f32 to vector<1x32x128xf32>
    %8 = arith.maximumf %6, %7 : vector<1x32x128xf32>
    %c0_8 = arith.constant 0 : index
    %c0_9 = arith.constant 0 : index
    %c0_10 = arith.constant 0 : index
    %9 = vector.load %arg5[%c0_8, %c0_9, %c0_10] : memref<1x32x128xf32, #tpu.memory_space<vmem>>, vector<1x32x128xf32>
    tpu.vector_store %arg5[%c0_8, %c0_9, %c0_10], %8 {strides = array<i32>} : memref<1x32x128xf32, #tpu.memory_space<vmem>>, vector<1x32x128xf32>,
    return
  }
  func.func @transform_0(%arg0: i32, %arg1: i32) -> (i32, i32, i32) {
    %c0_i32 = arith.constant 0 : i32
    %c0_i32_0 = arith.constant 0 : i32
    return %arg0, %arg1, %c0_i32 : i32, i32, i32
  }
  func.func @transform_1(%arg0: i32, %arg1: i32) -> (i32, i32, i32) {
    %c0_i32 = arith.constant 0 : i32
    %c0_i32_0 = arith.constant 0 : i32
    %c0_i32_1 = arith.constant 0 : i32
    return %arg0, %c0_i32, %c0_i32_0 : i32, i32, i32
  }
  func.func @transform_2(%arg0: i32, %arg1: i32) -> (i32, i32, i32) {
    %c0_i32 = arith.constant 0 : i32
    %c0_i32_0 = arith.constant 0 : i32
    %c0_i32_1 = arith.constant 0 : i32
    return %arg0, %c0_i32, %c0_i32_0 : i32, i32, i32
  }
  func.func @transform_3(%arg0: i32, %arg1: i32) -> (i32, i32, i32) {
    %c0_i32 = arith.constant 0 : i32
    %c0_i32_0 = arith.constant 0 : i32
    return %arg0, %arg1, %c0_i32 : i32, i32, i32
  }
}

module attributes {stable_mosaic.version = 11 : i64} {
  func.func @_matmul_kernel(%arg0: i32, %arg1: memref<128x576xbf16, #tpu.memory_space<vmem>>, %arg2: memref<576x64xbf16, #tpu.memory_space<vmem>>, %arg3: memref<128x64xf32, #tpu.memory_space<vmem>>) attributes {dimension_semantics = [#tpu.dimension_semantics<parallel>], iteration_bounds = array<i64: 1>, scalar_prefetch = 0 : i64, scratch_operands = 0 : i64, tpu.core_type = #tpu.core_type<tc>, window_params = [{transform_indices = @transform_0, window_bounds = array<i64: 128, 576>}, {pipeline_mode = #tpu.pipeline_mode<synchronous>, transform_indices = @transform_1, window_bounds = array<i64: 576, 64>}, {transform_indices = @transform_2, window_bounds = array<i64: 128, 64>}]} {
    %c0 = arith.constant 0 : index
    %c0_0 = arith.constant 0 : index
    %0 = vector.load %arg1[%c0, %c0_0] : memref<128x576xbf16, #tpu.memory_space<vmem>>, vector<128x576xbf16>
    %c0_1 = arith.constant 0 : index
    %c0_2 = arith.constant 0 : index
    %1 = vector.load %arg2[%c0_1, %c0_2] : memref<576x64xbf16, #tpu.memory_space<vmem>>, vector<576x64xbf16>
    %cst = arith.constant dense<0.000000e+00> : vector<128x64xf32>
    %2 = tpu.matmul %0, %1, %cst {dimension_numbers = #tpu.dot_dimension_numbers<[1], [0], [0], [1], [0, 0, 1, 1], [], []>} : vector<128x576xbf16>, vector<576x64xbf16>, vector<128x64xf32> -> vector<128x64xf32>
    %c0_3 = arith.constant 0 : index
    %c0_4 = arith.constant 0 : index
    %3 = vector.load %arg3[%c0_3, %c0_4] : memref<128x64xf32, #tpu.memory_space<vmem>>, vector<128x64xf32>
    tpu.vector_store %arg3[%c0_3, %c0_4], %2 {strides = array<i32>} : memref<128x64xf32, #tpu.memory_space<vmem>>, vector<128x64xf32>,
    return
  }
  func.func @transform_0(%arg0: i32) -> (i32, i32) {
    %c0_i32 = arith.constant 0 : i32
    %c0_i32_0 = arith.constant 0 : i32
    return %arg0, %c0_i32 : i32, i32
  }
  func.func @transform_1(%arg0: i32) -> (i32, i32) {
    %c0_i32 = arith.constant 0 : i32
    %c0_i32_0 = arith.constant 0 : i32
    %c0_i32_1 = arith.constant 0 : i32
    return %c0_i32, %c0_i32_0 : i32, i32
  }
  func.func @transform_2(%arg0: i32) -> (i32, i32) {
    %c0_i32 = arith.constant 0 : i32
    %c0_i32_0 = arith.constant 0 : i32
    return %arg0, %c0_i32 : i32, i32
  }
}

module attributes {stable_mosaic.version = 11 : i64} {
  func.func @_gn_stats_kernel(%arg0: i32, %arg1: i32, %arg2: memref<1x8x128xf32, #tpu.memory_space<vmem>>, %arg3: memref<1x8x128xf32, #tpu.memory_space<vmem>>, %arg4: memref<1x8x128xf32, #tpu.memory_space<vmem>>) attributes {dimension_semantics = [#tpu.dimension_semantics<parallel>, #tpu.dimension_semantics<arbitrary>], iteration_bounds = array<i64: 2, 1>, scalar_prefetch = 0 : i64, scratch_operands = 0 : i64, tpu.core_type = #tpu.core_type<tc>, window_params = [{transform_indices = @transform_0, window_bounds = array<i64: 1, 8, 128>}, {transform_indices = @transform_1, window_bounds = array<i64: 1, 8, 128>}, {transform_indices = @transform_2, window_bounds = array<i64: 1, 8, 128>}]} {
    %c0_i32 = arith.constant 0 : i32
    %0 = arith.cmpi eq, %arg1, %c0_i32 : i32
    %1 = arith.extui %0 : i1 to i32
    %c0_i32_0 = arith.constant 0 : i32
    %2 = arith.cmpi ne, %1, %c0_i32_0 : i32
    scf.if %2 {
      %cst_16 = arith.constant 0.000000e+00 : f32
      %17 = vector.broadcast %cst_16 : f32 to vector<1x8x128xf32>
      %c0_17 = arith.constant 0 : index
      %c0_18 = arith.constant 0 : index
      %c0_19 = arith.constant 0 : index
      %18 = vector.load %arg3[%c0_17, %c0_18, %c0_19] : memref<1x8x128xf32, #tpu.memory_space<vmem>>, vector<1x8x128xf32>
      tpu.vector_store %arg3[%c0_17, %c0_18, %c0_19], %17 {strides = array<i32>} : memref<1x8x128xf32, #tpu.memory_space<vmem>>, vector<1x8x128xf32>,
      %cst_20 = arith.constant 0.000000e+00 : f32
      %19 = vector.broadcast %cst_20 : f32 to vector<1x8x128xf32>
      %c0_21 = arith.constant 0 : index
      %c0_22 = arith.constant 0 : index
      %c0_23 = arith.constant 0 : index
      %20 = vector.load %arg4[%c0_21, %c0_22, %c0_23] : memref<1x8x128xf32, #tpu.memory_space<vmem>>, vector<1x8x128xf32>
      tpu.vector_store %arg4[%c0_21, %c0_22, %c0_23], %19 {strides = array<i32>} : memref<1x8x128xf32, #tpu.memory_space<vmem>>, vector<1x8x128xf32>,
    } else {
    }
    %c0 = arith.constant 0 : index
    %c0_1 = arith.constant 0 : index
    %c0_2 = arith.constant 0 : index
    %3 = vector.load %arg2[%c0, %c0_1, %c0_2] : memref<1x8x128xf32, #tpu.memory_space<vmem>>, vector<1x8x128xf32>
    %c0_3 = arith.constant 0 : index
    %c0_4 = arith.constant 0 : index
    %c0_5 = arith.constant 0 : index
    %4 = vector.load %arg3[%c0_3, %c0_4, %c0_5] : memref<1x8x128xf32, #tpu.memory_space<vmem>>, vector<1x8x128xf32>
    %cst = arith.constant dense<0.000000e+00> : vector<1x128xf32>
    %5 = vector.multi_reduction <add>, %3, %cst [1] : vector<1x8x128xf32> to vector<1x128xf32>
    %6 = vector.shape_cast %5 : vector<1x128xf32> to vector<1x1x128xf32>
    %7 = vector.broadcast %6 : vector<1x1x128xf32> to vector<1x8x128xf32>
    %8 = arith.addf %4, %7 : vector<1x8x128xf32>
    %c0_6 = arith.constant 0 : index
    %c0_7 = arith.constant 0 : index
    %c0_8 = arith.constant 0 : index
    %9 = vector.load %arg3[%c0_6, %c0_7, %c0_8] : memref<1x8x128xf32, #tpu.memory_space<vmem>>, vector<1x8x128xf32>
    tpu.vector_store %arg3[%c0_6, %c0_7, %c0_8], %8 {strides = array<i32>} : memref<1x8x128xf32, #tpu.memory_space<vmem>>, vector<1x8x128xf32>,
    %c0_9 = arith.constant 0 : index
    %c0_10 = arith.constant 0 : index
    %c0_11 = arith.constant 0 : index
    %10 = vector.load %arg4[%c0_9, %c0_10, %c0_11] : memref<1x8x128xf32, #tpu.memory_space<vmem>>, vector<1x8x128xf32>
    %11 = arith.mulf %3, %3 : vector<1x8x128xf32>
    %cst_12 = arith.constant dense<0.000000e+00> : vector<1x128xf32>
    %12 = vector.multi_reduction <add>, %11, %cst_12 [1] : vector<1x8x128xf32> to vector<1x128xf32>
    %13 = vector.shape_cast %12 : vector<1x128xf32> to vector<1x1x128xf32>
    %14 = vector.broadcast %13 : vector<1x1x128xf32> to vector<1x8x128xf32>
    %15 = arith.addf %10, %14 : vector<1x8x128xf32>
    %c0_13 = arith.constant 0 : index
    %c0_14 = arith.constant 0 : index
    %c0_15 = arith.constant 0 : index
    %16 = vector.load %arg4[%c0_13, %c0_14, %c0_15] : memref<1x8x128xf32, #tpu.memory_space<vmem>>, vector<1x8x128xf32>
    tpu.vector_store %arg4[%c0_13, %c0_14, %c0_15], %15 {strides = array<i32>} : memref<1x8x128xf32, #tpu.memory_space<vmem>>, vector<1x8x128xf32>,
    return
  }
  func.func @transform_0(%arg0: i32, %arg1: i32) -> (i32, i32, i32) {
    %c0_i32 = arith.constant 0 : i32
    %c0_i32_0 = arith.constant 0 : i32
    return %arg0, %arg1, %c0_i32 : i32, i32, i32
  }
  func.func @transform_1(%arg0: i32, %arg1: i32) -> (i32, i32, i32) {
    %c0_i32 = arith.constant 0 : i32
    %c0_i32_0 = arith.constant 0 : i32
    %c0_i32_1 = arith.constant 0 : i32
    return %arg0, %c0_i32, %c0_i32_0 : i32, i32, i32
  }
  func.func @transform_2(%arg0: i32, %arg1: i32) -> (i32, i32, i32) {
    %c0_i32 = arith.constant 0 : i32
    %c0_i32_0 = arith.constant 0 : i32
    %c0_i32_1 = arith.constant 0 : i32
    return %arg0, %c0_i32, %c0_i32_0 : i32, i32, i32
  }
}

module attributes {stable_mosaic.version = 11 : i64} {
  func.func @_matmul_kernel(%arg0: i32, %arg1: memref<32x576xbf16, #tpu.memory_space<vmem>>, %arg2: memref<576x64xbf16, #tpu.memory_space<vmem>>, %arg3: memref<32x64xf32, #tpu.memory_space<vmem>>) attributes {dimension_semantics = [#tpu.dimension_semantics<parallel>], iteration_bounds = array<i64: 1>, scalar_prefetch = 0 : i64, scratch_operands = 0 : i64, tpu.core_type = #tpu.core_type<tc>, window_params = [{transform_indices = @transform_0, window_bounds = array<i64: 32, 576>}, {pipeline_mode = #tpu.pipeline_mode<synchronous>, transform_indices = @transform_1, window_bounds = array<i64: 576, 64>}, {transform_indices = @transform_2, window_bounds = array<i64: 32, 64>}]} {
    %c0 = arith.constant 0 : index
    %c0_0 = arith.constant 0 : index
    %0 = vector.load %arg1[%c0, %c0_0] : memref<32x576xbf16, #tpu.memory_space<vmem>>, vector<32x576xbf16>
    %c0_1 = arith.constant 0 : index
    %c0_2 = arith.constant 0 : index
    %1 = vector.load %arg2[%c0_1, %c0_2] : memref<576x64xbf16, #tpu.memory_space<vmem>>, vector<576x64xbf16>
    %cst = arith.constant dense<0.000000e+00> : vector<32x64xf32>
    %2 = tpu.matmul %0, %1, %cst {dimension_numbers = #tpu.dot_dimension_numbers<[1], [0], [0], [1], [0, 0, 1, 1], [], []>} : vector<32x576xbf16>, vector<576x64xbf16>, vector<32x64xf32> -> vector<32x64xf32>
    %c0_3 = arith.constant 0 : index
    %c0_4 = arith.constant 0 : index
    %3 = vector.load %arg3[%c0_3, %c0_4] : memref<32x64xf32, #tpu.memory_space<vmem>>, vector<32x64xf32>
    tpu.vector_store %arg3[%c0_3, %c0_4], %2 {strides = array<i32>} : memref<32x64xf32, #tpu.memory_space<vmem>>, vector<32x64xf32>,
    return
  }
  func.func @transform_0(%arg0: i32) -> (i32, i32) {
    %c0_i32 = arith.constant 0 : i32
    %c0_i32_0 = arith.constant 0 : i32
    return %arg0, %c0_i32 : i32, i32
  }
  func.func @transform_1(%arg0: i32) -> (i32, i32) {
    %c0_i32 = arith.constant 0 : i32
    %c0_i32_0 = arith.constant 0 : i32
    %c0_i32_1 = arith.constant 0 : i32
    return %c0_i32, %c0_i32_0 : i32, i32
  }
  func.func @transform_2(%arg0: i32) -> (i32, i32) {
    %c0_i32 = arith.constant 0 : i32
    %c0_i32_0 = arith.constant 0 : i32
    return %arg0, %c0_i32 : i32, i32
  }
}

module attributes {stable_mosaic.version = 11 : i64} {
  func.func @_gn_apply_kernel(%arg0: i32, %arg1: i32, %arg2: memref<1x8x128xf32, #tpu.memory_space<vmem>>, %arg3: memref<1x8x128xf32, #tpu.memory_space<vmem>>, %arg4: memref<1x8x128xf32, #tpu.memory_space<vmem>>, %arg5: memref<1x8x128xf32, #tpu.memory_space<vmem>>) attributes {dimension_semantics = [#tpu.dimension_semantics<parallel>, #tpu.dimension_semantics<parallel>], iteration_bounds = array<i64: 2, 1>, scalar_prefetch = 0 : i64, scratch_operands = 0 : i64, tpu.core_type = #tpu.core_type<tc>, window_params = [{transform_indices = @transform_0, window_bounds = array<i64: 1, 8, 128>}, {transform_indices = @transform_1, window_bounds = array<i64: 1, 8, 128>}, {transform_indices = @transform_2, window_bounds = array<i64: 1, 8, 128>}, {transform_indices = @transform_3, window_bounds = array<i64: 1, 8, 128>}]} {
    %c0 = arith.constant 0 : index
    %c0_0 = arith.constant 0 : index
    %c0_1 = arith.constant 0 : index
    %0 = vector.load %arg2[%c0, %c0_0, %c0_1] : memref<1x8x128xf32, #tpu.memory_space<vmem>>, vector<1x8x128xf32>
    %c0_2 = arith.constant 0 : index
    %c0_3 = arith.constant 0 : index
    %c0_4 = arith.constant 0 : index
    %1 = vector.load %arg3[%c0_2, %c0_3, %c0_4] : memref<1x8x128xf32, #tpu.memory_space<vmem>>, vector<1x1x128xf32>
    %2 = vector.broadcast %1 : vector<1x1x128xf32> to vector<1x8x128xf32>
    %3 = arith.mulf %0, %2 : vector<1x8x128xf32>
    %c0_5 = arith.constant 0 : index
    %c0_6 = arith.constant 0 : index
    %c0_7 = arith.constant 0 : index
    %4 = vector.load %arg4[%c0_5, %c0_6, %c0_7] : memref<1x8x128xf32, #tpu.memory_space<vmem>>, vector<1x1x128xf32>
    %5 = vector.broadcast %4 : vector<1x1x128xf32> to vector<1x8x128xf32>
    %6 = arith.addf %3, %5 : vector<1x8x128xf32>
    %cst = arith.constant 0.000000e+00 : f32
    %7 = vector.broadcast %cst : f32 to vector<1x8x128xf32>
    %8 = arith.maximumf %6, %7 : vector<1x8x128xf32>
    %c0_8 = arith.constant 0 : index
    %c0_9 = arith.constant 0 : index
    %c0_10 = arith.constant 0 : index
    %9 = vector.load %arg5[%c0_8, %c0_9, %c0_10] : memref<1x8x128xf32, #tpu.memory_space<vmem>>, vector<1x8x128xf32>
    tpu.vector_store %arg5[%c0_8, %c0_9, %c0_10], %8 {strides = array<i32>} : memref<1x8x128xf32, #tpu.memory_space<vmem>>, vector<1x8x128xf32>,
    return
  }
  func.func @transform_0(%arg0: i32, %arg1: i32) -> (i32, i32, i32) {
    %c0_i32 = arith.constant 0 : i32
    %c0_i32_0 = arith.constant 0 : i32
    return %arg0, %arg1, %c0_i32 : i32, i32, i32
  }
  func.func @transform_1(%arg0: i32, %arg1: i32) -> (i32, i32, i32) {
    %c0_i32 = arith.constant 0 : i32
    %c0_i32_0 = arith.constant 0 : i32
    %c0_i32_1 = arith.constant 0 : i32
    return %arg0, %c0_i32, %c0_i32_0 : i32, i32, i32
  }
  func.func @transform_2(%arg0: i32, %arg1: i32) -> (i32, i32, i32) {
    %c0_i32 = arith.constant 0 : i32
    %c0_i32_0 = arith.constant 0 : i32
    %c0_i32_1 = arith.constant 0 : i32
    return %arg0, %c0_i32, %c0_i32_0 : i32, i32, i32
  }
  func.func @transform_3(%arg0: i32, %arg1: i32) -> (i32, i32, i32) {
    %c0_i32 = arith.constant 0 : i32
    %c0_i32_0 = arith.constant 0 : i32
    return %arg0, %arg1, %c0_i32 : i32, i32, i32
  }
}

module attributes {stable_mosaic.version = 11 : i64} {
  func.func @_matmul_kernel(%arg0: i32, %arg1: memref<32x256xbf16, #tpu.memory_space<vmem>>, %arg2: memref<256x256xbf16, #tpu.memory_space<vmem>>, %arg3: memref<32x256xf32, #tpu.memory_space<vmem>>) attributes {dimension_semantics = [#tpu.dimension_semantics<parallel>], iteration_bounds = array<i64: 1>, scalar_prefetch = 0 : i64, scratch_operands = 0 : i64, tpu.core_type = #tpu.core_type<tc>, window_params = [{transform_indices = @transform_0, window_bounds = array<i64: 32, 256>}, {pipeline_mode = #tpu.pipeline_mode<synchronous>, transform_indices = @transform_1, window_bounds = array<i64: 256, 256>}, {transform_indices = @transform_2, window_bounds = array<i64: 32, 256>}]} {
    %c0 = arith.constant 0 : index
    %c0_0 = arith.constant 0 : index
    %0 = vector.load %arg1[%c0, %c0_0] : memref<32x256xbf16, #tpu.memory_space<vmem>>, vector<32x256xbf16>
    %c0_1 = arith.constant 0 : index
    %c0_2 = arith.constant 0 : index
    %1 = vector.load %arg2[%c0_1, %c0_2] : memref<256x256xbf16, #tpu.memory_space<vmem>>, vector<256x256xbf16>
    %cst = arith.constant dense<0.000000e+00> : vector<32x256xf32>
    %2 = tpu.matmul %0, %1, %cst {dimension_numbers = #tpu.dot_dimension_numbers<[1], [0], [0], [1], [0, 0, 1, 1], [], []>} : vector<32x256xbf16>, vector<256x256xbf16>, vector<32x256xf32> -> vector<32x256xf32>
    %c0_3 = arith.constant 0 : index
    %c0_4 = arith.constant 0 : index
    %3 = vector.load %arg3[%c0_3, %c0_4] : memref<32x256xf32, #tpu.memory_space<vmem>>, vector<32x256xf32>
    tpu.vector_store %arg3[%c0_3, %c0_4], %2 {strides = array<i32>} : memref<32x256xf32, #tpu.memory_space<vmem>>, vector<32x256xf32>,
    return
  }
  func.func @transform_0(%arg0: i32) -> (i32, i32) {
    %c0_i32 = arith.constant 0 : i32
    %c0_i32_0 = arith.constant 0 : i32
    return %arg0, %c0_i32 : i32, i32
  }
  func.func @transform_1(%arg0: i32) -> (i32, i32) {
    %c0_i32 = arith.constant 0 : i32
    %c0_i32_0 = arith.constant 0 : i32
    %c0_i32_1 = arith.constant 0 : i32
    return %c0_i32, %c0_i32_0 : i32, i32
  }
  func.func @transform_2(%arg0: i32) -> (i32, i32) {
    %c0_i32 = arith.constant 0 : i32
    %c0_i32_0 = arith.constant 0 : i32
    return %arg0, %c0_i32 : i32, i32
  }
}

module attributes {stable_mosaic.version = 11 : i64} {
  func.func @_gn_apply_kernel(%arg0: i32, %arg1: i32, %arg2: memref<1x32x128xf32, #tpu.memory_space<vmem>>, %arg3: memref<1x32x128xf32, #tpu.memory_space<vmem>>, %arg4: memref<1x8x128xf32, #tpu.memory_space<vmem>>, %arg5: memref<1x8x128xf32, #tpu.memory_space<vmem>>, %arg6: memref<1x32x128xf32, #tpu.memory_space<vmem>>) attributes {dimension_semantics = [#tpu.dimension_semantics<parallel>, #tpu.dimension_semantics<parallel>], iteration_bounds = array<i64: 2, 1>, scalar_prefetch = 0 : i64, scratch_operands = 0 : i64, tpu.core_type = #tpu.core_type<tc>, window_params = [{transform_indices = @transform_0, window_bounds = array<i64: 1, 32, 128>}, {transform_indices = @transform_1, window_bounds = array<i64: 1, 32, 128>}, {transform_indices = @transform_2, window_bounds = array<i64: 1, 8, 128>}, {transform_indices = @transform_3, window_bounds = array<i64: 1, 8, 128>}, {transform_indices = @transform_4, window_bounds = array<i64: 1, 32, 128>}]} {
    %c0 = arith.constant 0 : index
    %c0_0 = arith.constant 0 : index
    %c0_1 = arith.constant 0 : index
    %0 = vector.load %arg2[%c0, %c0_0, %c0_1] : memref<1x32x128xf32, #tpu.memory_space<vmem>>, vector<1x32x128xf32>
    %c0_2 = arith.constant 0 : index
    %c0_3 = arith.constant 0 : index
    %c0_4 = arith.constant 0 : index
    %1 = vector.load %arg4[%c0_2, %c0_3, %c0_4] : memref<1x8x128xf32, #tpu.memory_space<vmem>>, vector<1x1x128xf32>
    %2 = vector.broadcast %1 : vector<1x1x128xf32> to vector<1x32x128xf32>
    %3 = arith.mulf %0, %2 : vector<1x32x128xf32>
    %c0_5 = arith.constant 0 : index
    %c0_6 = arith.constant 0 : index
    %c0_7 = arith.constant 0 : index
    %4 = vector.load %arg5[%c0_5, %c0_6, %c0_7] : memref<1x8x128xf32, #tpu.memory_space<vmem>>, vector<1x1x128xf32>
    %5 = vector.broadcast %4 : vector<1x1x128xf32> to vector<1x32x128xf32>
    %6 = arith.addf %3, %5 : vector<1x32x128xf32>
    %c0_8 = arith.constant 0 : index
    %c0_9 = arith.constant 0 : index
    %c0_10 = arith.constant 0 : index
    %7 = vector.load %arg3[%c0_8, %c0_9, %c0_10] : memref<1x32x128xf32, #tpu.memory_space<vmem>>, vector<1x32x128xf32>
    %8 = arith.addf %6, %7 : vector<1x32x128xf32>
    %cst = arith.constant 0.000000e+00 : f32
    %9 = vector.broadcast %cst : f32 to vector<1x32x128xf32>
    %10 = arith.maximumf %8, %9 : vector<1x32x128xf32>
    %c0_11 = arith.constant 0 : index
    %c0_12 = arith.constant 0 : index
    %c0_13 = arith.constant 0 : index
    %11 = vector.load %arg6[%c0_11, %c0_12, %c0_13] : memref<1x32x128xf32, #tpu.memory_space<vmem>>, vector<1x32x128xf32>
    tpu.vector_store %arg6[%c0_11, %c0_12, %c0_13], %10 {strides = array<i32>} : memref<1x32x128xf32, #tpu.memory_space<vmem>>, vector<1x32x128xf32>,
    return
  }
  func.func @transform_0(%arg0: i32, %arg1: i32) -> (i32, i32, i32) {
    %c0_i32 = arith.constant 0 : i32
    %c0_i32_0 = arith.constant 0 : i32
    return %arg0, %arg1, %c0_i32 : i32, i32, i32
  }
  func.func @transform_1(%arg0: i32, %arg1: i32) -> (i32, i32, i32) {
    %c0_i32 = arith.constant 0 : i32
    %c0_i32_0 = arith.constant 0 : i32
    return %arg0, %arg1, %c0_i32 : i32, i32, i32
  }
  func.func @transform_2(%arg0: i32, %arg1: i32) -> (i32, i32, i32) {
    %c0_i32 = arith.constant 0 : i32
    %c0_i32_0 = arith.constant 0 : i32
    %c0_i32_1 = arith.constant 0 : i32
    return %arg0, %c0_i32, %c0_i32_0 : i32, i32, i32
  }
  func.func @transform_3(%arg0: i32, %arg1: i32) -> (i32, i32, i32) {
    %c0_i32 = arith.constant 0 : i32
    %c0_i32_0 = arith.constant 0 : i32
    %c0_i32_1 = arith.constant 0 : i32
    return %arg0, %c0_i32, %c0_i32_0 : i32, i32, i32
  }
  func.func @transform_4(%arg0: i32, %arg1: i32) -> (i32, i32, i32) {
    %c0_i32 = arith.constant 0 : i32
    %c0_i32_0 = arith.constant 0 : i32
    return %arg0, %arg1, %c0_i32 : i32, i32, i32
  }
}

module attributes {stable_mosaic.version = 11 : i64} {
  func.func @_matmul_kernel(%arg0: i32, %arg1: memref<128x256xbf16, #tpu.memory_space<vmem>>, %arg2: memref<256x128xbf16, #tpu.memory_space<vmem>>, %arg3: memref<128x128xf32, #tpu.memory_space<vmem>>) attributes {dimension_semantics = [#tpu.dimension_semantics<parallel>], iteration_bounds = array<i64: 1>, scalar_prefetch = 0 : i64, scratch_operands = 0 : i64, tpu.core_type = #tpu.core_type<tc>, window_params = [{transform_indices = @transform_0, window_bounds = array<i64: 128, 256>}, {pipeline_mode = #tpu.pipeline_mode<synchronous>, transform_indices = @transform_1, window_bounds = array<i64: 256, 128>}, {transform_indices = @transform_2, window_bounds = array<i64: 128, 128>}]} {
    %c0 = arith.constant 0 : index
    %c0_0 = arith.constant 0 : index
    %0 = vector.load %arg1[%c0, %c0_0] : memref<128x256xbf16, #tpu.memory_space<vmem>>, vector<128x256xbf16>
    %c0_1 = arith.constant 0 : index
    %c0_2 = arith.constant 0 : index
    %1 = vector.load %arg2[%c0_1, %c0_2] : memref<256x128xbf16, #tpu.memory_space<vmem>>, vector<256x128xbf16>
    %cst = arith.constant dense<0.000000e+00> : vector<128x128xf32>
    %2 = tpu.matmul %0, %1, %cst {dimension_numbers = #tpu.dot_dimension_numbers<[1], [0], [0], [1], [0, 0, 1, 1], [], []>} : vector<128x256xbf16>, vector<256x128xbf16>, vector<128x128xf32> -> vector<128x128xf32>
    %c0_3 = arith.constant 0 : index
    %c0_4 = arith.constant 0 : index
    %3 = vector.load %arg3[%c0_3, %c0_4] : memref<128x128xf32, #tpu.memory_space<vmem>>, vector<128x128xf32>
    tpu.vector_store %arg3[%c0_3, %c0_4], %2 {strides = array<i32>} : memref<128x128xf32, #tpu.memory_space<vmem>>, vector<128x128xf32>,
    return
  }
  func.func @transform_0(%arg0: i32) -> (i32, i32) {
    %c0_i32 = arith.constant 0 : i32
    %c0_i32_0 = arith.constant 0 : i32
    return %arg0, %c0_i32 : i32, i32
  }
  func.func @transform_1(%arg0: i32) -> (i32, i32) {
    %c0_i32 = arith.constant 0 : i32
    %c0_i32_0 = arith.constant 0 : i32
    %c0_i32_1 = arith.constant 0 : i32
    return %c0_i32, %c0_i32_0 : i32, i32
  }
  func.func @transform_2(%arg0: i32) -> (i32, i32) {
    %c0_i32 = arith.constant 0 : i32
    %c0_i32_0 = arith.constant 0 : i32
    return %arg0, %c0_i32 : i32, i32
  }
}

module attributes {stable_mosaic.version = 11 : i64} {
  func.func @_gn_apply_kernel(%arg0: i32, %arg1: i32, %arg2: memref<1x64x128xf32, #tpu.memory_space<vmem>>, %arg3: memref<1x8x128xf32, #tpu.memory_space<vmem>>, %arg4: memref<1x8x128xf32, #tpu.memory_space<vmem>>, %arg5: memref<1x64x128xf32, #tpu.memory_space<vmem>>) attributes {dimension_semantics = [#tpu.dimension_semantics<parallel>, #tpu.dimension_semantics<parallel>], iteration_bounds = array<i64: 2, 1>, scalar_prefetch = 0 : i64, scratch_operands = 0 : i64, tpu.core_type = #tpu.core_type<tc>, window_params = [{transform_indices = @transform_0, window_bounds = array<i64: 1, 64, 128>}, {transform_indices = @transform_1, window_bounds = array<i64: 1, 8, 128>}, {transform_indices = @transform_2, window_bounds = array<i64: 1, 8, 128>}, {transform_indices = @transform_3, window_bounds = array<i64: 1, 64, 128>}]} {
    %c0 = arith.constant 0 : index
    %c0_0 = arith.constant 0 : index
    %c0_1 = arith.constant 0 : index
    %0 = vector.load %arg2[%c0, %c0_0, %c0_1] : memref<1x64x128xf32, #tpu.memory_space<vmem>>, vector<1x64x128xf32>
    %c0_2 = arith.constant 0 : index
    %c0_3 = arith.constant 0 : index
    %c0_4 = arith.constant 0 : index
    %1 = vector.load %arg3[%c0_2, %c0_3, %c0_4] : memref<1x8x128xf32, #tpu.memory_space<vmem>>, vector<1x1x128xf32>
    %2 = vector.broadcast %1 : vector<1x1x128xf32> to vector<1x64x128xf32>
    %3 = arith.mulf %0, %2 : vector<1x64x128xf32>
    %c0_5 = arith.constant 0 : index
    %c0_6 = arith.constant 0 : index
    %c0_7 = arith.constant 0 : index
    %4 = vector.load %arg4[%c0_5, %c0_6, %c0_7] : memref<1x8x128xf32, #tpu.memory_space<vmem>>, vector<1x1x128xf32>
    %5 = vector.broadcast %4 : vector<1x1x128xf32> to vector<1x64x128xf32>
    %6 = arith.addf %3, %5 : vector<1x64x128xf32>
    %c0_8 = arith.constant 0 : index
    %c0_9 = arith.constant 0 : index
    %c0_10 = arith.constant 0 : index
    %7 = vector.load %arg5[%c0_8, %c0_9, %c0_10] : memref<1x64x128xf32, #tpu.memory_space<vmem>>, vector<1x64x128xf32>
    tpu.vector_store %arg5[%c0_8, %c0_9, %c0_10], %6 {strides = array<i32>} : memref<1x64x128xf32, #tpu.memory_space<vmem>>, vector<1x64x128xf32>,
    return
  }
  func.func @transform_0(%arg0: i32, %arg1: i32) -> (i32, i32, i32) {
    %c0_i32 = arith.constant 0 : i32
    %c0_i32_0 = arith.constant 0 : i32
    return %arg0, %arg1, %c0_i32 : i32, i32, i32
  }
  func.func @transform_1(%arg0: i32, %arg1: i32) -> (i32, i32, i32) {
    %c0_i32 = arith.constant 0 : i32
    %c0_i32_0 = arith.constant 0 : i32
    %c0_i32_1 = arith.constant 0 : i32
    return %arg0, %c0_i32, %c0_i32_0 : i32, i32, i32
  }
  func.func @transform_2(%arg0: i32, %arg1: i32) -> (i32, i32, i32) {
    %c0_i32 = arith.constant 0 : i32
    %c0_i32_0 = arith.constant 0 : i32
    %c0_i32_1 = arith.constant 0 : i32
    return %arg0, %c0_i32, %c0_i32_0 : i32, i32, i32
  }
  func.func @transform_3(%arg0: i32, %arg1: i32) -> (i32, i32, i32) {
    %c0_i32 = arith.constant 0 : i32
    %c0_i32_0 = arith.constant 0 : i32
    return %arg0, %arg1, %c0_i32 : i32, i32, i32
  }
}

</mosaic_0001>

<bundles_post_ra>
// kernel: hourglass_bev_neck_forward.22
= control target key start
LH: loop header
LB: loop body
LE: loop exit
PB: predicated region body
PF: predicated region fallthrough
CT: control target
= control target key end

     0   :  { %s409_s9 = smov 0   ;;  %s411_s10 = smov 0   ;;  %s449_s0 = inlined_call_operand.vmem [shape: f32[2,64,128], index: 0, kind: input, shape index: {}]   ;;  %s450_s1 = inlined_call_operand.vmem [shape: f32[2,8,128], index: 1, kind: output, shape index: {0}]   ;;  %s451_s2 = inlined_call_operand.vmem [shape: f32[2,8,128], index: 2, kind: output, shape index: {1}]  }
   0x1   :  { %s413_s11 = smov 0  }
   0x2 LB: > { %s25_s12 = sadd.s32 1, %s388_s10  ;;  %p337_p0 = scmp.ge.s32.totalorder %s392_s11, 1  ;;  %s392_s11 = sphi %s413_s11, %s13_s11   ;;  %s388_s10 = sphi %s411_s10, %s453_s10   ;;  %s384_s9 = sphi %s409_s9, %s452_s9  }
   0x3   : > { %p27_p1 = scmp.ge.s32.totalorder %s25_s12, 2  ;;  %p134_p2 = scmp.lt.s32.totalorder %s392_s11, 3 }
   0x5   : > { %s455_s12 = smov (%p27_p1, %s25_s12), 0  ;;  %p135_p3 = pnand %p337_p0, %p134_p2 }
   0x6   : > { %p164_p4 = scmp.lt.s32.totalorder (!%p135_p3), %s384_s9, 1 }
   0x7   : > { %138 = sbr.rel (%p135_p3) target bundleno = 47 (0x2f), region = 24 }
   0xe   : > { %s457_s9 = smov (!%p164_p4, %s384_s9), 1 }
   0xf   : > { %s344_s13 = sshll.u32 %s457_s9, 6  ;;  %s340_s17 = sshll.u32 %s457_s9, 3 }
  0x10   : > { %s171_s16 = scalar_lea.vmem %s449_s0, %s344_s13  ;;  %s176_s20 = scalar_lea.vmem %s450_s1, %s340_s17 }
  0x11   : > { %v187_v0 = vld [vmem:[%s171_s16] sm:$0xff]  ;;  %v188_v1 = vld [vmem:[%s171_s16 + $0x8] sm:$0xff]  ;;  %v189_v2 = vld [vmem:[%s171_s16 + $0x10] sm:$0xff]  ;;  %s180_s23 = scalar_lea.vmem %s451_s2, %s340_s17 }
  0x12   : > { %v196_v3 = vadd.f32 %v188_v1, %v187_v0  ;;  %v212_v4 = vmul.f32 %v187_v0, %v187_v0  ;;  %v213_v5 = vmul.f32 %v188_v1, %v188_v1  ;;  %v214_v6 = vmul.f32 %v189_v2, %v189_v2  ;;  %v190_v7 = vld [vmem:[%s171_s16 + $0x18] sm:$0xff]  ;;  %v191_v8 = vld [vmem:[%s171_s16 + $0x20] sm:$0xff]  ;;  %v192_v12 = vld [vmem:[%s171_s16 + $0x28] sm:$0xff] }
  0x13   : > { %v215_v10 = vmul.f32 %v190_v7, %v190_v7  ;;  %v216_v14 = vmul.f32 %v191_v8, %v191_v8  ;;  %v193_v16 = vld [vmem:[%s171_s16 + $0x30] sm:$0xff]  ;;  %v217_v18 = vmul.f32 %v192_v12, %v192_v12  ;;  %v194_v20 = vld [vmem:[%s171_s16 + $0x38] sm:$0xff] }
  0x14   : > { %v197_v9 = vadd.f32 %v196_v3, %v189_v2  ;;  %v220_v11 = vadd.f32 %v213_v5, %v212_v4  ;;  %v218_v22 = vmul.f32 %v193_v16, %v193_v16  ;;  %v219_v25 = vmul.f32 %v194_v20, %v194_v20 }
  0x16   : > { %v198_v13 = vadd.f32 %v197_v9, %v190_v7  ;;  %v221_v15 = vadd.f32 %v220_v11, %v214_v6 }
  0x18   : > { %v199_v17 = vadd.f32 %v198_v13, %v191_v8  ;;  %v222_v19 = vadd.f32 %v221_v15, %v215_v10 }
  0x1a   : > { %v200_v21 = vadd.f32 %v199_v17, %v192_v12  ;;  %v223_v23 = vadd.f32 %v222_v19, %v216_v14 }
  0x1c   : > { %v201_v24 = vadd.f32 %v200_v21, %v193_v16  ;;  %v224_v26 = vadd.f32 %v223_v23, %v217_v18 }
  0x1e   : > { %v202_v27 = vadd.f32 %v201_v24, %v194_v20  ;;  %v225_v28 = vadd.f32 %v224_v26, %v218_v22 }
  0x20   : > { %v203_v29 = vrot.slane %v202_v27, 4  ;;  %v226_v30 = vadd.f32 %v225_v28, %v219_v25 }
  0x22   : > { %v204_v31 = vadd.f32 %v203_v29, %v202_v27  ;;  %v227_v32 = vrot.slane %v226_v30, 4 }
  0x24   : > { %v205_v33 = vrot.slane %v204_v31, 2  ;;  %v228_v34 = vadd.f32 %v227_v32, %v226_v30 }
  0x26   : > { %v206_v35 = vadd.f32 %v205_v33, %v204_v31  ;;  %v229_v36 = vrot.slane %v228_v34, 2 }
  0x28   : > { %v207_v37 = vrot.slane %v206_v35, 1  ;;  %v230_v38 = vadd.f32 %v229_v36, %v228_v34 }
  0x2a   : > { %v208_v39 = vadd.f32 %v207_v37, %v206_v35  ;;  %v231_v40 = vrot.slane %v230_v38, 1 }
  0x2c   : > { %v232_v41 = vadd.f32 %v231_v40, %v230_v38  ;;  %210 = vst [vmem:[%s176_s20] sm:$0xff] %v208_v39 }
  0x2e   : > { %234 = vst [vmem:[%s180_s23] sm:$0xff] %v232_v41 }
  0x2f PF: > { %s13_s11 = sadd.s32 1, %s392_s11   ;;  %s452_s9 = smov %s388_s10 }
  0x30   : > { %p10_p5 = scmp.ge.s32.totalorder %s13_s11, 4   ;;  %s453_s10 = smov %s455_s12 }
  0x32   :  { %12 = sbr.rel (!%p10_p5) target bundleno = 2 (0x2), region = 70 }

// kernel: squeeze.32
= control target key start
LH: loop header
LB: loop body
LE: loop exit
PB: predicated region body
PF: predicated region fallthrough
CT: control target
= control target key end

     0   :  { %s43_s8 = smov 32   ;;  %vm7_vm0 = vcmask 261120   ;;  %s44_s9 = smov 64   ;;  %s64_s0 = inlined_call_operand.vmem [shape: f32[2,128], index: 0, kind: input, shape index: {}]   ;;  %s65_s1 = inlined_call_operand.vmem [shape: f32[2,4,32], index: 1, kind: output, shape index: {}]  }
   0x1   :  { %v4_v0 = vld [vmem:[%s64_s0] sm:$0x3]  ;;  %s42_s0 = smov 96  }
   0x2   :  { %5 = vst [vmem:[#allocation1] sm:$0x3] %v4_v0 }
   0x9   :  { %v9_v1 = vld [vmem:[#allocation1] sm:$0x3]  }
   0xa   :  { %v21_v2 = vld [vmem:[#allocation1] sm:$0x3]   ;;  %10 = vrot.lane.b32.xlu0 %v9_v1, %s42_s0 }
   0xb   :  { %22 = vrot.lane.b32.xlu1 %v21_v2, %s43_s8  ;;  %v6_v3 = vld [vmem:[#allocation1] sm:$0x3]  }
   0xc   :  { %v15_v4 = vld [vmem:[#allocation1] sm:$0x3]   ;;  %8 = vst.msk [vmem:[#allocation0] ss:$8 sm:$0x3] %vm7_vm0, %v6_v3  }
   0xe   :  { %16 = vrot.lane.b32.xlu0 %v15_v4, %s44_s9 }
  0x7c   :  { %v11_v5 = vpop.permute.xlu0 %10  }
  0x7d   :  { %v23_v6 = vpop.permute.xlu1 %22   ;;  %14 = vst.msk [vmem:[#allocation0 + $0x1] ss:$8 sm:$0x3] %vm7_vm0, %v11_v5  }
  0x7e   :  { %26 = vst.msk [vmem:[#allocation0 + $0x3] ss:$8 sm:$0x3] %vm7_vm0, %v23_v6  }
  0x80   :  { %v17_v7 = vpop.permute.xlu0 %16  }
  0x81   :  { %20 = vst.msk [vmem:[#allocation0 + $0x2] ss:$8 sm:$0x3] %vm7_vm0, %v17_v7  }
  0x88   :  { %v30_v8 = vld [vmem:[#allocation0] sm:$0xf]  ;;  %v34_v9 = vld [vmem:[#allocation0 + $0x8] sm:$0xf] }
  0x89   :  { %32 = vst [vmem:[%s65_s1] sm:$0xf] %v30_v8  ;;  %38 = vst [vmem:[%s65_s1 + $0x4] sm:$0xf] %v34_v9 }

// kernel: hourglass_bev_neck_forward.21
= control target key start
LH: loop header
LB: loop body
LE: loop exit
PB: predicated region body
PF: predicated region fallthrough
CT: control target
= control target key end

     0   :  { %v1120_v0 = vmov 0   ;;  %vm436_vm0 = vcmask 130048   ;;  %vm822_vm1 = vcmask 261120   ;;  %s1643_s1 = inlined_call_operand.vmem [shape: bf16[144,32], index: 1, kind: input, shape index: {}]   ;;  %s1644_s0 = inlined_call_operand.vmem [shape: bf16[512,144], index: 0, kind: input, shape index: {}]   ;;  %s1645_s2 = inlined_call_operand.vmem [shape: f32[512,32], index: 2, kind: output, shape index: {}]  }
   0x1   :  { %533 = vmatprep.subr.bf16.mxu0 %v1120_v0  ;;  %996 = vmatprep.subr.bf16.mxu1 %v1120_v0  ;;  %v1015_v1 = vld [vmem:[%s1643_s1] sm:$0xff]   ;;  %v1016_v2 = vld [vmem:[%s1643_s1 + $0x8] sm:$0xff]   ;;  %v1017_v3 = vld [vmem:[%s1643_s1 + $0x10] sm:$0xff]  }
   0x2   :  { %534 = vmatpush1.bf16.msra.mxu0 %v1015_v1  ;;  %1005 = vmatpush1.bf16.msra.mxu1 %v1015_v1  ;;  %v1018_v4 = vld [vmem:[%s1643_s1 + $0x18] sm:$0xff]   ;;  %v1026_v5 = vld [vmem:[%s1644_s0 + $0x4] ss:$8 sps:$4 sm:$0xff]   ;;  %v1021_v9 = vld [vmem:[%s1643_s1 + $0x30] sm:$0xff]  }
   0x3   :  { %535 = vmatprep.subr.bf16.mxu0 %v1120_v0  ;;  %997 = vmatprep.subr.bf16.mxu1 %v1120_v0  ;;  %v1029_v6 = vld [vmem:[%s1644_s0 + $0x104] ss:$8 sps:$4 sm:$0xff]   ;;  %v1022_v10 = vld [vmem:[%s1643_s1 + $0x38] sm:$0xff]   ;;  %v1024_v12 = vld [vmem:[%s1644_s0] ss:$8 sps:$4 sm:$0xff]  }
   0x4   :  { %964 = vmatprep.mubr.msk.bf16.mxu0 %vm436_vm0, %v1026_v5  ;;  %980 = vmatprep.mubr.msk.bf16.mxu1 %vm436_vm0, %v1029_v6  ;;  %v1019_v7 = vld [vmem:[%s1643_s1 + $0x20] sm:$0xff]   ;;  %v1020_v8 = vld [vmem:[%s1643_s1 + $0x28] sm:$0xff]   ;;  %v1030_v14 = vld [vmem:[%s1644_s0 + $0x14] ss:$8 sps:$4 sm:$0xff]  }
   0x5   :  { %v1023_v11 = vld [vmem:[%s1643_s1 + $0x40] sm:$0xff]   ;;  %v1032_v15 = vld [vmem:[%s1644_s0 + $0x114] ss:$8 sps:$4 sm:$0xff]   ;;  %v1034_v16 = vld [vmem:[%s1644_s0 + $0x10] ss:$8 sps:$4 sm:$0xff]  }
   0x6   :  { %536 = vmatpush1.bf16.msra.mxu0 %v1016_v2  ;;  %1006 = vmatpush1.bf16.msra.mxu1 %v1016_v2  ;;  %v1027_v13 = vld [vmem:[%s1644_s0 + $0x100] ss:$8 sps:$4 sm:$0xff]   ;;  %v1035_v17 = vld [vmem:[%s1644_s0 + $0x110] ss:$8 sps:$4 sm:$0xff]   ;;  %v1036_v18 = vld [vmem:[%s1644_s0 + $0x24] ss:$8 sps:$4 sm:$0xff]  }
   0x7   :  { %537 = vmatprep.subr.bf16.mxu0 %v1120_v0  ;;  %998 = vmatprep.subr.bf16.mxu1 %v1120_v0  ;;  %v1038_v19 = vld [vmem:[%s1644_s0 + $0x124] ss:$8 sps:$4 sm:$0xff]   ;;  %v1040_v20 = vld [vmem:[%s1644_s0 + $0x20] ss:$8 sps:$4 sm:$0xff]   ;;  %v1042_v22 = vld [vmem:[%s1644_s0 + $0x34] ss:$8 sps:$4 sm:$0xff]  }
   0x8   :  { %v1041_v21 = vld [vmem:[%s1644_s0 + $0x120] ss:$8 sps:$4 sm:$0xff]   ;;  %v1044_v23 = vld [vmem:[%s1644_s0 + $0x134] ss:$8 sps:$4 sm:$0xff]   ;;  %v1046_v24 = vld [vmem:[%s1644_s0 + $0x30] ss:$8 sps:$4 sm:$0xff]  }
   0x9   :  { %v1047_v25 = vld [vmem:[%s1644_s0 + $0x130] ss:$8 sps:$4 sm:$0xff]   ;;  %v1048_v26 = vld [vmem:[%s1644_s0 + $0x44] ss:$8 sps:$4 sm:$0xff]   ;;  %v1052_v28 = vld [vmem:[%s1644_s0 + $0x40] ss:$8 sps:$4 sm:$0xff]  }
   0xa   :  { %538 = vmatpush1.bf16.msra.mxu0 %v1017_v3  ;;  %1007 = vmatpush1.bf16.msra.mxu1 %v1017_v3  ;;  %v1050_v27 = vld [vmem:[%s1644_s0 + $0x144] ss:$8 sps:$4 sm:$0xff]   ;;  %v1053_v29 = vld [vmem:[%s1644_s0 + $0x140] ss:$8 sps:$4 sm:$0xff]   ;;  %v1054_v30 = vld [vmem:[%s1644_s0 + $0x54] ss:$8 sps:$4 sm:$0xff]  }
   0xb   :  { %539 = vmatprep.subr.bf16.mxu0 %v1120_v0  ;;  %999 = vmatprep.subr.bf16.mxu1 %v1120_v0  ;;  %v1056_v31 = vld [vmem:[%s1644_s0 + $0x154] ss:$8 sps:$4 sm:$0xff]   ;;  %v1058_v32 = vld [vmem:[%s1644_s0 + $0x50] ss:$8 sps:$4 sm:$0xff]   ;;  %v1060_v34 = vld [vmem:[%s1644_s0 + $0x64] ss:$8 sps:$4 sm:$0xff]  }
   0xc   :  { %v1059_v33 = vld [vmem:[%s1644_s0 + $0x150] ss:$8 sps:$4 sm:$0xff]   ;;  %v1062_v35 = vld [vmem:[%s1644_s0 + $0x164] ss:$8 sps:$4 sm:$0xff]   ;;  %v1064_v36 = vld [vmem:[%s1644_s0 + $0x60] ss:$8 sps:$4 sm:$0xff]  }
   0xd   :  { %v1065_v37 = vld [vmem:[%s1644_s0 + $0x160] ss:$8 sps:$4 sm:$0xff]   ;;  %v1066_v38 = vld [vmem:[%s1644_s0 + $0x74] ss:$8 sps:$4 sm:$0xff]   ;;  %v1070_v40 = vld [vmem:[%s1644_s0 + $0x70] ss:$8 sps:$4 sm:$0xff]  }
   0xe   :  { %540 = vmatpush1.bf16.msra.mxu0 %v1018_v4  ;;  %1008 = vmatpush1.bf16.msra.mxu1 %v1018_v4  ;;  %v1068_v39 = vld [vmem:[%s1644_s0 + $0x174] ss:$8 sps:$4 sm:$0xff]   ;;  %v1071_v41 = vld [vmem:[%s1644_s0 + $0x170] ss:$8 sps:$4 sm:$0xff]   ;;  %v1072_v42 = vld [vmem:[%s1644_s0 + $0x84] ss:$8 sps:$4 sm:$0xff]  }
   0xf   :  { %541 = vmatprep.subr.bf16.mxu0 %v1120_v0  ;;  %1000 = vmatprep.subr.bf16.mxu1 %v1120_v0  ;;  %v1074_v43 = vld [vmem:[%s1644_s0 + $0x184] ss:$8 sps:$4 sm:$0xff]   ;;  %v1076_v44 = vld [vmem:[%s1644_s0 + $0x80] ss:$8 sps:$4 sm:$0xff]   ;;  %v1078_v46 = vld [vmem:[%s1644_s0 + $0x94] ss:$8 sps:$4 sm:$0xff]  }
  0x10   :  { %v1077_v45 = vld [vmem:[%s1644_s0 + $0x180] ss:$8 sps:$4 sm:$0xff]   ;;  %v1080_v47 = vld [vmem:[%s1644_s0 + $0x194] ss:$8 sps:$4 sm:$0xff]   ;;  %v1082_v48 = vld [vmem:[%s1644_s0 + $0x90] ss:$8 sps:$4 sm:$0xff]  }
  0x11   :  { %v1083_v49 = vld [vmem:[%s1644_s0 + $0x190] ss:$8 sps:$4 sm:$0xff]   ;;  %v1084_v50 = vld [vmem:[%s1644_s0 + $0xa4] ss:$8 sps:$4 sm:$0xff]   ;;  %v1088_v52 = vld [vmem:[%s1644_s0 + $0xa0] ss:$8 sps:$4 sm:$0xff]  }
  0x12   :  { %542 = vmatpush1.bf16.msra.mxu0 %v1019_v7  ;;  %1009 = vmatpush1.bf16.msra.mxu1 %v1019_v7  ;;  %v1086_v51 = vld [vmem:[%s1644_s0 + $0x1a4] ss:$8 sps:$4 sm:$0xff]   ;;  %v1089_v53 = vld [vmem:[%s1644_s0 + $0x1a0] ss:$8 sps:$4 sm:$0xff]   ;;  %v1090_v54 = vld [vmem:[%s1644_s0 + $0xb4] ss:$8 sps:$4 sm:$0xff]  }
  0x13   :  { %543 = vmatprep.subr.bf16.mxu0 %v1120_v0  ;;  %1001 = vmatprep.subr.bf16.mxu1 %v1120_v0  ;;  %v1092_v55 = vld [vmem:[%s1644_s0 + $0x1b4] ss:$8 sps:$4 sm:$0xff]   ;;  %v1094_v56 = vld [vmem:[%s1644_s0 + $0xb0] ss:$8 sps:$4 sm:$0xff]   ;;  %v1096_v58 = vld [vmem:[%s1644_s0 + $0xc4] ss:$8 sps:$4 sm:$0xff]  }
  0x14   :  { %v1095_v57 = vld [vmem:[%s1644_s0 + $0x1b0] ss:$8 sps:$4 sm:$0xff]   ;;  %v1098_v59 = vld [vmem:[%s1644_s0 + $0x1c4] ss:$8 sps:$4 sm:$0xff]   ;;  %v1100_v60 = vld [vmem:[%s1644_s0 + $0xc0] ss:$8 sps:$4 sm:$0xff]  }
  0x15   :  { %v1101_v61 = vld [vmem:[%s1644_s0 + $0x1c0] ss:$8 sps:$4 sm:$0xff]   ;;  %v1102_v62 = vld [vmem:[%s1644_s0 + $0xd4] ss:$8 sps:$4 sm:$0xff]   ;;  %v1107_v1 = vld [vmem:[%s1644_s0 + $0x1d0] ss:$8 sps:$4 sm:$0xff]  }
  0x16   :  { %544 = vmatpush1.bf16.msra.mxu0 %v1020_v8  ;;  %1010 = vmatpush1.bf16.msra.mxu1 %v1020_v8  ;;  %v1104_v63 = vld [vmem:[%s1644_s0 + $0x1d4] ss:$8 sps:$4 sm:$0xff]   ;;  %v1108_v2 = vld [vmem:[%s1644_s0 + $0xe4] ss:$8 sps:$4 sm:$0xff]   ;;  %v1112_v4 = vld [vmem:[%s1644_s0 + $0xe0] ss:$8 sps:$4 sm:$0xff]  }
  0x17   :  { %545 = vmatprep.subr.bf16.mxu0 %v1120_v0  ;;  %1002 = vmatprep.subr.bf16.mxu1 %v1120_v0  ;;  %v1110_v3 = vld [vmem:[%s1644_s0 + $0x1e4] ss:$8 sps:$4 sm:$0xff]   ;;  %v1113_v5 = vld [vmem:[%s1644_s0 + $0x1e0] ss:$8 sps:$4 sm:$0xff]   ;;  %v1114_v6 = vld [vmem:[%s1644_s0 + $0xf4] ss:$8 sps:$4 sm:$0xff]  }
  0x18   :  { %v1116_v7 = vld [vmem:[%s1644_s0 + $0x1f4] ss:$8 sps:$4 sm:$0xff]   ;;  %v1118_v8 = vld [vmem:[%s1644_s0 + $0xf0] ss:$8 sps:$4 sm:$0xff]  }
  0x1a   :  { %546 = vmatpush1.bf16.msra.mxu0 %v1021_v9  ;;  %1011 = vmatpush1.bf16.msra.mxu1 %v1021_v9  ;;  %v1119_v9 = vld [vmem:[%s1644_s0 + $0x1f0] ss:$8 sps:$4 sm:$0xff]  }
  0x1b   :  { %547 = vmatprep.subr.bf16.mxu0 %v1120_v0  ;;  %1003 = vmatprep.subr.bf16.mxu1 %v1120_v0 }
  0x1e   :  { %548 = vmatpush1.bf16.msra.mxu0 %v1022_v10  ;;  %1012 = vmatpush1.bf16.msra.mxu1 %v1022_v10 }
  0x1f   :  { %549 = vmatprep.subr.bf16.mxu0 %v1120_v0  ;;  %1004 = vmatprep.subr.bf16.mxu1 %v1120_v0  ;;  %v1106_v0 = vld [vmem:[%s1644_s0 + $0xd0] ss:$8 sps:$4 sm:$0xff]  }
  0x22   :  { %550 = vmatpush1.bf16.msra.mxu0 %v1023_v11  ;;  %1013 = vmatpush1.bf16.msra.mxu1 %v1023_v11 }
  0x25   :  { %566 = vmatmul.mubr.bf16.vlgmr.msra.gmra.mrb[0].mxu0 %v1024_v12  ;;  %694 = vmatmul.mubr.bf16.vlgmr.msra.gmra.mrb[0].mxu1 %v1027_v13 }
  0x26   :  { %965 = vmatprep.mubr.msk.bf16.mxu0 %vm436_vm0, %v1030_v14  ;;  %981 = vmatprep.mubr.msk.bf16.mxu1 %vm436_vm0, %v1032_v15 }
  0x2d   :  { %574 = vmatmul.mubr.bf16.gmra.mrb[4].mxu0 %v1034_v16  ;;  %702 = vmatmul.mubr.bf16.gmra.mrb[4].mxu1 %v1035_v17 }
  0x2e   :  { %966 = vmatprep.mubr.msk.bf16.mxu0 %vm436_vm0, %v1036_v18  ;;  %982 = vmatprep.mubr.msk.bf16.mxu1 %vm436_vm0, %v1038_v19 }
  0x35   :  { %582 = vmatmul.mubr.bf16.gmra.mrb[8].mxu0 %v1040_v20  ;;  %710 = vmatmul.mubr.bf16.gmra.mrb[8].mxu1 %v1041_v21 }
  0x36   :  { %967 = vmatprep.mubr.msk.bf16.mxu0 %vm436_vm0, %v1042_v22  ;;  %983 = vmatprep.mubr.msk.bf16.mxu1 %vm436_vm0, %v1044_v23 }
  0x3d   :  { %590 = vmatmul.mubr.bf16.gmra.mrb[12].mxu0 %v1046_v24  ;;  %718 = vmatmul.mubr.bf16.gmra.mrb[12].mxu1 %v1047_v25 }
  0x3e   :  { %968 = vmatprep.mubr.msk.bf16.mxu0 %vm436_vm0, %v1048_v26  ;;  %984 = vmatprep.mubr.msk.bf16.mxu1 %vm436_vm0, %v1050_v27 }
  0x45   :  { %598 = vmatmul.mubr.bf16.gmra.mrb[16].mxu0 %v1052_v28  ;;  %726 = vmatmul.mubr.bf16.gmra.mrb[16].mxu1 %v1053_v29 }
  0x46   :  { %969 = vmatprep.mubr.msk.bf16.mxu0 %vm436_vm0, %v1054_v30  ;;  %985 = vmatprep.mubr.msk.bf16.mxu1 %vm436_vm0, %v1056_v31 }
  0x4d   :  { %606 = vmatmul.mubr.bf16.gmra.mrb[20].mxu0 %v1058_v32  ;;  %734 = vmatmul.mubr.bf16.gmra.mrb[20].mxu1 %v1059_v33 }
  0x4e   :  { %970 = vmatprep.mubr.msk.bf16.mxu0 %vm436_vm0, %v1060_v34  ;;  %986 = vmatprep.mubr.msk.bf16.mxu1 %vm436_vm0, %v1062_v35 }
  0x55   :  { %614 = vmatmul.mubr.bf16.gmra.mrb[24].mxu0 %v1064_v36  ;;  %742 = vmatmul.mubr.bf16.gmra.mrb[24].mxu1 %v1065_v37 }
  0x56   :  { %971 = vmatprep.mubr.msk.bf16.mxu0 %vm436_vm0, %v1066_v38  ;;  %987 = vmatprep.mubr.msk.bf16.mxu1 %vm436_vm0, %v1068_v39 }
  0x5d   :  { %622 = vmatmul.mubr.bf16.gmra.mrb[28].mxu0 %v1070_v40  ;;  %750 = vmatmul.mubr.bf16.gmra.mrb[28].mxu1 %v1071_v41 }
  0x5e   :  { %972 = vmatprep.mubr.msk.bf16.mxu0 %vm436_vm0, %v1072_v42  ;;  %988 = vmatprep.mubr.msk.bf16.mxu1 %vm436_vm0, %v1074_v43 }
  0x65   :  { %630 = vmatmul.mubr.bf16.gmra.mrb[32].mxu0 %v1076_v44  ;;  %758 = vmatmul.mubr.bf16.gmra.mrb[32].mxu1 %v1077_v45 }
  0x66   :  { %973 = vmatprep.mubr.msk.bf16.mxu0 %vm436_vm0, %v1078_v46  ;;  %989 = vmatprep.mubr.msk.bf16.mxu1 %vm436_vm0, %v1080_v47 }
  0x6d   :  { %638 = vmatmul.mubr.bf16.gmra.mrb[36].mxu0 %v1082_v48  ;;  %766 = vmatmul.mubr.bf16.gmra.mrb[36].mxu1 %v1083_v49 }
  0x6e   :  { %974 = vmatprep.mubr.msk.bf16.mxu0 %vm436_vm0, %v1084_v50  ;;  %990 = vmatprep.mubr.msk.bf16.mxu1 %vm436_vm0, %v1086_v51 }
  0x75   :  { %646 = vmatmul.mubr.bf16.gmra.mrb[40].mxu0 %v1088_v52  ;;  %774 = vmatmul.mubr.bf16.gmra.mrb[40].mxu1 %v1089_v53 }
  0x76   :  { %975 = vmatprep.mubr.msk.bf16.mxu0 %vm436_vm0, %v1090_v54  ;;  %991 = vmatprep.mubr.msk.bf16.mxu1 %vm436_vm0, %v1092_v55 }
  0x7d   :  { %654 = vmatmul.mubr.bf16.gmra.mrb[44].mxu0 %v1094_v56  ;;  %782 = vmatmul.mubr.bf16.gmra.mrb[44].mxu1 %v1095_v57 }
  0x7e   :  { %976 = vmatprep.mubr.msk.bf16.mxu0 %vm436_vm0, %v1096_v58  ;;  %992 = vmatprep.mubr.msk.bf16.mxu1 %vm436_vm0, %v1098_v59 }
  0x85   :  { %662 = vmatmul.mubr.bf16.gmra.mrb[48].mxu0 %v1100_v60  ;;  %790 = vmatmul.mubr.bf16.gmra.mrb[48].mxu1 %v1101_v61 }
  0x86   :  { %977 = vmatprep.mubr.msk.bf16.mxu0 %vm436_vm0, %v1102_v62  ;;  %993 = vmatprep.mubr.msk.bf16.mxu1 %vm436_vm0, %v1104_v63 }
  0x8d   :  { %670 = vmatmul.mubr.bf16.gmra.mrb[52].mxu0 %v1106_v0  ;;  %798 = vmatmul.mubr.bf16.gmra.mrb[52].mxu1 %v1107_v1 }
  0x8e   :  { %978 = vmatprep.mubr.msk.bf16.mxu0 %vm436_vm0, %v1108_v2  ;;  %994 = vmatprep.mubr.msk.bf16.mxu1 %vm436_vm0, %v1110_v3 }
  0x95   :  { %678 = vmatmul.mubr.bf16.gmra.mrb[56].mxu0 %v1112_v4  ;;  %806 = vmatmul.mubr.bf16.gmra.mrb[56].mxu1 %v1113_v5 }
  0x96   :  { %979 = vmatprep.mubr.msk.bf16.mxu0 %vm436_vm0, %v1114_v6  ;;  %995 = vmatprep.mubr.msk.bf16.mxu1 %vm436_vm0, %v1116_v7 }
  0x9d   :  { %686 = vmatmul.mubr.bf16.gmra.mrb[60].mxu0 %v1118_v8  ;;  %814 = vmatmul.mubr.bf16.gmra.mrb[60].mxu1 %v1119_v9 }
  0xf8   :  { %v567_v10 = vpop.f32.mrb[0].mxu0  ;;  %v695_v11 = vpop.f32.mrb[0].mxu1 }
  0xf9   :  { %823 = vst.msk [vmem:[%s1645_s2] sm:$0xff] %vm822_vm1, %v567_v10  ;;  %855 = vst.msk [vmem:[%s1645_s2 + $0x100] sm:$0xff] %vm822_vm1, %v695_v11  ;;  %v569_v12 = vpop.f32.mrb[1].mxu0  ;;  %v697_v13 = vpop.f32.mrb[1].mxu1 }
  0xfa   :  { %v570_v14 = vpop.f32.mrb[2].mxu0  ;;  %v698_v15 = vpop.f32.mrb[2].mxu1 }
  0xfb   :  { %824 = vst.msk [vmem:[%s1645_s2 + $0x8] sm:$0xff] %vm822_vm1, %v570_v14  ;;  %856 = vst.msk [vmem:[%s1645_s2 + $0x108] sm:$0xff] %vm822_vm1, %v698_v15  ;;  %v572_v16 = vpop.f32.mrb[3].mxu0  ;;  %v700_v17 = vpop.f32.mrb[3].mxu1 }
 0x100   :  { %v575_v18 = vpop.f32.mrb[4].mxu0  ;;  %v703_v19 = vpop.f32.mrb[4].mxu1 }
 0x101   :  { %825 = vst.msk [vmem:[%s1645_s2 + $0x10] sm:$0xff] %vm822_vm1, %v575_v18  ;;  %857 = vst.msk [vmem:[%s1645_s2 + $0x110] sm:$0xff] %vm822_vm1, %v703_v19  ;;  %v577_v20 = vpop.f32.mrb[5].mxu0  ;;  %v705_v21 = vpop.f32.mrb[5].mxu1 }
 0x102   :  { %v578_v22 = vpop.f32.mrb[6].mxu0  ;;  %v706_v23 = vpop.f32.mrb[6].mxu1 }
 0x103   :  { %826 = vst.msk [vmem:[%s1645_s2 + $0x18] sm:$0xff] %vm822_vm1, %v578_v22  ;;  %858 = vst.msk [vmem:[%s1645_s2 + $0x118] sm:$0xff] %vm822_vm1, %v706_v23  ;;  %v580_v24 = vpop.f32.mrb[7].mxu0  ;;  %v708_v25 = vpop.f32.mrb[7].mxu1 }
 0x108   :  { %v583_v26 = vpop.f32.mrb[8].mxu0  ;;  %v711_v27 = vpop.f32.mrb[8].mxu1 }
 0x109   :  { %827 = vst.msk [vmem:[%s1645_s2 + $0x20] sm:$0xff] %vm822_vm1, %v583_v26  ;;  %859 = vst.msk [vmem:[%s1645_s2 + $0x120] sm:$0xff] %vm822_vm1, %v711_v27  ;;  %v585_v28 = vpop.f32.mrb[9].mxu0  ;;  %v713_v29 = vpop.f32.mrb[9].mxu1 }
 0x10a   :  { %v586_v30 = vpop.f32.mrb[10].mxu0  ;;  %v714_v31 = vpop.f32.mrb[10].mxu1 }
 0x10b   :  { %828 = vst.msk [vmem:[%s1645_s2 + $0x28] sm:$0xff] %vm822_vm1, %v586_v30  ;;  %860 = vst.msk [vmem:[%s1645_s2 + $0x128] sm:$0xff] %vm822_vm1, %v714_v31  ;;  %v588_v32 = vpop.f32.mrb[11].mxu0  ;;  %v716_v33 = vpop.f32.mrb[11].mxu1 }
 0x110   :  { %v591_v34 = vpop.f32.mrb[12].mxu0  ;;  %v719_v35 = vpop.f32.mrb[12].mxu1 }
 0x111   :  { %829 = vst.msk [vmem:[%s1645_s2 + $0x30] sm:$0xff] %vm822_vm1, %v591_v34  ;;  %861 = vst.msk [vmem:[%s1645_s2 + $0x130] sm:$0xff] %vm822_vm1, %v719_v35  ;;  %v593_v36 = vpop.f32.mrb[13].mxu0  ;;  %v721_v37 = vpop.f32.mrb[13].mxu1 }
 0x112   :  { %v594_v38 = vpop.f32.mrb[14].mxu0  ;;  %v722_v39 = vpop.f32.mrb[14].mxu1 }
 0x113   :  { %830 = vst.msk [vmem:[%s1645_s2 + $0x38] sm:$0xff] %vm822_vm1, %v594_v38  ;;  %862 = vst.msk [vmem:[%s1645_s2 + $0x138] sm:$0xff] %vm822_vm1, %v722_v39  ;;  %v596_v40 = vpop.f32.mrb[15].mxu0  ;;  %v724_v41 = vpop.f32.mrb[15].mxu1 }
 0x118   :  { %v599_v42 = vpop.f32.mrb[16].mxu0  ;;  %v727_v43 = vpop.f32.mrb[16].mxu1 }
 0x119   :  { %831 = vst.msk [vmem:[%s1645_s2 + $0x40] sm:$0xff] %vm822_vm1, %v599_v42  ;;  %863 = vst.msk [vmem:[%s1645_s2 + $0x140] sm:$0xff] %vm822_vm1, %v727_v43  ;;  %v601_v44 = vpop.f32.mrb[17].mxu0  ;;  %v729_v45 = vpop.f32.mrb[17].mxu1 }
 0x11a   :  { %v602_v46 = vpop.f32.mrb[18].mxu0  ;;  %v730_v47 = vpop.f32.mrb[18].mxu1 }
 0x11b   :  { %832 = vst.msk [vmem:[%s1645_s2 + $0x48] sm:$0xff] %vm822_vm1, %v602_v46  ;;  %864 = vst.msk [vmem:[%s1645_s2 + $0x148] sm:$0xff] %vm822_vm1, %v730_v47  ;;  %v604_v48 = vpop.f32.mrb[19].mxu0  ;;  %v732_v49 = vpop.f32.mrb[19].mxu1 }
 0x120   :  { %v607_v50 = vpop.f32.mrb[20].mxu0  ;;  %v735_v51 = vpop.f32.mrb[20].mxu1 }
 0x121   :  { %833 = vst.msk [vmem:[%s1645_s2 + $0x50] sm:$0xff] %vm822_vm1, %v607_v50  ;;  %865 = vst.msk [vmem:[%s1645_s2 + $0x150] sm:$0xff] %vm822_vm1, %v735_v51  ;;  %v609_v52 = vpop.f32.mrb[21].mxu0  ;;  %v737_v53 = vpop.f32.mrb[21].mxu1 }
 0x122   :  { %v610_v54 = vpop.f32.mrb[22].mxu0  ;;  %v738_v55 = vpop.f32.mrb[22].mxu1 }
 0x123   :  { %834 = vst.msk [vmem:[%s1645_s2 + $0x58] sm:$0xff] %vm822_vm1, %v610_v54  ;;  %866 = vst.msk [vmem:[%s1645_s2 + $0x158] sm:$0xff] %vm822_vm1, %v738_v55  ;;  %v612_v56 = vpop.f32.mrb[23].mxu0  ;;  %v740_v57 = vpop.f32.mrb[23].mxu1 }
 0x128   :  { %v615_v58 = vpop.f32.mrb[24].mxu0  ;;  %v743_v59 = vpop.f32.mrb[24].mxu1 }
 0x129   :  { %835 = vst.msk [vmem:[%s1645_s2 + $0x60] sm:$0xff] %vm822_vm1, %v615_v58  ;;  %867 = vst.msk [vmem:[%s1645_s2 + $0x160] sm:$0xff] %vm822_vm1, %v743_v59  ;;  %v617_v60 = vpop.f32.mrb[25].mxu0  ;;  %v745_v61 = vpop.f32.mrb[25].mxu1 }
 0x12a   :  { %v618_v62 = vpop.f32.mrb[26].mxu0  ;;  %v746_v63 = vpop.f32.mrb[26].mxu1 }
 0x12b   :  { %836 = vst.msk [vmem:[%s1645_s2 + $0x68] sm:$0xff] %vm822_vm1, %v618_v62  ;;  %868 = vst.msk [vmem:[%s1645_s2 + $0x168] sm:$0xff] %vm822_vm1, %v746_v63  ;;  %v620_v0 = vpop.f32.mrb[27].mxu0  ;;  %v748_v1 = vpop.f32.mrb[27].mxu1 }
 0x130   :  { %v623_v2 = vpop.f32.mrb[28].mxu0  ;;  %v751_v3 = vpop.f32.mrb[28].mxu1 }
 0x131   :  { %837 = vst.msk [vmem:[%s1645_s2 + $0x70] sm:$0xff] %vm822_vm1, %v623_v2  ;;  %869 = vst.msk [vmem:[%s1645_s2 + $0x170] sm:$0xff] %vm822_vm1, %v751_v3  ;;  %v625_v4 = vpop.f32.mrb[29].mxu0  ;;  %v753_v5 = vpop.f32.mrb[29].mxu1 }
 0x132   :  { %v626_v6 = vpop.f32.mrb[30].mxu0  ;;  %v754_v7 = vpop.f32.mrb[30].mxu1 }
 0x133   :  { %838 = vst.msk [vmem:[%s1645_s2 + $0x78] sm:$0xff] %vm822_vm1, %v626_v6  ;;  %870 = vst.msk [vmem:[%s1645_s2 + $0x178] sm:$0xff] %vm822_vm1, %v754_v7  ;;  %v628_v8 = vpop.f32.mrb[31].mxu0  ;;  %v756_v9 = vpop.f32.mrb[31].mxu1 }
 0x138   :  { %v631_v10 = vpop.f32.mrb[32].mxu0  ;;  %v759_v11 = vpop.f32.mrb[32].mxu1 }
 0x139   :  { %839 = vst.msk [vmem:[%s1645_s2 + $0x80] sm:$0xff] %vm822_vm1, %v631_v10  ;;  %871 = vst.msk [vmem:[%s1645_s2 + $0x180] sm:$0xff] %vm822_vm1, %v759_v11  ;;  %v633_v12 = vpop.f32.mrb[33].mxu0  ;;  %v761_v13 = vpop.f32.mrb[33].mxu1 }
 0x13a   :  { %v634_v14 = vpop.f32.mrb[34].mxu0  ;;  %v762_v15 = vpop.f32.mrb[34].mxu1 }
 0x13b   :  { %840 = vst.msk [vmem:[%s1645_s2 + $0x88] sm:$0xff] %vm822_vm1, %v634_v14  ;;  %872 = vst.msk [vmem:[%s1645_s2 + $0x188] sm:$0xff] %vm822_vm1, %v762_v15  ;;  %v636_v16 = vpop.f32.mrb[35].mxu0  ;;  %v764_v17 = vpop.f32.mrb[35].mxu1 }
 0x140   :  { %v639_v18 = vpop.f32.mrb[36].mxu0  ;;  %v767_v19 = vpop.f32.mrb[36].mxu1 }
 0x141   :  { %841 = vst.msk [vmem:[%s1645_s2 + $0x90] sm:$0xff] %vm822_vm1, %v639_v18  ;;  %873 = vst.msk [vmem:[%s1645_s2 + $0x190] sm:$0xff] %vm822_vm1, %v767_v19  ;;  %v641_v20 = vpop.f32.mrb[37].mxu0  ;;  %v769_v21 = vpop.f32.mrb[37].mxu1 }
 0x142   :  { %v642_v22 = vpop.f32.mrb[38].mxu0  ;;  %v770_v23 = vpop.f32.mrb[38].mxu1 }
 0x143   :  { %842 = vst.msk [vmem:[%s1645_s2 + $0x98] sm:$0xff] %vm822_vm1, %v642_v22  ;;  %874 = vst.msk [vmem:[%s1645_s2 + $0x198] sm:$0xff] %vm822_vm1, %v770_v23  ;;  %v644_v24 = vpop.f32.mrb[39].mxu0  ;;  %v772_v25 = vpop.f32.mrb[39].mxu1 }
 0x148   :  { %v647_v26 = vpop.f32.mrb[40].mxu0  ;;  %v775_v27 = vpop.f32.mrb[40].mxu1 }
 0x149   :  { %843 = vst.msk [vmem:[%s1645_s2 + $0xa0] sm:$0xff] %vm822_vm1, %v647_v26  ;;  %875 = vst.msk [vmem:[%s1645_s2 + $0x1a0] sm:$0xff] %vm822_vm1, %v775_v27  ;;  %v649_v28 = vpop.f32.mrb[41].mxu0  ;;  %v777_v29 = vpop.f32.mrb[41].mxu1 }
 0x14a   :  { %v650_v30 = vpop.f32.mrb[42].mxu0  ;;  %v778_v31 = vpop.f32.mrb[42].mxu1 }
 0x14b   :  { %844 = vst.msk [vmem:[%s1645_s2 + $0xa8] sm:$0xff] %vm822_vm1, %v650_v30  ;;  %876 = vst.msk [vmem:[%s1645_s2 + $0x1a8] sm:$0xff] %vm822_vm1, %v778_v31  ;;  %v652_v32 = vpop.f32.mrb[43].mxu0  ;;  %v780_v33 = vpop.f32.mrb[43].mxu1 }
 0x150   :  { %v655_v34 = vpop.f32.mrb[44].mxu0  ;;  %v783_v35 = vpop.f32.mrb[44].mxu1 }
 0x151   :  { %845 = vst.msk [vmem:[%s1645_s2 + $0xb0] sm:$0xff] %vm822_vm1, %v655_v34  ;;  %877 = vst.msk [vmem:[%s1645_s2 + $0x1b0] sm:$0xff] %vm822_vm1, %v783_v35  ;;  %v657_v36 = vpop.f32.mrb[45].mxu0  ;;  %v785_v37 = vpop.f32.mrb[45].mxu1 }
 0x152   :  { %v658_v38 = vpop.f32.mrb[46].mxu0  ;;  %v786_v39 = vpop.f32.mrb[46].mxu1 }
 0x153   :  { %846 = vst.msk [vmem:[%s1645_s2 + $0xb8] sm:$0xff] %vm822_vm1, %v658_v38  ;;  %878 = vst.msk [vmem:[%s1645_s2 + $0x1b8] sm:$0xff] %vm822_vm1, %v786_v39  ;;  %v660_v40 = vpop.f32.mrb[47].mxu0  ;;  %v788_v41 = vpop.f32.mrb[47].mxu1 }
 0x158   :  { %v663_v42 = vpop.f32.mrb[48].mxu0  ;;  %v791_v43 = vpop.f32.mrb[48].mxu1 }
 0x159   :  { %847 = vst.msk [vmem:[%s1645_s2 + $0xc0] sm:$0xff] %vm822_vm1, %v663_v42  ;;  %879 = vst.msk [vmem:[%s1645_s2 + $0x1c0] sm:$0xff] %vm822_vm1, %v791_v43  ;;  %v665_v44 = vpop.f32.mrb[49].mxu0  ;;  %v793_v45 = vpop.f32.mrb[49].mxu1 }
 0x15a   :  { %v666_v46 = vpop.f32.mrb[50].mxu0  ;;  %v794_v47 = vpop.f32.mrb[50].mxu1 }
 0x15b   :  { %848 = vst.msk [vmem:[%s1645_s2 + $0xc8] sm:$0xff] %vm822_vm1, %v666_v46  ;;  %880 = vst.msk [vmem:[%s1645_s2 + $0x1c8] sm:$0xff] %vm822_vm1, %v794_v47  ;;  %v668_v48 = vpop.f32.mrb[51].mxu0  ;;  %v796_v49 = vpop.f32.mrb[51].mxu1 }
 0x160   :  { %v671_v50 = vpop.f32.mrb[52].mxu0  ;;  %v799_v51 = vpop.f32.mrb[52].mxu1 }
 0x161   :  { %849 = vst.msk [vmem:[%s1645_s2 + $0xd0] sm:$0xff] %vm822_vm1, %v671_v50  ;;  %881 = vst.msk [vmem:[%s1645_s2 + $0x1d0] sm:$0xff] %vm822_vm1, %v799_v51  ;;  %v673_v52 = vpop.f32.mrb[53].mxu0  ;;  %v801_v53 = vpop.f32.mrb[53].mxu1 }
 0x162   :  { %v674_v54 = vpop.f32.mrb[54].mxu0  ;;  %v802_v55 = vpop.f32.mrb[54].mxu1 }
 0x163   :  { %850 = vst.msk [vmem:[%s1645_s2 + $0xd8] sm:$0xff] %vm822_vm1, %v674_v54  ;;  %882 = vst.msk [vmem:[%s1645_s2 + $0x1d8] sm:$0xff] %vm822_vm1, %v802_v55  ;;  %v676_v56 = vpop.f32.mrb[55].mxu0  ;;  %v804_v57 = vpop.f32.mrb[55].mxu1 }
 0x168   :  { %v679_v58 = vpop.f32.mrb[56].mxu0  ;;  %v807_v59 = vpop.f32.mrb[56].mxu1 }
 0x169   :  { %851 = vst.msk [vmem:[%s1645_s2 + $0xe0] sm:$0xff] %vm822_vm1, %v679_v58  ;;  %883 = vst.msk [vmem:[%s1645_s2 + $0x1e0] sm:$0xff] %vm822_vm1, %v807_v59  ;;  %v681_v60 = vpop.f32.mrb[57].mxu0  ;;  %v809_v61 = vpop.f32.mrb[57].mxu1 }
 0x16a   :  { %v682_v62 = vpop.f32.mrb[58].mxu0  ;;  %v810_v63 = vpop.f32.mrb[58].mxu1 }
 0x16b   :  { %852 = vst.msk [vmem:[%s1645_s2 + $0xe8] sm:$0xff] %vm822_vm1, %v682_v62  ;;  %884 = vst.msk [vmem:[%s1645_s2 + $0x1e8] sm:$0xff] %vm822_vm1, %v810_v63  ;;  %v684_v0 = vpop.f32.mrb[59].mxu0  ;;  %v812_v1 = vpop.f32.mrb[59].mxu1 }
 0x170   :  { %v687_v2 = vpop.f32.mrb[60].mxu0  ;;  %v815_v3 = vpop.f32.mrb[60].mxu1 }
 0x171   :  { %853 = vst.msk [vmem:[%s1645_s2 + $0xf0] sm:$0xff] %vm822_vm1, %v687_v2  ;;  %885 = vst.msk [vmem:[%s1645_s2 + $0x1f0] sm:$0xff] %vm822_vm1, %v815_v3  ;;  %v689_v4 = vpop.f32.mrb[61].mxu0  ;;  %v817_v5 = vpop.f32.mrb[61].mxu1 }
 0x172   :  { %v690_v6 = vpop.f32.mrb[62].mxu0  ;;  %v818_v7 = vpop.f32.mrb[62].mxu1 }
 0x173   :  { %854 = vst.msk [vmem:[%s1645_s2 + $0xf8] sm:$0xff] %vm822_vm1, %v690_v6  ;;  %886 = vst.msk [vmem:[%s1645_s2 + $0x1f8] sm:$0xff] %vm822_vm1, %v818_v7  ;;  %v692_v8 = vpop.f32.mrb[63].mxu0  ;;  %v820_v9 = vpop.f32.mrb[63].mxu1 }

// kernel: hourglass_bev_neck_forward.23
= control target key start
LH: loop header
LB: loop body
LE: loop exit
PB: predicated region body
PF: predicated region fallthrough
CT: control target
= control target key end

     0   :  { %s490_s12 = smov 0   ;;  %s492_s13 = smov 0   ;;  %s529_s0 = inlined_call_operand.vmem [shape: f32[2,64,128], index: 0, kind: input, shape index: {}]   ;;  %s530_s1 = inlined_call_operand.vmem [shape: f32[2,8,128], index: 1, kind: input, shape index: {}]   ;;  %s531_s2 = inlined_call_operand.vmem [shape: f32[2,8,128], index: 2, kind: input, shape index: {}]   ;;  %s532_s3 = inlined_call_operand.vmem [shape: f32[2,64,128], index: 3, kind: output, shape index: {}]  }
   0x1   :  { %s494_s14 = smov 0  }
   0x2 LB: > { %s25_s15 = sadd.s32 1, %s464_s13  ;;  %p409_p0 = scmp.ge.s32.totalorder %s468_s14, 1  ;;  %s468_s14 = sphi %s494_s14, %s13_s14   ;;  %s464_s13 = sphi %s492_s13, %s534_s13   ;;  %s460_s12 = sphi %s490_s12, %s533_s12  }
   0x3   : > { %p27_p1 = scmp.ge.s32.totalorder %s25_s15, 2  ;;  %p176_p2 = scmp.lt.s32.totalorder %s468_s14, 3 }
   0x5   : > { %s536_s15 = smov (%p27_p1, %s25_s15), 0  ;;  %p177_p3 = pnand %p409_p0, %p176_p2 }
   0x6   : > { %p217_p4 = scmp.lt.s32.totalorder (!%p177_p3), %s460_s12, 1 }
   0x7   : > { %180 = sbr.rel (%p177_p3) target bundleno = 29 (0x1d), region = 32 }
   0xe   : > { %s538_s12 = smov (!%p217_p4, %s460_s12), 1 }
   0xf   : > { %s420_s16 = sshll.u32 %s538_s12, 6  ;;  %s412_s17 = sshll.u32 %s538_s12, 3 }
  0x10   : > { %s224_s20 = scalar_lea.vmem %s529_s0, %s420_s16  ;;  %s229_s23 = scalar_lea.vmem %s530_s1, %s412_s17 }
  0x11   : > { %s233_s26 = scalar_lea.vmem %s531_s2, %s412_s17  ;;  %v244_v0 = vld [vmem:[%s224_s20] sm:$0xff]  ;;  %v245_v2 = vld [vmem:[%s224_s20 + $0x8] sm:$0xff]  ;;  %v246_v6 = vld [vmem:[%s224_s20 + $0x10] sm:$0xff]  ;;  %s242_s29 = scalar_lea.vmem %s532_s3, %s420_s16 }
  0x12   : > { %v416_v1 = vld [vmem:[%s229_s23] ss:$0 sm:$0xff]  ;;  %v247_v7 = vld [vmem:[%s224_s20 + $0x18] sm:$0xff]  ;;  %v249_v11 = vld [vmem:[%s224_s20 + $0x28] sm:$0xff] }
  0x13   : > { %v257_v3 = vmul.f32 %v416_v1, %v244_v0  ;;  %v417_v4 = vld [vmem:[%s233_s26] ss:$0 sm:$0xff]  ;;  %v258_v5 = vmul.f32 %v416_v1, %v245_v2  ;;  %v259_v8 = vmul.f32 %v416_v1, %v246_v6  ;;  %v260_v9 = vmul.f32 %v416_v1, %v247_v7  ;;  %v250_v12 = vld [vmem:[%s224_s20 + $0x30] sm:$0xff]  ;;  %v251_v17 = vld [vmem:[%s224_s20 + $0x38] sm:$0xff] }
  0x14   : > { %v248_v10 = vld [vmem:[%s224_s20 + $0x20] sm:$0xff]  ;;  %v262_v16 = vmul.f32 %v416_v1, %v249_v11  ;;  %v263_v20 = vmul.f32 %v416_v1, %v250_v12  ;;  %v264_v21 = vmul.f32 %v416_v1, %v251_v17 }
  0x15   : > { %v270_v13 = vadd.f32 %v417_v4, %v257_v3  ;;  %v271_v14 = vadd.f32 %v417_v4, %v258_v5  ;;  %v261_v15 = vmul.f32 %v416_v1, %v248_v10  ;;  %v272_v18 = vadd.f32 %v417_v4, %v259_v8 }
  0x16   : > { %v273_v19 = vadd.f32 %v417_v4, %v260_v9  ;;  %v275_v25 = vadd.f32 %v417_v4, %v262_v16  ;;  %v276_v28 = vadd.f32 %v417_v4, %v263_v20  ;;  %v277_v29 = vadd.f32 %v417_v4, %v264_v21 }
  0x17   : > { %v278_v22 = vmax.f32 %v270_v13, 0.0  ;;  %v279_v23 = vmax.f32 %v271_v14, 0.0  ;;  %v274_v24 = vadd.f32 %v417_v4, %v261_v15  ;;  %v280_v26 = vmax.f32 %v272_v18, 0.0 }
  0x18   : > { %v281_v27 = vmax.f32 %v273_v19, 0.0  ;;  %v283_v31 = vmax.f32 %v275_v25, 0.0  ;;  %v284_v32 = vmax.f32 %v276_v28, 0.0  ;;  %v285_v33 = vmax.f32 %v277_v29, 0.0 }
  0x19   : > { %286 = vst [vmem:[%s242_s29] sm:$0xff] %v278_v22  ;;  %287 = vst [vmem:[%s242_s29 + $0x8] sm:$0xff] %v279_v23  ;;  %v282_v30 = vmax.f32 %v274_v24, 0.0 }
  0x1a   : > { %288 = vst [vmem:[%s242_s29 + $0x10] sm:$0xff] %v280_v26  ;;  %289 = vst [vmem:[%s242_s29 + $0x18] sm:$0xff] %v281_v27 }
  0x1b   : > { %290 = vst [vmem:[%s242_s29 + $0x20] sm:$0xff] %v282_v30  ;;  %291 = vst [vmem:[%s242_s29 + $0x28] sm:$0xff] %v283_v31 }
  0x1c   : > { %292 = vst [vmem:[%s242_s29 + $0x30] sm:$0xff] %v284_v32  ;;  %293 = vst [vmem:[%s242_s29 + $0x38] sm:$0xff] %v285_v33 }
  0x1d PF: > { %s13_s14 = sadd.s32 1, %s468_s14   ;;  %s533_s12 = smov %s464_s13 }
  0x1e   : > { %p10_p5 = scmp.ge.s32.totalorder %s13_s14, 4   ;;  %s534_s13 = smov %s536_s15 }
  0x20   :  { %12 = sbr.rel (!%p10_p5) target bundleno = 2 (0x2), region = 68 }

// kernel: hourglass_bev_neck_forward.25
= control target key start
LH: loop header
LB: loop body
LE: loop exit
PB: predicated region body
PF: predicated region fallthrough
CT: control target
= control target key end

     0   :  { %s393_s9 = smov 0   ;;  %s395_s10 = smov 0   ;;  %s433_s0 = inlined_call_operand.vmem [shape: f32[2,32,128], index: 0, kind: input, shape index: {}]   ;;  %s434_s1 = inlined_call_operand.vmem [shape: f32[2,8,128], index: 1, kind: output, shape index: {0}]   ;;  %s435_s2 = inlined_call_operand.vmem [shape: f32[2,8,128], index: 2, kind: output, shape index: {1}]  }
   0x1   :  { %s397_s11 = smov 0  }
   0x2 LB: > { %s25_s12 = sadd.s32 1, %s372_s10  ;;  %p321_p0 = scmp.ge.s32.totalorder %s376_s11, 1  ;;  %s376_s11 = sphi %s397_s11, %s13_s11   ;;  %s372_s10 = sphi %s395_s10, %s437_s10   ;;  %s368_s9 = sphi %s393_s9, %s436_s9  }
   0x3   : > { %p27_p1 = scmp.ge.s32.totalorder %s25_s12, 2  ;;  %p134_p2 = scmp.lt.s32.totalorder %s376_s11, 3 }
   0x5   : > { %s439_s12 = smov (%p27_p1, %s25_s12), 0  ;;  %p135_p3 = pnand %p321_p0, %p134_p2 }
   0x6   : > { %p164_p4 = scmp.lt.s32.totalorder (!%p135_p3), %s368_s9, 1 }
   0x7   : > { %138 = sbr.rel (%p135_p3) target bundleno = 39 (0x27), region = 24 }
   0xe   : > { %s441_s9 = smov (!%p164_p4, %s368_s9), 1 }
   0xf   : > { %s328_s13 = sshll.u32 %s441_s9, 5  ;;  %s324_s17 = sshll.u32 %s441_s9, 3 }
  0x10   : > { %s171_s16 = scalar_lea.vmem %s433_s0, %s328_s13  ;;  %s176_s20 = scalar_lea.vmem %s434_s1, %s324_s17 }
  0x11   : > { %v187_v0 = vld [vmem:[%s171_s16] sm:$0xff]  ;;  %v188_v1 = vld [vmem:[%s171_s16 + $0x8] sm:$0xff]  ;;  %v189_v2 = vld [vmem:[%s171_s16 + $0x10] sm:$0xff]  ;;  %s180_s23 = scalar_lea.vmem %s435_s2, %s324_s17 }
  0x12   : > { %v190_v3 = vld [vmem:[%s171_s16 + $0x18] sm:$0xff]  ;;  %v192_v4 = vadd.f32 %v188_v1, %v187_v0  ;;  %v204_v5 = vmul.f32 %v187_v0, %v187_v0  ;;  %v205_v6 = vmul.f32 %v188_v1, %v188_v1  ;;  %v206_v7 = vmul.f32 %v189_v2, %v189_v2 }
  0x13   : > { %v207_v9 = vmul.f32 %v190_v3, %v190_v3 }
  0x14   : > { %v193_v8 = vadd.f32 %v192_v4, %v189_v2  ;;  %v208_v10 = vadd.f32 %v205_v6, %v204_v5 }
  0x16   : > { %v194_v11 = vadd.f32 %v193_v8, %v190_v3  ;;  %v209_v12 = vadd.f32 %v208_v10, %v206_v7 }
  0x18   : > { %v195_v13 = vrot.slane %v194_v11, 4  ;;  %v210_v14 = vadd.f32 %v209_v12, %v207_v9 }
  0x1a   : > { %v196_v15 = vadd.f32 %v195_v13, %v194_v11  ;;  %v211_v16 = vrot.slane %v210_v14, 4 }
  0x1c   : > { %v197_v17 = vrot.slane %v196_v15, 2  ;;  %v212_v18 = vadd.f32 %v211_v16, %v210_v14 }
  0x1e   : > { %v198_v19 = vadd.f32 %v197_v17, %v196_v15  ;;  %v213_v20 = vrot.slane %v212_v18, 2 }
  0x20   : > { %v199_v21 = vrot.slane %v198_v19, 1  ;;  %v214_v22 = vadd.f32 %v213_v20, %v212_v18 }
  0x22   : > { %v200_v23 = vadd.f32 %v199_v21, %v198_v19  ;;  %v215_v24 = vrot.slane %v214_v22, 1 }
  0x24   : > { %v216_v25 = vadd.f32 %v215_v24, %v214_v22  ;;  %202 = vst [vmem:[%s176_s20] sm:$0xff] %v200_v23 }
  0x26   : > { %218 = vst [vmem:[%s180_s23] sm:$0xff] %v216_v25 }
  0x27 PF: > { %s13_s11 = sadd.s32 1, %s376_s11   ;;  %s436_s9 = smov %s372_s10 }
  0x28   : > { %p10_p5 = scmp.ge.s32.totalorder %s13_s11, 4   ;;  %s437_s10 = smov %s439_s12 }
  0x2a   :  { %12 = sbr.rel (!%p10_p5) target bundleno = 2 (0x2), region = 70 }

// kernel: squeeze.34
= control target key start
LH: loop header
LB: loop body
LE: loop exit
PB: predicated region body
PF: predicated region fallthrough
CT: control target
= control target key end

     0   :  { %vm7_vm0 = vcmask 523264   ;;  %s48_s0 = inlined_call_operand.vmem [shape: f32[2,128], index: 0, kind: input, shape index: {}]   ;;  %s49_s1 = inlined_call_operand.vmem [shape: f32[2,2,64], index: 1, kind: output, shape index: {}]  }
   0x1   :  { %v4_v0 = vld [vmem:[%s48_s0] sm:$0x3]  ;;  %s28_s0 = smov 64  }
   0x2   :  { %5 = vst [vmem:[#allocation1] sm:$0x3] %v4_v0 }
   0x9   :  { %v9_v1 = vld [vmem:[#allocation1] sm:$0x3]  }
   0xa   :  { %v6_v2 = vld [vmem:[#allocation1] sm:$0x3]   ;;  %10 = vrot.lane.b32.xlu0 %v9_v1, %s28_s0 }
   0xb   :  { %8 = vst.msk [vmem:[#allocation0] ss:$8 sm:$0x3] %vm7_vm0, %v6_v2  }
  0x7c   :  { %v11_v3 = vpop.permute.xlu0 %10  }
  0x7d   :  { %14 = vst.msk [vmem:[#allocation0 + $0x1] ss:$8 sm:$0x3] %vm7_vm0, %v11_v3  }
  0x84   :  { %v18_v4 = vld [vmem:[#allocation0] sm:$0x3]  ;;  %v22_v5 = vld [vmem:[#allocation0 + $0x8] sm:$0x3] }
  0x85   :  { %20 = vst [vmem:[%s49_s1] sm:$0x3] %v18_v4  ;;  %26 = vst [vmem:[%s49_s1 + $0x2] sm:$0x3] %v22_v5 }

// kernel: hourglass_bev_neck_forward.24
= control target key start
LH: loop header
LB: loop body
LE: loop exit
PB: predicated region body
PF: predicated region fallthrough
CT: control target
= control target key end

     0   :  { %vm308_vm0 = vcmask 261120   ;;  %vm527_vm1 = vcmask 523264   ;;  %s980_s1 = inlined_call_operand.vmem [shape: bf16[288,64], index: 1, kind: input, shape index: {}]   ;;  %s981_s0 = inlined_call_operand.vmem [shape: bf16[128,288], index: 0, kind: input, shape index: {}]   ;;  %s982_s2 = inlined_call_operand.vmem [shape: f32[128,64], index: 2, kind: output, shape index: {}]  }
   0x1   :  { %v708_v0 = vld [vmem:[%s980_s1 + $0x40] sm:$0xff]   ;;  %v710_v2 = vld [vmem:[%s980_s1 + $0x48] sm:$0xff]   ;;  %v712_v4 = vld [vmem:[%s980_s1 + $0x50] sm:$0xff]  }
   0x2   :  { %v709_v1 = vld [vmem:[%s980_s1] sm:$0xff]   ;;  %598 = vmatprep.subr.bf16.mxu0 %v708_v0  ;;  %692 = vmatprep.subr.bf16.mxu1 %v708_v0  ;;  %v711_v3 = vld [vmem:[%s980_s1 + $0x8] sm:$0xff]   ;;  %v713_v5 = vld [vmem:[%s980_s1 + $0x10] sm:$0xff]  }
   0x3   :  { %599 = vmatpush3.bf16.msra.mxu0 %v709_v1  ;;  %700 = vmatpush3.bf16.msra.mxu1 %v709_v1  ;;  %v714_v6 = vld [vmem:[%s980_s1 + $0x58] sm:$0xff]   ;;  %v716_v8 = vld [vmem:[%s980_s1 + $0x60] sm:$0xff]   ;;  %v718_v10 = vld [vmem:[%s980_s1 + $0x68] sm:$0xff]  }
   0x4   :  { %600 = vmatprep.subr.bf16.mxu0 %v710_v2  ;;  %693 = vmatprep.subr.bf16.mxu1 %v710_v2  ;;  %v715_v7 = vld [vmem:[%s980_s1 + $0x18] sm:$0xff]   ;;  %v717_v9 = vld [vmem:[%s980_s1 + $0x20] sm:$0xff]   ;;  %v719_v13 = vld [vmem:[%s980_s1 + $0x28] sm:$0xff]  }
   0x5   :  { %v726_v11 = vld [vmem:[%s981_s0 + $0x4] ss:$12 sps:$4 sm:$0xff]   ;;  %v729_v12 = vld [vmem:[%s981_s0 + $0x94] ss:$12 sps:$4 sm:$0xff]   ;;  %v722_v16 = vld [vmem:[%s980_s1 + $0x78] sm:$0xff]  }
   0x6   :  { %v720_v14 = vld [vmem:[%s980_s1 + $0x70] sm:$0xff]   ;;  %365 = vmatprep.mubr.bf16.mxu0 %v726_v11  ;;  %413 = vmatprep.mubr.bf16.mxu1 %v729_v12  ;;  %v723_v17 = vld [vmem:[%s980_s1 + $0x38] sm:$0xff]   ;;  %v724_v18 = vld [vmem:[%s981_s0] ss:$12 sps:$4 sm:$0xff]  }
   0x7   :  { %601 = vmatpush3.bf16.msra.mxu0 %v711_v3  ;;  %701 = vmatpush3.bf16.msra.mxu1 %v711_v3  ;;  %v721_v15 = vld [vmem:[%s980_s1 + $0x30] sm:$0xff]   ;;  %v730_v19 = vld [vmem:[%s980_s1 + $0x80] sm:$0xff]   ;;  %v731_v21 = vld [vmem:[%s981_s0 + $0x1c] ss:$12 sps:$4 sm:$0xff]  }
   0x8   :  { %602 = vmatprep.subr.bf16.mxu0 %v712_v4  ;;  %694 = vmatprep.subr.bf16.mxu1 %v712_v4  ;;  %v727_v20 = vld [vmem:[%s981_s0 + $0x90] ss:$12 sps:$4 sm:$0xff]   ;;  %v733_v22 = vld [vmem:[%s981_s0 + $0xac] ss:$12 sps:$4 sm:$0xff]   ;;  %v736_v25 = vld [vmem:[%s981_s0 + $0xa8] ss:$12 sps:$4 sm:$0xff]  }
   0x9   :  { %v737_v23 = vld [vmem:[%s980_s1 + $0x88] sm:$0xff]   ;;  %v735_v24 = vld [vmem:[%s981_s0 + $0x18] ss:$12 sps:$4 sm:$0xff]   ;;  %v738_v26 = vld [vmem:[%s981_s0 + $0x34] ss:$12 sps:$4 sm:$0xff]  }
   0xa   :  { %v740_v27 = vld [vmem:[%s981_s0 + $0x8] ss:$12 sps:$4 sm:$0xff]   ;;  %v741_v28 = vld [vmem:[%s981_s0 + $0x30] ss:$12 sps:$4 sm:$0xff]   ;;  %v742_v29 = vld [vmem:[%s981_s0 + $0x20] ss:$12 sps:$4 sm:$0xff]  }
   0xb   :  { %603 = vmatpush3.bf16.msra.mxu0 %v713_v5  ;;  %702 = vmatpush3.bf16.msra.mxu1 %v713_v5  ;;  %v743_v30 = vld [vmem:[%s981_s0 + $0x4c] ss:$12 sps:$4 sm:$0xff]   ;;  %v746_v32 = vld [vmem:[%s981_s0 + $0x48] ss:$12 sps:$4 sm:$0xff]   ;;  %v747_v33 = vld [vmem:[%s981_s0 + $0x50] ss:$12 sps:$4 sm:$0xff]  }
   0xc   :  { %604 = vmatprep.subr.bf16.mxu0 %v714_v6  ;;  %695 = vmatprep.subr.bf16.mxu1 %v714_v6  ;;  %v745_v31 = vld [vmem:[%s981_s0 + $0x38] ss:$12 sps:$4 sm:$0xff]   ;;  %v750_v35 = vld [vmem:[%s981_s0 + $0x68] ss:$12 sps:$4 sm:$0xff]   ;;  %v751_v36 = vld [vmem:[%s981_s0 + $0x60] ss:$12 sps:$4 sm:$0xff]  }
   0xd   :  { %v748_v34 = vld [vmem:[%s981_s0 + $0x64] ss:$12 sps:$4 sm:$0xff]   ;;  %v752_v37 = vld [vmem:[%s981_s0 + $0x80] ss:$12 sps:$4 sm:$0xff]   ;;  %v753_v38 = vld [vmem:[%s981_s0 + $0x7c] ss:$12 sps:$4 sm:$0xff]  }
   0xe   :  { %v755_v39 = vld [vmem:[%s981_s0 + $0x98] ss:$12 sps:$4 sm:$0xff]   ;;  %v757_v41 = vld [vmem:[%s981_s0 + $0xb0] ss:$12 sps:$4 sm:$0xff]  }
   0xf   :  { %605 = vmatpush3.bf16.msra.mxu0 %v715_v7  ;;  %703 = vmatpush3.bf16.msra.mxu1 %v715_v7  ;;  %v756_v40 = vld [vmem:[%s981_s0 + $0x78] ss:$12 sps:$4 sm:$0xff]  }
  0x10   :  { %606 = vmatprep.subr.bf16.mxu0 %v716_v8  ;;  %696 = vmatprep.subr.bf16.mxu1 %v716_v8 }
  0x13   :  { %607 = vmatpush3.bf16.msra.mxu0 %v717_v9  ;;  %704 = vmatpush3.bf16.msra.mxu1 %v717_v9 }
  0x14   :  { %608 = vmatprep.subr.bf16.mxu0 %v718_v10  ;;  %697 = vmatprep.subr.bf16.mxu1 %v718_v10 }
  0x17   :  { %609 = vmatpush3.bf16.msra.mxu0 %v719_v13  ;;  %705 = vmatpush3.bf16.msra.mxu1 %v719_v13 }
  0x18   :  { %610 = vmatprep.subr.bf16.mxu0 %v720_v14  ;;  %698 = vmatprep.subr.bf16.mxu1 %v720_v14 }
  0x1b   :  { %611 = vmatpush3.bf16.msra.mxu0 %v721_v15  ;;  %706 = vmatpush3.bf16.msra.mxu1 %v721_v15 }
  0x1c   :  { %612 = vmatprep.subr.bf16.mxu0 %v722_v16  ;;  %699 = vmatprep.subr.bf16.mxu1 %v722_v16 }
  0x1f   :  { %613 = vmatpush3.bf16.msra.mxu0 %v723_v17  ;;  %707 = vmatpush3.bf16.msra.mxu1 %v723_v17 }
  0x20   :  { %672 = vmatprep.subr.bf16.mxu1 %v730_v19 }
  0x22   :  { %366 = vmatmul.mubr.bf16.vlgmr.msra.gmra.mrb[0].mxu0 %v724_v18  ;;  %414 = vmatmul.mubr.bf16.vlgmr.msra.gmra.mrb[0].mxu1 %v727_v20 }
  0x23   :  { %673 = vmatpush3.bf16.msra.mxu1 %v730_v19  ;;  %373 = vmatprep.mubr.bf16.mxu0 %v731_v21 }
  0x24   :  { %421 = vmatprep.mubr.bf16.mxu1 %v733_v22  ;;  %674 = vmatprep.subr.bf16.mxu1 %v737_v23 }
  0x27   :  { %675 = vmatpush3.bf16.msra.mxu1 %v737_v23 }
  0x2a   :  { %374 = vmatmul.mubr.bf16.gmra.mrb[4].mxu0 %v735_v24  ;;  %422 = vmatmul.mubr.bf16.gmra.mrb[4].mxu1 %v736_v25 }
  0x2b   :  { %381 = vmatprep.mubr.bf16.mxu0 %v738_v26  ;;  %676 = vmatprep.mubr.msk.bf16.mxu1 %vm308_vm0, %v740_v27 }
  0x32   :  { %382 = vmatmul.mubr.bf16.gmra.mrb[8].mxu0 %v741_v28  ;;  %677 = vmatmul.mubr.msk.bf16.vlgmr.msra.gmra.mrb[8].mxu1 %vm308_vm0, %v742_v29 }
  0x33   :  { %389 = vmatprep.mubr.bf16.mxu0 %v743_v30  ;;  %680 = vmatprep.mubr.msk.bf16.mxu1 %vm308_vm0, %v745_v31 }
  0x3a   :  { %390 = vmatmul.mubr.bf16.gmra.mrb[12].mxu0 %v746_v32  ;;  %681 = vmatmul.mubr.msk.bf16.gmra.mrb[12].mxu1 %vm308_vm0, %v747_v33 }
  0x3b   :  { %397 = vmatprep.mubr.bf16.mxu0 %v748_v34  ;;  %684 = vmatprep.mubr.msk.bf16.mxu1 %vm308_vm0, %v750_v35 }
  0x42   :  { %398 = vmatmul.mubr.bf16.gmra.mrb[16].mxu0 %v751_v36  ;;  %685 = vmatmul.mubr.msk.bf16.gmra.mrb[16].mxu1 %vm308_vm0, %v752_v37 }
  0x43   :  { %405 = vmatprep.mubr.bf16.mxu0 %v753_v38  ;;  %688 = vmatprep.mubr.msk.bf16.mxu1 %vm308_vm0, %v755_v39 }
  0x4a   :  { %406 = vmatmul.mubr.bf16.gmra.mrb[20].mxu0 %v756_v40  ;;  %689 = vmatmul.mubr.msk.bf16.gmra.mrb[20].mxu1 %vm308_vm0, %v757_v41 }
  0xf5   :  { %v614_v42 = vpop.f32.mrb[0].mxu0  ;;  %v650_v43 = vpop.f32.mrb[0].mxu1 }
  0xf6   :  { %v615_v44 = vpop.f32.mrb[1].mxu0  ;;  %v651_v45 = vpop.f32.mrb[1].mxu1 }
  0xf7   :  { %v616_v46 = vadd.f32 %v615_v44, %v614_v42  ;;  %v907_v47 = vadd.f32 %v651_v45, %v650_v43  ;;  %v617_v48 = vpop.f32.mrb[2].mxu0  ;;  %v653_v49 = vpop.f32.mrb[2].mxu1 }
  0xf8   :  { %v618_v50 = vpop.f32.mrb[3].mxu0  ;;  %v654_v51 = vpop.f32.mrb[3].mxu1 }
  0xf9   :  { %v619_v52 = vadd.f32 %v618_v50, %v617_v48  ;;  %v909_v53 = vadd.f32 %v654_v51, %v653_v49 }
  0xfd   :  { %v620_v54 = vpop.f32.mrb[4].mxu0  ;;  %v656_v55 = vpop.f32.mrb[4].mxu1 }
  0xfe   :  { %v621_v56 = vpop.f32.mrb[5].mxu0  ;;  %v657_v57 = vpop.f32.mrb[5].mxu1 }
  0xff   :  { %v622_v58 = vadd.f32 %v621_v56, %v620_v54  ;;  %v658_v59 = vadd.f32 %v657_v57, %v656_v55  ;;  %v623_v60 = vpop.f32.mrb[6].mxu0  ;;  %v659_v61 = vpop.f32.mrb[6].mxu1 }
 0x100   :  { %v624_v62 = vpop.f32.mrb[7].mxu0  ;;  %v660_v63 = vpop.f32.mrb[7].mxu1 }
 0x101   :  { %v625_v0 = vadd.f32 %v624_v62, %v623_v60  ;;  %v911_v1 = vadd.f32 %v660_v63, %v659_v61 }
 0x105   :  { %v626_v2 = vpop.f32.mrb[8].mxu0  ;;  %v678_v3 = vpop.f32.mrb[8].mxu1 }
 0x106   :  { %v473_v4 = vadd.f32 %v678_v3, %v622_v58  ;;  %v627_v5 = vpop.f32.mrb[9].mxu0  ;;  %v464_v6 = vpop.f32.mrb[9].mxu1 }
 0x107   :  { %v628_v7 = vadd.f32 %v627_v5, %v626_v2  ;;  %v465_v8 = vadd.f32 %v616_v46, %v464_v6  ;;  %v629_v9 = vpop.f32.mrb[10].mxu0  ;;  %v679_v10 = vpop.f32.mrb[10].mxu1 }
 0x108   :  { %530 = vst.msk [vmem:[%s982_s2 + $0x10] sm:$0xff] %vm527_vm1, %v473_v4  ;;  %v476_v11 = vadd.f32 %v679_v10, %v625_v0  ;;  %v630_v12 = vpop.f32.mrb[11].mxu0  ;;  %v467_v13 = vpop.f32.mrb[11].mxu1 }
 0x109   :  { %528 = vst.msk [vmem:[%s982_s2] sm:$0xff] %vm527_vm1, %v465_v8  ;;  %v631_v14 = vadd.f32 %v630_v12, %v629_v9  ;;  %v468_v15 = vadd.f32 %v619_v52, %v467_v13 }
 0x10a   :  { %531 = vst.msk [vmem:[%s982_s2 + $0x18] sm:$0xff] %vm527_vm1, %v476_v11 }
 0x10b   :  { %529 = vst.msk [vmem:[%s982_s2 + $0x8] sm:$0xff] %vm527_vm1, %v468_v15 }
 0x10d   :  { %v632_v16 = vpop.f32.mrb[12].mxu0  ;;  %v682_v17 = vpop.f32.mrb[12].mxu1 }
 0x10e   :  { %v633_v18 = vpop.f32.mrb[13].mxu0  ;;  %v480_v19 = vpop.f32.mrb[13].mxu1 }
 0x10f   :  { %v634_v20 = vadd.f32 %v633_v18, %v632_v16  ;;  %v481_v21 = vadd.f32 %v628_v7, %v480_v19  ;;  %v635_v22 = vpop.f32.mrb[14].mxu0  ;;  %v683_v23 = vpop.f32.mrb[14].mxu1 }
 0x110   :  { %v636_v24 = vpop.f32.mrb[15].mxu0  ;;  %v483_v25 = vpop.f32.mrb[15].mxu1 }
 0x111   :  { %v489_v26 = vadd.f32 %v682_v17, %v634_v20  ;;  %532 = vst.msk [vmem:[%s982_s2 + $0x20] sm:$0xff] %vm527_vm1, %v481_v21  ;;  %v637_v27 = vadd.f32 %v636_v24, %v635_v22  ;;  %v484_v28 = vadd.f32 %v631_v14, %v483_v25 }
 0x113   :  { %534 = vst.msk [vmem:[%s982_s2 + $0x30] sm:$0xff] %vm527_vm1, %v489_v26  ;;  %v492_v29 = vadd.f32 %v683_v23, %v637_v27  ;;  %533 = vst.msk [vmem:[%s982_s2 + $0x28] sm:$0xff] %vm527_vm1, %v484_v28 }
 0x115   :  { %535 = vst.msk [vmem:[%s982_s2 + $0x38] sm:$0xff] %vm527_vm1, %v492_v29  ;;  %v638_v30 = vpop.f32.mrb[16].mxu0  ;;  %v686_v31 = vpop.f32.mrb[16].mxu1 }
 0x116   :  { %v639_v32 = vpop.f32.mrb[17].mxu0  ;;  %v496_v33 = vpop.f32.mrb[17].mxu1 }
 0x117   :  { %v640_v34 = vadd.f32 %v639_v32, %v638_v30  ;;  %v641_v35 = vpop.f32.mrb[18].mxu0  ;;  %v687_v36 = vpop.f32.mrb[18].mxu1 }
 0x118   :  { %v642_v37 = vpop.f32.mrb[19].mxu0  ;;  %v499_v38 = vpop.f32.mrb[19].mxu1 }
 0x119   :  { %v497_v39 = vadd.f32 %v640_v34, %v496_v33  ;;  %v643_v40 = vadd.f32 %v642_v37, %v641_v35 }
 0x11b   :  { %536 = vst.msk [vmem:[%s982_s2 + $0x40] sm:$0xff] %vm527_vm1, %v497_v39  ;;  %v500_v41 = vadd.f32 %v643_v40, %v499_v38 }
 0x11d   :  { %537 = vst.msk [vmem:[%s982_s2 + $0x48] sm:$0xff] %vm527_vm1, %v500_v41  ;;  %v644_v42 = vpop.f32.mrb[20].mxu0  ;;  %v690_v43 = vpop.f32.mrb[20].mxu1 }
 0x11e   :  { %v521_v44 = vadd.f32 %v690_v43, %v658_v59  ;;  %v645_v45 = vpop.f32.mrb[21].mxu0  ;;  %v512_v46 = vpop.f32.mrb[21].mxu1 }
 0x11f   :  { %v646_v48 = vadd.f32 %v645_v45, %v644_v42  ;;  %v513_v49 = vadd.f32 %v907_v47, %v512_v46  ;;  %v647_v50 = vpop.f32.mrb[22].mxu0  ;;  %v691_v51 = vpop.f32.mrb[22].mxu1 }
 0x120   :  { %542 = vst.msk [vmem:[%s982_s2 + $0x70] sm:$0xff] %vm527_vm1, %v521_v44  ;;  %v524_v52 = vadd.f32 %v691_v51, %v911_v1  ;;  %v648_v54 = vpop.f32.mrb[23].mxu0  ;;  %v515_v55 = vpop.f32.mrb[23].mxu1 }
 0x121   :  { %v505_v56 = vadd.f32 %v686_v31, %v646_v48  ;;  %540 = vst.msk [vmem:[%s982_s2 + $0x60] sm:$0xff] %vm527_vm1, %v513_v49  ;;  %v649_v57 = vadd.f32 %v648_v54, %v647_v50  ;;  %v516_v47 = vadd.f32 %v909_v53, %v515_v55 }
 0x122   :  { %543 = vst.msk [vmem:[%s982_s2 + $0x78] sm:$0xff] %vm527_vm1, %v524_v52 }
 0x123   :  { %538 = vst.msk [vmem:[%s982_s2 + $0x50] sm:$0xff] %vm527_vm1, %v505_v56  ;;  %v508_v58 = vadd.f32 %v687_v36, %v649_v57  ;;  %541 = vst.msk [vmem:[%s982_s2 + $0x68] sm:$0xff] %vm527_vm1, %v516_v47 }
 0x125   :  { %539 = vst.msk [vmem:[%s982_s2 + $0x58] sm:$0xff] %vm527_vm1, %v508_v58 }

// kernel: hourglass_bev_neck_forward.26
= control target key start
LH: loop header
LB: loop body
LE: loop exit
PB: predicated region body
PF: predicated region fallthrough
CT: control target
= control target key end

     0   :  { %s470_s12 = smov 0   ;;  %s472_s13 = smov 0   ;;  %s509_s0 = inlined_call_operand.vmem [shape: f32[2,32,128], index: 0, kind: input, shape index: {}]   ;;  %s510_s1 = inlined_call_operand.vmem [shape: f32[2,8,128], index: 1, kind: input, shape index: {}]   ;;  %s511_s2 = inlined_call_operand.vmem [shape: f32[2,8,128], index: 2, kind: input, shape index: {}]   ;;  %s512_s3 = inlined_call_operand.vmem [shape: f32[2,32,128], index: 3, kind: output, shape index: {}]  }
   0x1   :  { %s474_s14 = smov 0  }
   0x2 LB: > { %s25_s15 = sadd.s32 1, %s444_s13  ;;  %p389_p0 = scmp.ge.s32.totalorder %s448_s14, 1  ;;  %s448_s14 = sphi %s474_s14, %s13_s14   ;;  %s444_s13 = sphi %s472_s13, %s514_s13   ;;  %s440_s12 = sphi %s470_s12, %s513_s12  }
   0x3   : > { %p27_p1 = scmp.ge.s32.totalorder %s25_s15, 2  ;;  %p176_p2 = scmp.lt.s32.totalorder %s448_s14, 3 }
   0x5   : > { %s516_s15 = smov (%p27_p1, %s25_s15), 0  ;;  %p177_p3 = pnand %p389_p0, %p176_p2 }
   0x6   : > { %p217_p4 = scmp.lt.s32.totalorder (!%p177_p3), %s440_s12, 1 }
   0x7   : > { %180 = sbr.rel (%p177_p3) target bundleno = 27 (0x1b), region = 32 }
   0xe   : > { %s518_s12 = smov (!%p217_p4, %s440_s12), 1 }
   0xf   : > { %s400_s16 = sshll.u32 %s518_s12, 5  ;;  %s392_s17 = sshll.u32 %s518_s12, 3 }
  0x10   : > { %s224_s20 = scalar_lea.vmem %s509_s0, %s400_s16  ;;  %s229_s23 = scalar_lea.vmem %s510_s1, %s392_s17 }
  0x11   : > { %s233_s26 = scalar_lea.vmem %s511_s2, %s392_s17  ;;  %v244_v0 = vld [vmem:[%s224_s20] sm:$0xff]  ;;  %v245_v2 = vld [vmem:[%s224_s20 + $0x8] sm:$0xff]  ;;  %v246_v6 = vld [vmem:[%s224_s20 + $0x10] sm:$0xff]  ;;  %s242_s29 = scalar_lea.vmem %s512_s3, %s400_s16 }
  0x12   : > { %v396_v1 = vld [vmem:[%s229_s23] ss:$0 sm:$0xff]  ;;  %v247_v7 = vld [vmem:[%s224_s20 + $0x18] sm:$0xff] }
  0x13   : > { %v253_v3 = vmul.f32 %v396_v1, %v244_v0  ;;  %v397_v4 = vld [vmem:[%s233_s26] ss:$0 sm:$0xff]  ;;  %v254_v5 = vmul.f32 %v396_v1, %v245_v2  ;;  %v255_v8 = vmul.f32 %v396_v1, %v246_v6  ;;  %v256_v9 = vmul.f32 %v396_v1, %v247_v7 }
  0x15   : > { %v262_v10 = vadd.f32 %v397_v4, %v253_v3  ;;  %v263_v11 = vadd.f32 %v397_v4, %v254_v5  ;;  %v264_v12 = vadd.f32 %v397_v4, %v255_v8  ;;  %v265_v13 = vadd.f32 %v397_v4, %v256_v9 }
  0x17   : > { %v266_v14 = vmax.f32 %v262_v10, 0.0  ;;  %v267_v15 = vmax.f32 %v263_v11, 0.0  ;;  %v268_v16 = vmax.f32 %v264_v12, 0.0  ;;  %v269_v17 = vmax.f32 %v265_v13, 0.0 }
  0x19   : > { %270 = vst [vmem:[%s242_s29] sm:$0xff] %v266_v14  ;;  %271 = vst [vmem:[%s242_s29 + $0x8] sm:$0xff] %v267_v15 }
  0x1a   : > { %272 = vst [vmem:[%s242_s29 + $0x10] sm:$0xff] %v268_v16  ;;  %273 = vst [vmem:[%s242_s29 + $0x18] sm:$0xff] %v269_v17 }
  0x1b PF: > { %s13_s14 = sadd.s32 1, %s448_s14   ;;  %s513_s12 = smov %s444_s13 }
  0x1c   : > { %p10_p5 = scmp.ge.s32.totalorder %s13_s14, 4   ;;  %s514_s13 = smov %s516_s15 }
  0x1e   :  { %12 = sbr.rel (!%p10_p5) target bundleno = 2 (0x2), region = 68 }

// kernel: hourglass_bev_neck_forward.27
= control target key start
LH: loop header
LB: loop body
LE: loop exit
PB: predicated region body
PF: predicated region fallthrough
CT: control target
= control target key end

     0   :  { %vm548_vm0 = vcmask 523264   ;;  %s1574_s1 = inlined_call_operand.vmem [shape: bf16[576,64], index: 1, kind: input, shape index: {}]   ;;  %s1575_s0 = inlined_call_operand.vmem [shape: bf16[128,576], index: 0, kind: input, shape index: {}]   ;;  %s1576_s2 = inlined_call_operand.vmem [shape: f32[128,64], index: 2, kind: output, shape index: {}]  }
   0x1   :  { %v1140_v0 = vld [vmem:[%s1574_s1 + $0x40] sm:$0xff]   ;;  %v1144_v4 = vld [vmem:[%s1574_s1 + $0x48] sm:$0xff]   ;;  %v1148_v8 = vld [vmem:[%s1574_s1 + $0x50] sm:$0xff]  }
   0x2   :  { %v1141_v1 = vld [vmem:[%s1574_s1 + $0xc0] sm:$0xff]   ;;  %968 = vmatprep.subr.bf16.mxu0 %v1140_v0  ;;  %v1145_v5 = vld [vmem:[%s1574_s1 + $0xc8] sm:$0xff]   ;;  %v1149_v9 = vld [vmem:[%s1574_s1 + $0xd0] sm:$0xff]  }
   0x3   :  { %v1142_v2 = vld [vmem:[%s1574_s1] sm:$0xff]   ;;  %1032 = vmatprep.subr.bf16.mxu1 %v1141_v1  ;;  %v1146_v6 = vld [vmem:[%s1574_s1 + $0x8] sm:$0xff]   ;;  %v1150_v10 = vld [vmem:[%s1574_s1 + $0x10] sm:$0xff]  }
   0x4   :  { %v1143_v3 = vld [vmem:[%s1574_s1 + $0x80] sm:$0xff]   ;;  %969 = vmatpush3.bf16.msra.mxu0 %v1142_v2  ;;  %v1147_v7 = vld [vmem:[%s1574_s1 + $0x88] sm:$0xff]   ;;  %v1151_v11 = vld [vmem:[%s1574_s1 + $0x90] sm:$0xff]  }
   0x5   :  { %1033 = vmatpush3.bf16.msra.mxu1 %v1143_v3  ;;  %970 = vmatprep.subr.bf16.mxu0 %v1144_v4  ;;  %v1152_v12 = vld [vmem:[%s1574_s1 + $0x58] sm:$0xff]   ;;  %v1156_v16 = vld [vmem:[%s1574_s1 + $0x60] sm:$0xff]   ;;  %v1160_v20 = vld [vmem:[%s1574_s1 + $0x68] sm:$0xff]  }
   0x6   :  { %1034 = vmatprep.subr.bf16.mxu1 %v1145_v5  ;;  %v1153_v13 = vld [vmem:[%s1574_s1 + $0xd8] sm:$0xff]   ;;  %v1157_v17 = vld [vmem:[%s1574_s1 + $0xe0] sm:$0xff]   ;;  %v1161_v21 = vld [vmem:[%s1574_s1 + $0xe8] sm:$0xff]  }
   0x7   :  { %v1154_v14 = vld [vmem:[%s1574_s1 + $0x18] sm:$0xff]   ;;  %v1158_v18 = vld [vmem:[%s1574_s1 + $0x20] sm:$0xff]   ;;  %v1162_v22 = vld [vmem:[%s1574_s1 + $0x28] sm:$0xff]  }
   0x8   :  { %971 = vmatpush3.bf16.msra.mxu0 %v1146_v6  ;;  %v1155_v15 = vld [vmem:[%s1574_s1 + $0x98] sm:$0xff]   ;;  %v1159_v19 = vld [vmem:[%s1574_s1 + $0xa0] sm:$0xff]   ;;  %v1163_v23 = vld [vmem:[%s1574_s1 + $0xa8] sm:$0xff]  }
   0x9   :  { %1035 = vmatpush3.bf16.msra.mxu1 %v1147_v7  ;;  %972 = vmatprep.subr.bf16.mxu0 %v1148_v8  ;;  %v1164_v24 = vld [vmem:[%s1574_s1 + $0x70] sm:$0xff]   ;;  %v1168_v28 = vld [vmem:[%s1574_s1 + $0x78] sm:$0xff]   ;;  %v1177_v35 = vld [vmem:[%s1575_s0 + $0xc] ss:$20 sps:$4 sm:$0xff]  }
   0xa   :  { %1036 = vmatprep.subr.bf16.mxu1 %v1149_v9  ;;  %v1165_v25 = vld [vmem:[%s1574_s1 + $0xf0] sm:$0xff]   ;;  %v1169_v29 = vld [vmem:[%s1574_s1 + $0xf8] sm:$0xff]   ;;  %v1178_v36 = vld [vmem:[%s1574_s1 + $0x100] sm:$0xff]   ;;  %702 = vmatprep.mubr.bf16.mxu1 %v1177_v35 }
   0xb   :  { %v1166_v26 = vld [vmem:[%s1574_s1 + $0x30] sm:$0xff]   ;;  %v1170_v30 = vld [vmem:[%s1574_s1 + $0x38] sm:$0xff]   ;;  %v1179_v37 = vld [vmem:[%s1575_s0 + $0x2c] ss:$20 sps:$4 sm:$0xff]  }
   0xc   :  { %973 = vmatpush3.bf16.msra.mxu0 %v1150_v10  ;;  %v1167_v27 = vld [vmem:[%s1574_s1 + $0xb0] sm:$0xff]   ;;  %v1171_v31 = vld [vmem:[%s1574_s1 + $0xb8] sm:$0xff]   ;;  %v1191_v42 = vld [vmem:[%s1574_s1 + $0x108] sm:$0xff]  }
   0xd   :  { %1037 = vmatpush3.bf16.msra.mxu1 %v1151_v11  ;;  %974 = vmatprep.subr.bf16.mxu0 %v1152_v12  ;;  %v1172_v32 = vld [vmem:[%s1575_s0] ss:$20 sps:$4 sm:$0xff]   ;;  %v1174_v33 = vld [vmem:[%s1575_s0 + $0x4] ss:$20 sps:$4 sm:$0xff]   ;;  %v1175_v34 = vld [vmem:[%s1575_s0 + $0x8] ss:$20 sps:$4 sm:$0xff]  }
   0xe   :  { %1038 = vmatprep.subr.bf16.mxu1 %v1153_v13  ;;  %605 = vmatprep.mubr.bf16.mxu0 %v1174_v33  ;;  %v1181_v38 = vld [vmem:[%s1575_s0 + $0x34] ss:$20 sps:$4 sm:$0xff]   ;;  %v1184_v40 = vld [vmem:[%s1575_s0 + $0x30] ss:$20 sps:$4 sm:$0xff]   ;;  %v1190_v45 = vld [vmem:[%s1575_s0 + $0x58] ss:$20 sps:$4 sm:$0xff]  }
   0xf   :  { %v1183_v39 = vld [vmem:[%s1575_s0 + $0x28] ss:$20 sps:$4 sm:$0xff]   ;;  %v1189_v44 = vld [vmem:[%s1575_s0 + $0x50] ss:$20 sps:$4 sm:$0xff]   ;;  %v1196_v50 = vld [vmem:[%s1575_s0 + $0x78] ss:$20 sps:$4 sm:$0xff]  }
  0x10   :  { %975 = vmatpush3.bf16.msra.mxu0 %v1154_v14  ;;  %v1185_v41 = vld [vmem:[%s1575_s0 + $0x54] ss:$20 sps:$4 sm:$0xff]   ;;  %v1187_v43 = vld [vmem:[%s1575_s0 + $0x5c] ss:$20 sps:$4 sm:$0xff]   ;;  %v1194_v48 = vld [vmem:[%s1575_s0 + $0x84] ss:$20 sps:$4 sm:$0xff]  }
  0x11   :  { %1039 = vmatpush3.bf16.msra.mxu1 %v1155_v15  ;;  %976 = vmatprep.subr.bf16.mxu0 %v1156_v16  ;;  %v1204_v46 = vld [vmem:[%s1574_s1 + $0x110] sm:$0xff]   ;;  %v1217_v49 = vld [vmem:[%s1574_s1 + $0x118] sm:$0xff]   ;;  %v1200_v53 = vld [vmem:[%s1575_s0 + $0xac] ss:$20 sps:$4 sm:$0xff]  }
  0x12   :  { %1040 = vmatprep.subr.bf16.mxu1 %v1157_v17  ;;  %v1192_v47 = vld [vmem:[%s1575_s0 + $0x7c] ss:$20 sps:$4 sm:$0xff]   ;;  %v1197_v51 = vld [vmem:[%s1575_s0 + $0x80] ss:$20 sps:$4 sm:$0xff]   ;;  %v1198_v52 = vld [vmem:[%s1575_s0 + $0xa4] ss:$20 sps:$4 sm:$0xff]  }
  0x13   :  { %v1202_v54 = vld [vmem:[%s1575_s0 + $0xa0] ss:$20 sps:$4 sm:$0xff]   ;;  %v1203_v55 = vld [vmem:[%s1575_s0 + $0xa8] ss:$20 sps:$4 sm:$0xff]   ;;  %v1210_v59 = vld [vmem:[%s1575_s0 + $0xd0] ss:$20 sps:$4 sm:$0xff]  }
  0x14   :  { %977 = vmatpush3.bf16.msra.mxu0 %v1158_v18  ;;  %v1205_v56 = vld [vmem:[%s1575_s0 + $0xcc] ss:$20 sps:$4 sm:$0xff]   ;;  %v1207_v57 = vld [vmem:[%s1575_s0 + $0xd4] ss:$20 sps:$4 sm:$0xff]   ;;  %v1213_v61 = vld [vmem:[%s1575_s0 + $0xfc] ss:$20 sps:$4 sm:$0xff]  }
  0x15   :  { %1041 = vmatpush3.bf16.msra.mxu1 %v1159_v19  ;;  %978 = vmatprep.subr.bf16.mxu0 %v1160_v20  ;;  %v1209_v58 = vld [vmem:[%s1575_s0 + $0xc8] ss:$20 sps:$4 sm:$0xff]   ;;  %v1215_v62 = vld [vmem:[%s1575_s0 + $0xf0] ss:$20 sps:$4 sm:$0xff]   ;;  %v1216_v63 = vld [vmem:[%s1575_s0 + $0xf8] ss:$20 sps:$4 sm:$0xff]  }
  0x16   :  { %1042 = vmatprep.subr.bf16.mxu1 %v1161_v21  ;;  %v1211_v60 = vld [vmem:[%s1575_s0 + $0xf4] ss:$20 sps:$4 sm:$0xff]   ;;  %v1218_v0 = vld [vmem:[%s1575_s0 + $0x11c] ss:$20 sps:$4 sm:$0xff]   ;;  %v1220_v1 = vld [vmem:[%s1575_s0 + $0x124] ss:$20 sps:$4 sm:$0xff]  }
  0x17   :  { %v1222_v2 = vld [vmem:[%s1575_s0 + $0x118] ss:$20 sps:$4 sm:$0xff]   ;;  %v1223_v3 = vld [vmem:[%s1575_s0 + $0x120] ss:$20 sps:$4 sm:$0xff]   ;;  %v1224_v4 = vld [vmem:[%s1575_s0 + $0x10] ss:$20 sps:$4 sm:$0xff]  }
  0x18   :  { %979 = vmatpush3.bf16.msra.mxu0 %v1162_v22  ;;  %v1225_v5 = vld [vmem:[%s1575_s0 + $0xb0] ss:$20 sps:$4 sm:$0xff]   ;;  %v1226_v6 = vld [vmem:[%s1575_s0 + $0x38] ss:$20 sps:$4 sm:$0xff]   ;;  %v1228_v8 = vld [vmem:[%s1575_s0 + $0x60] ss:$20 sps:$4 sm:$0xff]  }
  0x19   :  { %1043 = vmatpush3.bf16.msra.mxu1 %v1163_v23  ;;  %980 = vmatprep.subr.bf16.mxu0 %v1164_v24  ;;  %v1227_v7 = vld [vmem:[%s1575_s0 + $0xd8] ss:$20 sps:$4 sm:$0xff]   ;;  %v1229_v9 = vld [vmem:[%s1575_s0 + $0x100] ss:$20 sps:$4 sm:$0xff]   ;;  %v1230_v10 = vld [vmem:[%s1575_s0 + $0x88] ss:$20 sps:$4 sm:$0xff]  }
  0x1a   :  { %1044 = vmatprep.subr.bf16.mxu1 %v1165_v25  ;;  %v1231_v11 = vld [vmem:[%s1575_s0 + $0x128] ss:$20 sps:$4 sm:$0xff]  }
  0x1c   :  { %981 = vmatpush3.bf16.msra.mxu0 %v1166_v26 }
  0x1d   :  { %1045 = vmatpush3.bf16.msra.mxu1 %v1167_v27  ;;  %982 = vmatprep.subr.bf16.mxu0 %v1168_v28 }
  0x1e   :  { %1046 = vmatprep.subr.bf16.mxu1 %v1169_v29 }
  0x20   :  { %983 = vmatpush3.bf16.msra.mxu0 %v1170_v30 }
  0x21   :  { %1047 = vmatpush3.bf16.msra.mxu1 %v1171_v31  ;;  %1108 = vmatprep.subr.bf16.mxu0 %v1178_v36 }
  0x22   :  { %1132 = vmatprep.subr.bf16.mxu1 %v1178_v36 }
  0x23   :  { %606 = vmatmul.mubr.bf16.vlgmr.msra.gmra.mrb[0].mxu0 %v1172_v32 }
  0x24   :  { %703 = vmatmul.mubr.bf16.vlgmr.msra.gmra.mrb[0].mxu1 %v1175_v34  ;;  %1109 = vmatpush3.bf16.msra.mxu0 %v1178_v36 }
  0x25   :  { %1136 = vmatpush3.bf16.msra.mxu1 %v1178_v36  ;;  %613 = vmatprep.mubr.bf16.mxu0 %v1179_v37 }
  0x26   :  { %710 = vmatprep.mubr.bf16.mxu1 %v1181_v38  ;;  %1110 = vmatprep.subr.bf16.mxu0 %v1191_v42 }
  0x27   :  { %1133 = vmatprep.subr.bf16.mxu1 %v1191_v42 }
  0x28   :  { %1111 = vmatpush3.bf16.msra.mxu0 %v1191_v42 }
  0x29   :  { %1137 = vmatpush3.bf16.msra.mxu1 %v1191_v42  ;;  %1112 = vmatprep.subr.bf16.mxu0 %v1204_v46 }
  0x2a   :  { %1134 = vmatprep.subr.bf16.mxu1 %v1204_v46 }
  0x2b   :  { %614 = vmatmul.mubr.bf16.gmra.mrb[4].mxu0 %v1183_v39 }
  0x2c   :  { %711 = vmatmul.mubr.bf16.gmra.mrb[4].mxu1 %v1184_v40  ;;  %621 = vmatprep.mubr.bf16.mxu0 %v1185_v41 }
  0x2d   :  { %718 = vmatprep.mubr.bf16.mxu1 %v1187_v43  ;;  %1113 = vmatpush3.bf16.msra.mxu0 %v1204_v46 }
  0x2e   :  { %1138 = vmatpush3.bf16.msra.mxu1 %v1204_v46  ;;  %1114 = vmatprep.subr.bf16.mxu0 %v1217_v49 }
  0x2f   :  { %1135 = vmatprep.subr.bf16.mxu1 %v1217_v49 }
  0x31   :  { %1115 = vmatpush3.bf16.msra.mxu0 %v1217_v49 }
  0x32   :  { %1139 = vmatpush3.bf16.msra.mxu1 %v1217_v49 }
  0x33   :  { %622 = vmatmul.mubr.bf16.gmra.mrb[8].mxu0 %v1189_v44 }
  0x34   :  { %719 = vmatmul.mubr.bf16.gmra.mrb[8].mxu1 %v1190_v45  ;;  %629 = vmatprep.mubr.bf16.mxu0 %v1192_v47 }
  0x35   :  { %726 = vmatprep.mubr.bf16.mxu1 %v1194_v48 }
  0x3b   :  { %630 = vmatmul.mubr.bf16.gmra.mrb[12].mxu0 %v1196_v50 }
  0x3c   :  { %727 = vmatmul.mubr.bf16.gmra.mrb[12].mxu1 %v1197_v51  ;;  %637 = vmatprep.mubr.bf16.mxu0 %v1198_v52 }
  0x3d   :  { %734 = vmatprep.mubr.bf16.mxu1 %v1200_v53 }
  0x43   :  { %638 = vmatmul.mubr.bf16.gmra.mrb[16].mxu0 %v1202_v54 }
  0x44   :  { %735 = vmatmul.mubr.bf16.gmra.mrb[16].mxu1 %v1203_v55  ;;  %645 = vmatprep.mubr.bf16.mxu0 %v1205_v56 }
  0x45   :  { %742 = vmatprep.mubr.bf16.mxu1 %v1207_v57 }
  0x4b   :  { %646 = vmatmul.mubr.bf16.gmra.mrb[20].mxu0 %v1209_v58 }
  0x4c   :  { %743 = vmatmul.mubr.bf16.gmra.mrb[20].mxu1 %v1210_v59  ;;  %653 = vmatprep.mubr.bf16.mxu0 %v1211_v60 }
  0x4d   :  { %750 = vmatprep.mubr.bf16.mxu1 %v1213_v61 }
  0x53   :  { %654 = vmatmul.mubr.bf16.gmra.mrb[24].mxu0 %v1215_v62 }
  0x54   :  { %751 = vmatmul.mubr.bf16.gmra.mrb[24].mxu1 %v1216_v63  ;;  %661 = vmatprep.mubr.bf16.mxu0 %v1218_v0 }
  0x55   :  { %758 = vmatprep.mubr.bf16.mxu1 %v1220_v1 }
  0x5b   :  { %662 = vmatmul.mubr.bf16.gmra.mrb[28].mxu0 %v1222_v2 }
  0x5c   :  { %759 = vmatmul.mubr.bf16.gmra.mrb[28].mxu1 %v1223_v3  ;;  %1116 = vmatprep.mubr.msk.bf16.mxu0 %vm548_vm0, %v1224_v4 }
  0x5d   :  { %1124 = vmatprep.mubr.msk.bf16.mxu1 %vm548_vm0, %v1225_v5 }
  0x63   :  { %1117 = vmatmul.mubr.msk.bf16.vlgmr.msra.gmra.mrb[32].mxu0 %vm548_vm0, %v1226_v6 }
  0x64   :  { %1125 = vmatmul.mubr.msk.bf16.vlgmr.msra.gmra.mrb[32].mxu1 %vm548_vm0, %v1227_v7  ;;  %1120 = vmatprep.mubr.msk.bf16.mxu0 %vm548_vm0, %v1228_v8 }
  0x65   :  { %1128 = vmatprep.mubr.msk.bf16.mxu1 %vm548_vm0, %v1229_v9 }
  0x6b   :  { %1121 = vmatmul.mubr.msk.bf16.gmra.mrb[36].mxu0 %vm548_vm0, %v1230_v10 }
  0x6c   :  { %1129 = vmatmul.mubr.msk.bf16.gmra.mrb[36].mxu1 %vm548_vm0, %v1231_v11 }
  0xf6   :  { %v984_v12 = vpop.f32.mrb[0].mxu0 }
  0xf7   :  { %v1048_v13 = vpop.f32.mrb[0].mxu1  ;;  %v985_v14 = vpop.f32.mrb[1].mxu0 }
  0xf8   :  { %v986_v15 = vadd.f32 %v985_v14, %v984_v12  ;;  %v1049_v16 = vpop.f32.mrb[1].mxu1  ;;  %v987_v17 = vpop.f32.mrb[2].mxu0 }
  0xf9   :  { %v1050_v18 = vadd.f32 %v1049_v16, %v1048_v13  ;;  %v1051_v19 = vpop.f32.mrb[2].mxu1  ;;  %v988_v20 = vpop.f32.mrb[3].mxu0 }
  0xfa   :  { %v989_v21 = vadd.f32 %v988_v20, %v987_v17  ;;  %v1052_v22 = vpop.f32.mrb[3].mxu1 }
  0xfb   :  { %v1053_v23 = vadd.f32 %v1052_v22, %v1051_v19  ;;  %v1483_v24 = vadd.f32 %v1050_v18, %v986_v15 }
  0xfd   :  { %v1485_v25 = vadd.f32 %v1053_v23, %v989_v21 }
  0xfe   :  { %v990_v26 = vpop.f32.mrb[4].mxu0 }
  0xff   :  { %v1054_v27 = vpop.f32.mrb[4].mxu1  ;;  %v991_v28 = vpop.f32.mrb[5].mxu0 }
 0x100   :  { %v992_v29 = vadd.f32 %v991_v28, %v990_v26  ;;  %v1055_v30 = vpop.f32.mrb[5].mxu1  ;;  %v993_v31 = vpop.f32.mrb[6].mxu0 }
 0x101   :  { %v1056_v32 = vadd.f32 %v1055_v30, %v1054_v27  ;;  %v1057_v33 = vpop.f32.mrb[6].mxu1  ;;  %v994_v34 = vpop.f32.mrb[7].mxu0 }
 0x102   :  { %v995_v35 = vadd.f32 %v994_v34, %v993_v31  ;;  %v1058_v36 = vpop.f32.mrb[7].mxu1 }
 0x103   :  { %v1059_v37 = vadd.f32 %v1058_v36, %v1057_v33  ;;  %v1487_v38 = vadd.f32 %v1056_v32, %v992_v29 }
 0x105   :  { %v1489_v39 = vadd.f32 %v1059_v37, %v995_v35 }
 0x106   :  { %v996_v40 = vpop.f32.mrb[8].mxu0 }
 0x107   :  { %v1060_v41 = vpop.f32.mrb[8].mxu1  ;;  %v997_v42 = vpop.f32.mrb[9].mxu0 }
 0x108   :  { %v998_v43 = vadd.f32 %v997_v42, %v996_v40  ;;  %v1061_v44 = vpop.f32.mrb[9].mxu1  ;;  %v999_v45 = vpop.f32.mrb[10].mxu0 }
 0x109   :  { %v1062_v46 = vadd.f32 %v1061_v44, %v1060_v41  ;;  %v1063_v47 = vpop.f32.mrb[10].mxu1  ;;  %v1000_v48 = vpop.f32.mrb[11].mxu0 }
 0x10a   :  { %v1001_v49 = vadd.f32 %v1000_v48, %v999_v45  ;;  %v1064_v50 = vpop.f32.mrb[11].mxu1 }
 0x10b   :  { %v1065_v51 = vadd.f32 %v1064_v50, %v1063_v47  ;;  %v1491_v52 = vadd.f32 %v1062_v46, %v998_v43 }
 0x10d   :  { %v1493_v53 = vadd.f32 %v1065_v51, %v1001_v49 }
 0x10e   :  { %v1002_v54 = vpop.f32.mrb[12].mxu0 }
 0x10f   :  { %v1066_v55 = vpop.f32.mrb[12].mxu1  ;;  %v1003_v56 = vpop.f32.mrb[13].mxu0 }
 0x110   :  { %v1004_v57 = vadd.f32 %v1003_v56, %v1002_v54  ;;  %v1067_v58 = vpop.f32.mrb[13].mxu1  ;;  %v1005_v59 = vpop.f32.mrb[14].mxu0 }
 0x111   :  { %v1068_v60 = vadd.f32 %v1067_v58, %v1066_v55  ;;  %v1069_v61 = vpop.f32.mrb[14].mxu1  ;;  %v1006_v62 = vpop.f32.mrb[15].mxu0 }
 0x112   :  { %v1007_v63 = vadd.f32 %v1006_v62, %v1005_v59  ;;  %v1070_v0 = vpop.f32.mrb[15].mxu1 }
 0x113   :  { %v1071_v1 = vadd.f32 %v1070_v0, %v1069_v61  ;;  %v1495_v2 = vadd.f32 %v1068_v60, %v1004_v57 }
 0x115   :  { %v1497_v3 = vadd.f32 %v1071_v1, %v1007_v63 }
 0x116   :  { %v1008_v4 = vpop.f32.mrb[16].mxu0 }
 0x117   :  { %v1072_v5 = vpop.f32.mrb[16].mxu1  ;;  %v1009_v6 = vpop.f32.mrb[17].mxu0 }
 0x118   :  { %v1010_v7 = vadd.f32 %v1009_v6, %v1008_v4  ;;  %v1073_v8 = vpop.f32.mrb[17].mxu1  ;;  %v1011_v9 = vpop.f32.mrb[18].mxu0 }
 0x119   :  { %v1074_v10 = vadd.f32 %v1073_v8, %v1072_v5  ;;  %v1075_v11 = vpop.f32.mrb[18].mxu1  ;;  %v1012_v12 = vpop.f32.mrb[19].mxu0 }
 0x11a   :  { %v1013_v13 = vadd.f32 %v1012_v12, %v1011_v9  ;;  %v1076_v14 = vpop.f32.mrb[19].mxu1 }
 0x11b   :  { %v1077_v15 = vadd.f32 %v1076_v14, %v1075_v11  ;;  %v737_v16 = vadd.f32 %v1074_v10, %v1010_v7 }
 0x11d   :  { %v1499_v17 = vadd.f32 %v1077_v15, %v1013_v13 }
 0x11e   :  { %v1014_v18 = vpop.f32.mrb[20].mxu0 }
 0x11f   :  { %v1078_v19 = vpop.f32.mrb[20].mxu1  ;;  %v1015_v20 = vpop.f32.mrb[21].mxu0 }
 0x120   :  { %v1016_v21 = vadd.f32 %v1015_v20, %v1014_v18  ;;  %v1079_v22 = vpop.f32.mrb[21].mxu1  ;;  %v1017_v23 = vpop.f32.mrb[22].mxu0 }
 0x121   :  { %v1080_v26 = vadd.f32 %v1079_v22, %v1078_v19  ;;  %v1081_v27 = vpop.f32.mrb[22].mxu1  ;;  %v1018_v28 = vpop.f32.mrb[23].mxu0 }
 0x122   :  { %v1019_v29 = vadd.f32 %v1018_v28, %v1017_v23  ;;  %v1082_v30 = vpop.f32.mrb[23].mxu1 }
 0x123   :  { %v1083_v31 = vadd.f32 %v1082_v30, %v1081_v27  ;;  %v745_v32 = vadd.f32 %v1080_v26, %v1016_v21 }
 0x125   :  { %v748_v33 = vadd.f32 %v1083_v31, %v1019_v29 }
 0x126   :  { %v1020_v34 = vpop.f32.mrb[24].mxu0 }
 0x127   :  { %v1084_v35 = vpop.f32.mrb[24].mxu1  ;;  %v1021_v36 = vpop.f32.mrb[25].mxu0 }
 0x128   :  { %v1022_v37 = vadd.f32 %v1021_v36, %v1020_v34  ;;  %v1085_v40 = vpop.f32.mrb[25].mxu1  ;;  %v1023_v41 = vpop.f32.mrb[26].mxu0 }
 0x129   :  { %v1086_v42 = vadd.f32 %v1085_v40, %v1084_v35  ;;  %v1087_v43 = vpop.f32.mrb[26].mxu1  ;;  %v1024_v44 = vpop.f32.mrb[27].mxu0 }
 0x12a   :  { %v1025_v45 = vadd.f32 %v1024_v44, %v1023_v41  ;;  %v1088_v46 = vpop.f32.mrb[27].mxu1 }
 0x12b   :  { %v1089_v47 = vadd.f32 %v1088_v46, %v1087_v43  ;;  %v753_v48 = vadd.f32 %v1086_v42, %v1022_v37 }
 0x12d   :  { %v756_v49 = vadd.f32 %v1089_v47, %v1025_v45 }
 0x12e   :  { %v1026_v50 = vpop.f32.mrb[28].mxu0 }
 0x12f   :  { %v1090_v51 = vpop.f32.mrb[28].mxu1  ;;  %v1027_v54 = vpop.f32.mrb[29].mxu0 }
 0x130   :  { %v1028_v55 = vadd.f32 %v1027_v54, %v1026_v50  ;;  %v1091_v56 = vpop.f32.mrb[29].mxu1  ;;  %v1029_v57 = vpop.f32.mrb[30].mxu0 }
 0x131   :  { %v1092_v58 = vadd.f32 %v1091_v56, %v1090_v51  ;;  %v1093_v59 = vpop.f32.mrb[30].mxu1  ;;  %v1030_v60 = vpop.f32.mrb[31].mxu0 }
 0x132   :  { %v1031_v61 = vadd.f32 %v1030_v60, %v1029_v57  ;;  %v1094_v62 = vpop.f32.mrb[31].mxu1 }
 0x133   :  { %v1095_v63 = vadd.f32 %v1094_v62, %v1093_v59  ;;  %v761_v0 = vadd.f32 %v1092_v58, %v1028_v55 }
 0x135   :  { %v764_v1 = vadd.f32 %v1095_v63, %v1031_v61 }
 0x136   :  { %v1118_v4 = vpop.f32.mrb[32].mxu0 }
 0x137   :  { %v810_v5 = vadd.f32 %v1118_v4, %v1487_v38  ;;  %v1126_v6 = vpop.f32.mrb[32].mxu1  ;;  %v801_v7 = vpop.f32.mrb[33].mxu0 }
 0x138   :  { %v842_v8 = vadd.f32 %v1126_v6, %v745_v32  ;;  %v802_v9 = vadd.f32 %v801_v7, %v1483_v24  ;;  %v833_v10 = vpop.f32.mrb[33].mxu1  ;;  %v1119_v11 = vpop.f32.mrb[34].mxu0 }
 0x139   :  { %866 = vst.msk [vmem:[%s1576_s2 + $0x10] sm:$0xff] %vm548_vm0, %v810_v5  ;;  %v834_v12 = vadd.f32 %v833_v10, %v737_v16  ;;  %v813_v13 = vadd.f32 %v1119_v11, %v1489_v39  ;;  %v1127_v14 = vpop.f32.mrb[34].mxu1  ;;  %v804_v15 = vpop.f32.mrb[35].mxu0 }
 0x13a   :  { %874 = vst.msk [vmem:[%s1576_s2 + $0x50] sm:$0xff] %vm548_vm0, %v842_v8  ;;  %864 = vst.msk [vmem:[%s1576_s2] sm:$0xff] %vm548_vm0, %v802_v9  ;;  %v845_v24 = vadd.f32 %v1127_v14, %v748_v33  ;;  %v805_v38 = vadd.f32 %v804_v15, %v1485_v25  ;;  %v836_v18 = vpop.f32.mrb[35].mxu1 }
 0x13b   :  { %872 = vst.msk [vmem:[%s1576_s2 + $0x40] sm:$0xff] %vm548_vm0, %v834_v12  ;;  %867 = vst.msk [vmem:[%s1576_s2 + $0x18] sm:$0xff] %vm548_vm0, %v813_v13  ;;  %v837_v39 = vadd.f32 %v836_v18, %v1499_v17 }
 0x13c   :  { %875 = vst.msk [vmem:[%s1576_s2 + $0x58] sm:$0xff] %vm548_vm0, %v845_v24  ;;  %865 = vst.msk [vmem:[%s1576_s2 + $0x8] sm:$0xff] %vm548_vm0, %v805_v38 }
 0x13d   :  { %873 = vst.msk [vmem:[%s1576_s2 + $0x48] sm:$0xff] %vm548_vm0, %v837_v39 }
 0x13e   :  { %v1122_v25 = vpop.f32.mrb[36].mxu0 }
 0x13f   :  { %v826_v16 = vadd.f32 %v1122_v25, %v1495_v2  ;;  %v1130_v19 = vpop.f32.mrb[36].mxu1  ;;  %v817_v17 = vpop.f32.mrb[37].mxu0 }
 0x140   :  { %v858_v20 = vadd.f32 %v1130_v19, %v761_v0  ;;  %v818_v21 = vadd.f32 %v817_v17, %v1491_v52  ;;  %v849_v22 = vpop.f32.mrb[37].mxu1  ;;  %v1123_v23 = vpop.f32.mrb[38].mxu0 }
 0x141   :  { %870 = vst.msk [vmem:[%s1576_s2 + $0x30] sm:$0xff] %vm548_vm0, %v826_v16  ;;  %v850_v26 = vadd.f32 %v849_v22, %v753_v48  ;;  %v829_v27 = vadd.f32 %v1123_v23, %v1497_v3  ;;  %v1131_v28 = vpop.f32.mrb[38].mxu1  ;;  %v820_v29 = vpop.f32.mrb[39].mxu0 }
 0x142   :  { %878 = vst.msk [vmem:[%s1576_s2 + $0x70] sm:$0xff] %vm548_vm0, %v858_v20  ;;  %868 = vst.msk [vmem:[%s1576_s2 + $0x20] sm:$0xff] %vm548_vm0, %v818_v21  ;;  %v861_v52 = vadd.f32 %v1131_v28, %v764_v1  ;;  %v821_v2 = vadd.f32 %v820_v29, %v1493_v53  ;;  %v852_v30 = vpop.f32.mrb[39].mxu1 }
 0x143   :  { %876 = vst.msk [vmem:[%s1576_s2 + $0x60] sm:$0xff] %vm548_vm0, %v850_v26  ;;  %871 = vst.msk [vmem:[%s1576_s2 + $0x38] sm:$0xff] %vm548_vm0, %v829_v27  ;;  %v853_v3 = vadd.f32 %v852_v30, %v756_v49 }
 0x144   :  { %879 = vst.msk [vmem:[%s1576_s2 + $0x78] sm:$0xff] %vm548_vm0, %v861_v52  ;;  %869 = vst.msk [vmem:[%s1576_s2 + $0x28] sm:$0xff] %vm548_vm0, %v821_v2 }
 0x145   :  { %877 = vst.msk [vmem:[%s1576_s2 + $0x68] sm:$0xff] %vm548_vm0, %v853_v3 }

// kernel: hourglass_bev_neck_forward.31
= control target key start
LH: loop header
LB: loop body
LE: loop exit
PB: predicated region body
PF: predicated region fallthrough
CT: control target
= control target key end

     0   :  { %s368_s9 = smov 0   ;;  %s370_s10 = smov 0   ;;  %s401_s0 = inlined_call_operand.vmem [shape: f32[2,8,128], index: 0, kind: input, shape index: {}]   ;;  %s402_s1 = inlined_call_operand.vmem [shape: f32[2,8,128], index: 1, kind: output, shape index: {0}]   ;;  %s403_s2 = inlined_call_operand.vmem [shape: f32[2,8,128], index: 2, kind: output, shape index: {1}]  }
   0x1   :  { %s372_s11 = smov 0  }
   0x2 LB: > { %s25_s12 = sadd.s32 1, %s347_s10  ;;  %p298_p0 = scmp.ge.s32.totalorder %s351_s11, 1  ;;  %s351_s11 = sphi %s372_s11, %s13_s11   ;;  %s347_s10 = sphi %s370_s10, %s405_s10   ;;  %s343_s9 = sphi %s368_s9, %s404_s9  }
   0x3   : > { %p27_p1 = scmp.ge.s32.totalorder %s25_s12, 2  ;;  %p131_p2 = scmp.lt.s32.totalorder %s351_s11, 3 }
   0x5   : > { %s407_s12 = smov (%p27_p1, %s25_s12), 0  ;;  %p132_p3 = pnand %p298_p0, %p131_p2 }
   0x6   : > { %p158_p4 = scmp.lt.s32.totalorder (!%p132_p3), %s343_s9, 1 }
   0x7   : > { %135 = sbr.rel (%p132_p3) target bundleno = 33 (0x21), region = 24 }
   0xe   : > { %s409_s9 = smov (!%p158_p4, %s343_s9), 1 }
   0xf   : > { %s299_s13 = sshll.u32 %s409_s9, 3 }
  0x10   : > { %s164_s16 = scalar_lea.vmem %s401_s0, %s299_s13  ;;  %s168_s19 = scalar_lea.vmem %s402_s1, %s299_s13 }
  0x11   : > { %v179_v0 = vld [vmem:[%s164_s16] sm:$0xff]  ;;  %s172_s22 = scalar_lea.vmem %s403_s2, %s299_s13 }
  0x12   : > { %v181_v1 = vrot.slane %v179_v0, 4  ;;  %v190_v2 = vmul.f32 %v179_v0, %v179_v0 }
  0x14   : > { %v182_v3 = vadd.f32 %v181_v1, %v179_v0  ;;  %v191_v4 = vrot.slane %v190_v2, 4 }
  0x16   : > { %v183_v5 = vrot.slane %v182_v3, 2  ;;  %v192_v6 = vadd.f32 %v191_v4, %v190_v2 }
  0x18   : > { %v184_v7 = vadd.f32 %v183_v5, %v182_v3  ;;  %v193_v8 = vrot.slane %v192_v6, 2 }
  0x1a   : > { %v185_v9 = vrot.slane %v184_v7, 1  ;;  %v194_v10 = vadd.f32 %v193_v8, %v192_v6 }
  0x1c   : > { %v186_v11 = vadd.f32 %v185_v9, %v184_v7  ;;  %v195_v12 = vrot.slane %v194_v10, 1 }
  0x1e   : > { %v196_v13 = vadd.f32 %v195_v12, %v194_v10  ;;  %188 = vst [vmem:[%s168_s19] sm:$0xff] %v186_v11 }
  0x20   : > { %198 = vst [vmem:[%s172_s22] sm:$0xff] %v196_v13 }
  0x21 PF: > { %s13_s11 = sadd.s32 1, %s351_s11   ;;  %s404_s9 = smov %s347_s10 }
  0x22   : > { %p10_p5 = scmp.ge.s32.totalorder %s13_s11, 4   ;;  %s405_s10 = smov %s407_s12 }
  0x24   :  { %12 = sbr.rel (!%p10_p5) target bundleno = 2 (0x2), region = 70 }

// kernel: hourglass_bev_neck_forward.32
= control target key start
LH: loop header
LB: loop body
LE: loop exit
PB: predicated region body
PF: predicated region fallthrough
CT: control target
= control target key end

     0   :  { %s425_s12 = smov 0   ;;  %s427_s13 = smov 0   ;;  %s452_s0 = inlined_call_operand.vmem [shape: f32[2,8,128], index: 0, kind: input, shape index: {}]   ;;  %s453_s1 = inlined_call_operand.vmem [shape: f32[2,8,128], index: 1, kind: input, shape index: {}]   ;;  %s454_s2 = inlined_call_operand.vmem [shape: f32[2,8,128], index: 2, kind: input, shape index: {}]   ;;  %s455_s3 = inlined_call_operand.vmem [shape: f32[2,8,128], index: 3, kind: output, shape index: {}]  }
   0x1   :  { %s429_s14 = smov 0  }
   0x2 LB: > { %s25_s15 = sadd.s32 1, %s399_s13  ;;  %p348_p0 = scmp.ge.s32.totalorder %s403_s14, 1  ;;  %s403_s14 = sphi %s429_s14, %s13_s14   ;;  %s399_s13 = sphi %s427_s13, %s457_s13   ;;  %s395_s12 = sphi %s425_s12, %s456_s12  }
   0x3   : > { %p27_p1 = scmp.ge.s32.totalorder %s25_s15, 2  ;;  %p173_p2 = scmp.lt.s32.totalorder %s403_s14, 3 }
   0x5   : > { %s459_s15 = smov (%p27_p1, %s25_s15), 0  ;;  %p174_p3 = pnand %p348_p0, %p173_p2 }
   0x6   : > { %p209_p4 = scmp.lt.s32.totalorder (!%p174_p3), %s395_s12, 1 }
   0x7   : > { %177 = sbr.rel (%p174_p3) target bundleno = 26 (0x1a), region = 32 }
   0xe   : > { %s461_s12 = smov (!%p209_p4, %s395_s12), 1 }
   0xf   : > { %s349_s16 = sshll.u32 %s461_s12, 3 }
  0x10   : > { %s215_s19 = scalar_lea.vmem %s452_s0, %s349_s16  ;;  %s219_s22 = scalar_lea.vmem %s453_s1, %s349_s16 }
  0x11   : > { %s223_s25 = scalar_lea.vmem %s454_s2, %s349_s16  ;;  %v231_v0 = vld [vmem:[%s215_s19] sm:$0xff]  ;;  %s230_s28 = scalar_lea.vmem %s455_s3, %s349_s16 }
  0x12   : > { %v353_v1 = vld [vmem:[%s219_s22] ss:$0 sm:$0xff] }
  0x13   : > { %v237_v2 = vmul.f32 %v353_v1, %v231_v0  ;;  %v354_v3 = vld [vmem:[%s223_s25] ss:$0 sm:$0xff] }
  0x15   : > { %v243_v4 = vadd.f32 %v354_v3, %v237_v2 }
  0x17   : > { %v244_v5 = vmax.f32 %v243_v4, 0.0 }
  0x19   : > { %245 = vst [vmem:[%s230_s28] sm:$0xff] %v244_v5 }
  0x1a PF: > { %s13_s14 = sadd.s32 1, %s403_s14   ;;  %s456_s12 = smov %s399_s13 }
  0x1b   : > { %p10_p5 = scmp.ge.s32.totalorder %s13_s14, 4   ;;  %s457_s13 = smov %s459_s15 }
  0x1d   :  { %12 = sbr.rel (!%p10_p5) target bundleno = 2 (0x2), region = 68 }

// kernel: hourglass_bev_neck_forward.30
= control target key start
LH: loop header
LB: loop body
LE: loop exit
PB: predicated region body
PF: predicated region fallthrough
CT: control target
= control target key end

     0   :  { %vm362_vm0 = vcmask 523264   ;;  %s867_s1 = inlined_call_operand.vmem [shape: bf16[576,64], index: 1, kind: input, shape index: {}]   ;;  %s868_s0 = inlined_call_operand.vmem [shape: bf16[32,576], index: 0, kind: input, shape index: {}]   ;;  %s869_s2 = inlined_call_operand.vmem [shape: f32[32,64], index: 2, kind: output, shape index: {}]  }
   0x1   :  { %v646_v0 = vld [vmem:[%s867_s1 + $0x40] sm:$0xff]   ;;  %v650_v4 = vld [vmem:[%s867_s1 + $0x48] sm:$0xff]   ;;  %v654_v8 = vld [vmem:[%s867_s1 + $0x50] sm:$0xff]  }
   0x2   :  { %v647_v1 = vld [vmem:[%s867_s1 + $0xc0] sm:$0xff]   ;;  %572 = vmatprep.subr.bf16.mxu0 %v646_v0  ;;  %v651_v5 = vld [vmem:[%s867_s1 + $0xc8] sm:$0xff]   ;;  %v655_v9 = vld [vmem:[%s867_s1 + $0xd0] sm:$0xff]  }
   0x3   :  { %v648_v2 = vld [vmem:[%s867_s1] sm:$0xff]   ;;  %600 = vmatprep.subr.bf16.mxu1 %v647_v1  ;;  %v652_v6 = vld [vmem:[%s867_s1 + $0x8] sm:$0xff]   ;;  %v656_v10 = vld [vmem:[%s867_s1 + $0x10] sm:$0xff]  }
   0x4   :  { %v649_v3 = vld [vmem:[%s867_s1 + $0x80] sm:$0xff]   ;;  %573 = vmatpush3.bf16.msra.mxu0 %v648_v2  ;;  %v653_v7 = vld [vmem:[%s867_s1 + $0x88] sm:$0xff]   ;;  %v657_v11 = vld [vmem:[%s867_s1 + $0x90] sm:$0xff]  }
   0x5   :  { %601 = vmatpush3.bf16.msra.mxu1 %v649_v3  ;;  %574 = vmatprep.subr.bf16.mxu0 %v650_v4  ;;  %v658_v12 = vld [vmem:[%s867_s1 + $0x58] sm:$0xff]   ;;  %v662_v16 = vld [vmem:[%s867_s1 + $0x60] sm:$0xff]   ;;  %v666_v20 = vld [vmem:[%s867_s1 + $0x68] sm:$0xff]  }
   0x6   :  { %602 = vmatprep.subr.bf16.mxu1 %v651_v5  ;;  %v659_v13 = vld [vmem:[%s867_s1 + $0xd8] sm:$0xff]   ;;  %v663_v17 = vld [vmem:[%s867_s1 + $0xe0] sm:$0xff]   ;;  %v667_v21 = vld [vmem:[%s867_s1 + $0xe8] sm:$0xff]  }
   0x7   :  { %v660_v14 = vld [vmem:[%s867_s1 + $0x18] sm:$0xff]   ;;  %v664_v18 = vld [vmem:[%s867_s1 + $0x20] sm:$0xff]   ;;  %v668_v22 = vld [vmem:[%s867_s1 + $0x28] sm:$0xff]  }
   0x8   :  { %575 = vmatpush3.bf16.msra.mxu0 %v652_v6  ;;  %v661_v15 = vld [vmem:[%s867_s1 + $0x98] sm:$0xff]   ;;  %v665_v19 = vld [vmem:[%s867_s1 + $0xa0] sm:$0xff]   ;;  %v669_v23 = vld [vmem:[%s867_s1 + $0xa8] sm:$0xff]  }
   0x9   :  { %603 = vmatpush3.bf16.msra.mxu1 %v653_v7  ;;  %576 = vmatprep.subr.bf16.mxu0 %v654_v8  ;;  %v670_v24 = vld [vmem:[%s867_s1 + $0x70] sm:$0xff]   ;;  %v674_v28 = vld [vmem:[%s867_s1 + $0x78] sm:$0xff]   ;;  %v683_v35 = vld [vmem:[%s868_s0 + $0xc] ss:$20 sps:$4 sm:$0xff]  }
   0xa   :  { %604 = vmatprep.subr.bf16.mxu1 %v655_v9  ;;  %v671_v25 = vld [vmem:[%s867_s1 + $0xf0] sm:$0xff]   ;;  %v675_v29 = vld [vmem:[%s867_s1 + $0xf8] sm:$0xff]   ;;  %v684_v36 = vld [vmem:[%s867_s1 + $0x100] sm:$0xff]   ;;  %450 = vmatprep.mubr.bf16.mxu1 %v683_v35 }
   0xb   :  { %v672_v26 = vld [vmem:[%s867_s1 + $0x30] sm:$0xff]   ;;  %v676_v30 = vld [vmem:[%s867_s1 + $0x38] sm:$0xff]   ;;  %v685_v37 = vld [vmem:[%s867_s1 + $0x108] sm:$0xff]  }
   0xc   :  { %577 = vmatpush3.bf16.msra.mxu0 %v656_v10  ;;  %v673_v27 = vld [vmem:[%s867_s1 + $0xb0] sm:$0xff]   ;;  %v677_v31 = vld [vmem:[%s867_s1 + $0xb8] sm:$0xff]   ;;  %v686_v38 = vld [vmem:[%s868_s0 + $0x2c] ss:$20 sps:$4 sm:$0xff]  }
   0xd   :  { %605 = vmatpush3.bf16.msra.mxu1 %v657_v11  ;;  %578 = vmatprep.subr.bf16.mxu0 %v658_v12  ;;  %v678_v32 = vld [vmem:[%s868_s0] ss:$20 sps:$4 sm:$0xff]   ;;  %v680_v33 = vld [vmem:[%s868_s0 + $0x4] ss:$20 sps:$4 sm:$0xff]   ;;  %v681_v34 = vld [vmem:[%s868_s0 + $0x8] ss:$20 sps:$4 sm:$0xff]  }
   0xe   :  { %606 = vmatprep.subr.bf16.mxu1 %v659_v13  ;;  %401 = vmatprep.mubr.bf16.mxu0 %v680_v33  ;;  %v688_v39 = vld [vmem:[%s868_s0 + $0x34] ss:$20 sps:$4 sm:$0xff]   ;;  %v691_v42 = vld [vmem:[%s868_s0 + $0x30] ss:$20 sps:$4 sm:$0xff]   ;;  %v693_v44 = vld [vmem:[%s867_s1 + $0x118] sm:$0xff]  }
   0xf   :  { %v690_v40 = vld [vmem:[%s868_s0 + $0x28] ss:$20 sps:$4 sm:$0xff]   ;;  %v692_v41 = vld [vmem:[%s867_s1 + $0x110] sm:$0xff]   ;;  %v695_v45 = vld [vmem:[%s868_s0 + $0x38] ss:$20 sps:$4 sm:$0xff]  }
  0x10   :  { %579 = vmatpush3.bf16.msra.mxu0 %v660_v14  ;;  %v694_v43 = vld [vmem:[%s868_s0 + $0x10] ss:$20 sps:$4 sm:$0xff]  }
  0x11   :  { %607 = vmatpush3.bf16.msra.mxu1 %v661_v15  ;;  %580 = vmatprep.subr.bf16.mxu0 %v662_v16 }
  0x12   :  { %608 = vmatprep.subr.bf16.mxu1 %v663_v17 }
  0x14   :  { %581 = vmatpush3.bf16.msra.mxu0 %v664_v18 }
  0x15   :  { %609 = vmatpush3.bf16.msra.mxu1 %v665_v19  ;;  %582 = vmatprep.subr.bf16.mxu0 %v666_v20 }
  0x16   :  { %610 = vmatprep.subr.bf16.mxu1 %v667_v21 }
  0x18   :  { %583 = vmatpush3.bf16.msra.mxu0 %v668_v22 }
  0x19   :  { %611 = vmatpush3.bf16.msra.mxu1 %v669_v23  ;;  %584 = vmatprep.subr.bf16.mxu0 %v670_v24 }
  0x1a   :  { %612 = vmatprep.subr.bf16.mxu1 %v671_v25 }
  0x1c   :  { %585 = vmatpush3.bf16.msra.mxu0 %v672_v26 }
  0x1d   :  { %613 = vmatpush3.bf16.msra.mxu1 %v673_v27  ;;  %586 = vmatprep.subr.bf16.mxu0 %v674_v28 }
  0x1e   :  { %614 = vmatprep.subr.bf16.mxu1 %v675_v29 }
  0x20   :  { %587 = vmatpush3.bf16.msra.mxu0 %v676_v30 }
  0x21   :  { %615 = vmatpush3.bf16.msra.mxu1 %v677_v31  ;;  %634 = vmatprep.subr.bf16.mxu0 %v684_v36 }
  0x23   :  { %402 = vmatmul.mubr.bf16.vlgmr.msra.gmra.mrb[0].mxu0 %v678_v32 }
  0x24   :  { %451 = vmatmul.mubr.bf16.vlgmr.msra.gmra.mrb[0].mxu1 %v681_v34  ;;  %635 = vmatpush3.bf16.msra.mxu0 %v684_v36 }
  0x25   :  { %636 = vmatprep.subr.bf16.mxu0 %v685_v37  ;;  %409 = vmatprep.mubr.bf16.mxu0 %v686_v38 }
  0x26   :  { %458 = vmatprep.mubr.bf16.mxu1 %v688_v39 }
  0x28   :  { %637 = vmatpush3.bf16.msra.mxu0 %v685_v37 }
  0x29   :  { %638 = vmatprep.subr.bf16.mxu0 %v692_v41 }
  0x2b   :  { %410 = vmatmul.mubr.bf16.gmra.mrb[4].mxu0 %v690_v40 }
  0x2c   :  { %459 = vmatmul.mubr.bf16.gmra.mrb[4].mxu1 %v691_v42  ;;  %642 = vmatprep.mubr.msk.bf16.mxu0 %vm362_vm0, %v694_v43 }
  0x2d   :  { %639 = vmatpush3.bf16.msra.mxu0 %v692_v41 }
  0x2e   :  { %640 = vmatprep.subr.bf16.mxu0 %v693_v44 }
  0x31   :  { %641 = vmatpush3.bf16.msra.mxu0 %v693_v44 }
  0x34   :  { %643 = vmatmul.mubr.msk.bf16.vlgmr.msra.gmra.mrb[8].mxu0 %vm362_vm0, %v695_v45 }
  0xf6   :  { %v588_v46 = vpop.f32.mrb[0].mxu0 }
  0xf7   :  { %v616_v47 = vpop.f32.mrb[0].mxu1  ;;  %v589_v48 = vpop.f32.mrb[1].mxu0 }
  0xf8   :  { %v590_v49 = vadd.f32 %v589_v48, %v588_v46  ;;  %v617_v50 = vpop.f32.mrb[1].mxu1  ;;  %v591_v51 = vpop.f32.mrb[2].mxu0 }
  0xf9   :  { %v618_v52 = vadd.f32 %v617_v50, %v616_v47  ;;  %v619_v53 = vpop.f32.mrb[2].mxu1  ;;  %v592_v54 = vpop.f32.mrb[3].mxu0 }
  0xfa   :  { %v593_v55 = vadd.f32 %v592_v54, %v591_v51  ;;  %v620_v56 = vpop.f32.mrb[3].mxu1 }
  0xfb   :  { %v621_v57 = vadd.f32 %v620_v56, %v619_v53  ;;  %v453_v58 = vadd.f32 %v618_v52, %v590_v49 }
  0xfd   :  { %v456_v59 = vadd.f32 %v621_v57, %v593_v55 }
  0xfe   :  { %v594_v60 = vpop.f32.mrb[4].mxu0 }
  0xff   :  { %v622_v61 = vpop.f32.mrb[4].mxu1  ;;  %v595_v62 = vpop.f32.mrb[5].mxu0 }
 0x100   :  { %v596_v63 = vadd.f32 %v595_v62, %v594_v60  ;;  %v623_v0 = vpop.f32.mrb[5].mxu1  ;;  %v597_v1 = vpop.f32.mrb[6].mxu0 }
 0x101   :  { %v624_v2 = vadd.f32 %v623_v0, %v622_v61  ;;  %v625_v3 = vpop.f32.mrb[6].mxu1  ;;  %v598_v4 = vpop.f32.mrb[7].mxu0 }
 0x102   :  { %v599_v5 = vadd.f32 %v598_v4, %v597_v1  ;;  %v626_v6 = vpop.f32.mrb[7].mxu1 }
 0x103   :  { %v627_v7 = vadd.f32 %v626_v6, %v625_v3  ;;  %v461_v8 = vadd.f32 %v624_v2, %v596_v63 }
 0x105   :  { %v464_v9 = vadd.f32 %v627_v7, %v599_v5 }
 0x107   :  { %v644_v10 = vpop.f32.mrb[8].mxu0 }
 0x108   :  { %v510_v11 = vadd.f32 %v644_v10, %v461_v8  ;;  %v501_v12 = vpop.f32.mrb[9].mxu0 }
 0x109   :  { %v502_v13 = vadd.f32 %v501_v12, %v453_v58  ;;  %v645_v14 = vpop.f32.mrb[10].mxu0 }
 0x10a   :  { %518 = vst.msk [vmem:[%s869_s2 + $0x10] sm:$0xff] %vm362_vm0, %v510_v11  ;;  %v513_v15 = vadd.f32 %v645_v14, %v464_v9  ;;  %v504_v16 = vpop.f32.mrb[11].mxu0 }
 0x10b   :  { %516 = vst.msk [vmem:[%s869_s2] sm:$0xff] %vm362_vm0, %v502_v13  ;;  %v505_v17 = vadd.f32 %v504_v16, %v456_v59 }
 0x10c   :  { %519 = vst.msk [vmem:[%s869_s2 + $0x18] sm:$0xff] %vm362_vm0, %v513_v15 }
 0x10d   :  { %517 = vst.msk [vmem:[%s869_s2 + $0x8] sm:$0xff] %vm362_vm0, %v505_v17 }

// kernel: hourglass_bev_neck_forward.36
= control target key start
LH: loop header
LB: loop body
LE: loop exit
PB: predicated region body
PF: predicated region fallthrough
CT: control target
= control target key end

     0   :  { %s561_s1 = inlined_call_operand.vmem [shape: bf16[256,256], index: 1, kind: input, shape index: {}]   ;;  %s562_s0 = inlined_call_operand.vmem [shape: bf16[32,256], index: 0, kind: input, shape index: {}]   ;;  %s563_s2 = inlined_call_operand.vmem [shape: f32[32,256], index: 2, kind: output, shape index: {}]  }
   0x1   :  { %v360_v0 = vld [vmem:[%s561_s1 + $0x4] ss:$8 sps:$4 sm:$0xff]   ;;  %v362_v1 = vld [vmem:[%s561_s1] ss:$8 sps:$4 sm:$0xff]   ;;  %v363_v2 = vld [vmem:[%s561_s1 + $0x14] ss:$8 sps:$4 sm:$0xff]  }
   0x2   :  { %227 = vmatprep.subr.bf16.mxu0 %v360_v0  ;;  %328 = vmatprep.subr.bf16.mxu1 %v360_v0  ;;  %v365_v3 = vld [vmem:[%s561_s1 + $0x10] ss:$8 sps:$4 sm:$0xff]   ;;  %v366_v4 = vld [vmem:[%s561_s1 + $0x24] ss:$8 sps:$4 sm:$0xff]   ;;  %v368_v5 = vld [vmem:[%s561_s1 + $0x20] ss:$8 sps:$4 sm:$0xff]  }
   0x3   :  { %228 = vmatpush1.bf16.msra.mxu0 %v362_v1  ;;  %344 = vmatpush1.bf16.msra.mxu1 %v362_v1  ;;  %v369_v6 = vld [vmem:[%s561_s1 + $0x34] ss:$8 sps:$4 sm:$0xff]   ;;  %v371_v7 = vld [vmem:[%s561_s1 + $0x30] ss:$8 sps:$4 sm:$0xff]   ;;  %v372_v8 = vld [vmem:[%s561_s1 + $0x44] ss:$8 sps:$4 sm:$0xff]  }
   0x4   :  { %229 = vmatprep.subr.bf16.mxu0 %v363_v2  ;;  %329 = vmatprep.subr.bf16.mxu1 %v363_v2  ;;  %v374_v9 = vld [vmem:[%s561_s1 + $0x40] ss:$8 sps:$4 sm:$0xff]   ;;  %v375_v10 = vld [vmem:[%s561_s1 + $0x54] ss:$8 sps:$4 sm:$0xff]   ;;  %v377_v11 = vld [vmem:[%s561_s1 + $0x50] ss:$8 sps:$4 sm:$0xff]  }
   0x5   :  { %v378_v12 = vld [vmem:[%s561_s1 + $0x64] ss:$8 sps:$4 sm:$0xff]   ;;  %v380_v14 = vld [vmem:[%s561_s1 + $0x60] ss:$8 sps:$4 sm:$0xff]   ;;  %v413_v15 = vld [vmem:[%s562_s0 + $0x14] ss:$8 sps:$4 sm:$0xff]  }
   0x6   :  { %v410_v13 = vld [vmem:[%s562_s0 + $0x4] ss:$8 sps:$4 sm:$0xff]   ;;  %v381_v16 = vld [vmem:[%s561_s1 + $0x74] ss:$8 sps:$4 sm:$0xff]   ;;  %269 = vmatprep.mubr.bf16.mxu1 %v413_v15  ;;  %v383_v17 = vld [vmem:[%s561_s1 + $0x70] ss:$8 sps:$4 sm:$0xff]  }
   0x7   :  { %230 = vmatpush1.bf16.msra.mxu0 %v365_v3  ;;  %345 = vmatpush1.bf16.msra.mxu1 %v365_v3  ;;  %v384_v18 = vld [vmem:[%s561_s1 + $0x84] ss:$8 sps:$4 sm:$0xff]   ;;  %v386_v19 = vld [vmem:[%s561_s1 + $0x80] ss:$8 sps:$4 sm:$0xff]   ;;  %v387_v20 = vld [vmem:[%s561_s1 + $0x94] ss:$8 sps:$4 sm:$0xff]  }
   0x8   :  { %231 = vmatprep.subr.bf16.mxu0 %v366_v4  ;;  %330 = vmatprep.subr.bf16.mxu1 %v366_v4  ;;  %v389_v21 = vld [vmem:[%s561_s1 + $0x90] ss:$8 sps:$4 sm:$0xff]   ;;  %v390_v22 = vld [vmem:[%s561_s1 + $0xa4] ss:$8 sps:$4 sm:$0xff]   ;;  %v392_v23 = vld [vmem:[%s561_s1 + $0xa0] ss:$8 sps:$4 sm:$0xff]  }
   0x9   :  { %259 = vmatprep.mubr.bf16.mxu0 %v410_v13  ;;  %v393_v24 = vld [vmem:[%s561_s1 + $0xb4] ss:$8 sps:$4 sm:$0xff]   ;;  %v395_v25 = vld [vmem:[%s561_s1 + $0xb0] ss:$8 sps:$4 sm:$0xff]   ;;  %v396_v26 = vld [vmem:[%s561_s1 + $0xc4] ss:$8 sps:$4 sm:$0xff]  }
   0xa   :  { %v398_v27 = vld [vmem:[%s561_s1 + $0xc0] ss:$8 sps:$4 sm:$0xff]   ;;  %v399_v28 = vld [vmem:[%s561_s1 + $0xd4] ss:$8 sps:$4 sm:$0xff]   ;;  %v401_v29 = vld [vmem:[%s561_s1 + $0xd0] ss:$8 sps:$4 sm:$0xff]  }
   0xb   :  { %232 = vmatpush1.bf16.msra.mxu0 %v368_v5  ;;  %346 = vmatpush1.bf16.msra.mxu1 %v368_v5  ;;  %v402_v30 = vld [vmem:[%s561_s1 + $0xe4] ss:$8 sps:$4 sm:$0xff]   ;;  %v404_v31 = vld [vmem:[%s561_s1 + $0xe0] ss:$8 sps:$4 sm:$0xff]   ;;  %v405_v32 = vld [vmem:[%s561_s1 + $0xf4] ss:$8 sps:$4 sm:$0xff]  }
   0xc   :  { %233 = vmatprep.subr.bf16.mxu0 %v369_v6  ;;  %331 = vmatprep.subr.bf16.mxu1 %v369_v6  ;;  %v407_v33 = vld [vmem:[%s561_s1 + $0xf0] ss:$8 sps:$4 sm:$0xff]   ;;  %v408_v34 = vld [vmem:[%s562_s0] ss:$8 sps:$4 sm:$0xff]  }
   0xd   :  { %v411_v35 = vld [vmem:[%s562_s0 + $0x10] ss:$8 sps:$4 sm:$0xff]  }
   0xf   :  { %234 = vmatpush1.bf16.msra.mxu0 %v371_v7  ;;  %347 = vmatpush1.bf16.msra.mxu1 %v371_v7 }
  0x10   :  { %235 = vmatprep.subr.bf16.mxu0 %v372_v8  ;;  %332 = vmatprep.subr.bf16.mxu1 %v372_v8 }
  0x13   :  { %236 = vmatpush1.bf16.msra.mxu0 %v374_v9  ;;  %348 = vmatpush1.bf16.msra.mxu1 %v374_v9 }
  0x14   :  { %237 = vmatprep.subr.bf16.mxu0 %v375_v10  ;;  %333 = vmatprep.subr.bf16.mxu1 %v375_v10 }
  0x17   :  { %238 = vmatpush1.bf16.msra.mxu0 %v377_v11  ;;  %349 = vmatpush1.bf16.msra.mxu1 %v377_v11 }
  0x18   :  { %239 = vmatprep.subr.bf16.mxu0 %v378_v12  ;;  %334 = vmatprep.subr.bf16.mxu1 %v378_v12 }
  0x1b   :  { %240 = vmatpush1.bf16.msra.mxu0 %v380_v14  ;;  %350 = vmatpush1.bf16.msra.mxu1 %v380_v14 }
  0x1c   :  { %241 = vmatprep.subr.bf16.mxu0 %v381_v16  ;;  %335 = vmatprep.subr.bf16.mxu1 %v381_v16 }
  0x1f   :  { %242 = vmatpush1.bf16.msra.mxu0 %v383_v17  ;;  %351 = vmatpush1.bf16.msra.mxu1 %v383_v17 }
  0x20   :  { %243 = vmatprep.subr.bf16.mxu0 %v384_v18  ;;  %336 = vmatprep.subr.bf16.mxu1 %v384_v18 }
  0x23   :  { %244 = vmatpush1.bf16.msra.mxu0 %v386_v19  ;;  %352 = vmatpush1.bf16.msra.mxu1 %v386_v19 }
  0x24   :  { %245 = vmatprep.subr.bf16.mxu0 %v387_v20  ;;  %337 = vmatprep.subr.bf16.mxu1 %v387_v20 }
  0x27   :  { %246 = vmatpush1.bf16.msra.mxu0 %v389_v21  ;;  %353 = vmatpush1.bf16.msra.mxu1 %v389_v21 }
  0x28   :  { %247 = vmatprep.subr.bf16.mxu0 %v390_v22  ;;  %338 = vmatprep.subr.bf16.mxu1 %v390_v22 }
  0x2b   :  { %248 = vmatpush1.bf16.msra.mxu0 %v392_v23  ;;  %354 = vmatpush1.bf16.msra.mxu1 %v392_v23 }
  0x2c   :  { %249 = vmatprep.subr.bf16.mxu0 %v393_v24  ;;  %339 = vmatprep.subr.bf16.mxu1 %v393_v24 }
  0x2f   :  { %250 = vmatpush1.bf16.msra.mxu0 %v395_v25  ;;  %355 = vmatpush1.bf16.msra.mxu1 %v395_v25 }
  0x30   :  { %251 = vmatprep.subr.bf16.mxu0 %v396_v26  ;;  %340 = vmatprep.subr.bf16.mxu1 %v396_v26 }
  0x33   :  { %252 = vmatpush1.bf16.msra.mxu0 %v398_v27  ;;  %356 = vmatpush1.bf16.msra.mxu1 %v398_v27 }
  0x34   :  { %253 = vmatprep.subr.bf16.mxu0 %v399_v28  ;;  %341 = vmatprep.subr.bf16.mxu1 %v399_v28 }
  0x37   :  { %254 = vmatpush1.bf16.msra.mxu0 %v401_v29  ;;  %357 = vmatpush1.bf16.msra.mxu1 %v401_v29 }
  0x38   :  { %255 = vmatprep.subr.bf16.mxu0 %v402_v30  ;;  %342 = vmatprep.subr.bf16.mxu1 %v402_v30 }
  0x3b   :  { %256 = vmatpush1.bf16.msra.mxu0 %v404_v31  ;;  %358 = vmatpush1.bf16.msra.mxu1 %v404_v31 }
  0x3c   :  { %257 = vmatprep.subr.bf16.mxu0 %v405_v32  ;;  %343 = vmatprep.subr.bf16.mxu1 %v405_v32 }
  0x3f   :  { %258 = vmatpush1.bf16.msra.mxu0 %v407_v33  ;;  %359 = vmatpush1.bf16.msra.mxu1 %v407_v33 }
  0x42   :  { %260 = vmatmul.mubr.bf16.vlgmr.msra.gmra.mrb[0].mxu0 %v408_v34  ;;  %270 = vmatmul.mubr.bf16.vlgmr.msra.gmra.mrb[0].mxu1 %v411_v35 }
 0x115   :  { %v261_v36 = vpop.f32.mrb[0].mxu0  ;;  %v271_v37 = vpop.f32.mrb[0].mxu1 }
 0x116   :  { %280 = vst [vmem:[%s563_s2] sm:$0xff] %v261_v36  ;;  %284 = vst [vmem:[%s563_s2 + $0x20] sm:$0xff] %v271_v37  ;;  %v263_v38 = vpop.f32.mrb[1].mxu0  ;;  %v273_v39 = vpop.f32.mrb[1].mxu1 }
 0x117   :  { %281 = vst [vmem:[%s563_s2 + $0x8] sm:$0xff] %v263_v38  ;;  %285 = vst [vmem:[%s563_s2 + $0x28] sm:$0xff] %v273_v39  ;;  %v265_v40 = vpop.f32.mrb[2].mxu0  ;;  %v275_v41 = vpop.f32.mrb[2].mxu1 }
 0x118   :  { %282 = vst [vmem:[%s563_s2 + $0x10] sm:$0xff] %v265_v40  ;;  %286 = vst [vmem:[%s563_s2 + $0x30] sm:$0xff] %v275_v41  ;;  %v267_v42 = vpop.f32.mrb[3].mxu0  ;;  %v277_v43 = vpop.f32.mrb[3].mxu1 }
 0x119   :  { %283 = vst [vmem:[%s563_s2 + $0x18] sm:$0xff] %v267_v42  ;;  %287 = vst [vmem:[%s563_s2 + $0x38] sm:$0xff] %v277_v43 }

// kernel: hourglass_bev_neck_forward.38
= control target key start
LH: loop header
LB: loop body
LE: loop exit
PB: predicated region body
PF: predicated region fallthrough
CT: control target
= control target key end

     0   :  { %s567_s15 = smov 0   ;;  %s569_s16 = smov 0   ;;  %s609_s0 = inlined_call_operand.vmem [shape: f32[2,32,128], index: 0, kind: input, shape index: {}]   ;;  %s610_s1 = inlined_call_operand.vmem [shape: f32[2,32,128], index: 1, kind: input, shape index: {}]   ;;  %s611_s2 = inlined_call_operand.vmem [shape: f32[2,8,128], index: 2, kind: input, shape index: {}]   ;;  %s612_s3 = inlined_call_operand.vmem [shape: f32[2,8,128], index: 3, kind: input, shape index: {}]   ;;  %s613_s4 = inlined_call_operand.vmem [shape: f32[2,32,128], index: 4, kind: output, shape index: {}]  }
   0x1   :  { %s571_s17 = smov 0  }
   0x2 LB: > { %s26_s18 = sadd.s32 1, %s536_s16  ;;  %p478_p0 = scmp.ge.s32.totalorder %s540_s17, 1  ;;  %s540_s17 = sphi %s571_s17, %s14_s17   ;;  %s536_s16 = sphi %s569_s16, %s615_s16   ;;  %s532_s15 = sphi %s567_s15, %s614_s15  }
   0x3   : > { %p28_p1 = scmp.ge.s32.totalorder %s26_s18, 2  ;;  %p218_p2 = scmp.lt.s32.totalorder %s540_s17, 3 }
   0x5   : > { %s617_s18 = smov (%p28_p1, %s26_s18), 0  ;;  %p219_p3 = pnand %p478_p0, %p218_p2 }
   0x6   : > { %p270_p4 = scmp.lt.s32.totalorder (!%p219_p3), %s532_s15, 1 }
   0x7   : > { %222 = sbr.rel (%p219_p3) target bundleno = 29 (0x1d), region = 36 }
   0xe   : > { %s619_s15 = smov (!%p270_p4, %s532_s15), 1 }
   0xf   : > { %s491_s19 = sshll.u32 %s619_s15, 5  ;;  %s483_s20 = sshll.u32 %s619_s15, 3 }
  0x10   : > { %s277_s23 = scalar_lea.vmem %s609_s0, %s491_s19  ;;  %s287_s26 = scalar_lea.vmem %s610_s1, %s491_s19 }
  0x11   : > { %s292_s29 = scalar_lea.vmem %s611_s2, %s483_s20  ;;  %s296_s6 = scalar_lea.vmem %s612_s3, %s483_s20  ;;  %v307_v0 = vld [vmem:[%s277_s23] sm:$0xff]  ;;  %v308_v1 = vld [vmem:[%s277_s23 + $0x8] sm:$0xff]  ;;  %v309_v6 = vld [vmem:[%s277_s23 + $0x10] sm:$0xff] }
  0x12   : > { %v487_v2 = vld [vmem:[%s292_s29] ss:$0 sm:$0xff]  ;;  %v310_v7 = vld [vmem:[%s277_s23 + $0x18] sm:$0xff]  ;;  %v330_v9 = vld [vmem:[%s287_s26 + $0x8] sm:$0xff]  ;;  %s305_s9 = scalar_lea.vmem %s613_s4, %s491_s19 }
  0x13   : > { %v488_v3 = vld [vmem:[%s296_s6] ss:$0 sm:$0xff]  ;;  %v316_v4 = vmul.f32 %v487_v2, %v307_v0  ;;  %v317_v5 = vmul.f32 %v487_v2, %v308_v1  ;;  %v318_v10 = vmul.f32 %v487_v2, %v309_v6  ;;  %v319_v11 = vmul.f32 %v487_v2, %v310_v7  ;;  %v331_v14 = vld [vmem:[%s287_s26 + $0x10] sm:$0xff]  ;;  %v332_v15 = vld [vmem:[%s287_s26 + $0x18] sm:$0xff] }
  0x14   : > { %v329_v8 = vld [vmem:[%s287_s26] sm:$0xff] }
  0x15   : > { %v325_v12 = vadd.f32 %v488_v3, %v316_v4  ;;  %v326_v13 = vadd.f32 %v488_v3, %v317_v5  ;;  %v327_v16 = vadd.f32 %v488_v3, %v318_v10  ;;  %v328_v17 = vadd.f32 %v488_v3, %v319_v11 }
  0x17   : > { %v333_v18 = vadd.f32 %v329_v8, %v325_v12  ;;  %v334_v19 = vadd.f32 %v330_v9, %v326_v13  ;;  %v335_v20 = vadd.f32 %v331_v14, %v327_v16  ;;  %v336_v21 = vadd.f32 %v332_v15, %v328_v17 }
  0x19   : > { %v337_v22 = vmax.f32 %v333_v18, 0.0  ;;  %v338_v23 = vmax.f32 %v334_v19, 0.0  ;;  %v339_v24 = vmax.f32 %v335_v20, 0.0  ;;  %v340_v25 = vmax.f32 %v336_v21, 0.0 }
  0x1b   : > { %341 = vst [vmem:[%s305_s9] sm:$0xff] %v337_v22  ;;  %342 = vst [vmem:[%s305_s9 + $0x8] sm:$0xff] %v338_v23 }
  0x1c   : > { %343 = vst [vmem:[%s305_s9 + $0x10] sm:$0xff] %v339_v24  ;;  %344 = vst [vmem:[%s305_s9 + $0x18] sm:$0xff] %v340_v25 }
  0x1d PF: > { %s14_s17 = sadd.s32 1, %s540_s17   ;;  %s614_s15 = smov %s536_s16 }
  0x1e   : > { %p11_p5 = scmp.ge.s32.totalorder %s14_s17, 4   ;;  %s615_s16 = smov %s617_s18 }
  0x20   :  { %13 = sbr.rel (!%p11_p5) target bundleno = 2 (0x2), region = 75 }

// kernel: hourglass_bev_neck_forward.39
= control target key start
LH: loop header
LB: loop body
LE: loop exit
PB: predicated region body
PF: predicated region fallthrough
CT: control target
= control target key end

     0   :  { %s664_s1 = inlined_call_operand.vmem [shape: bf16[256,128], index: 1, kind: input, shape index: {}]   ;;  %s665_s0 = inlined_call_operand.vmem [shape: bf16[128,256], index: 0, kind: input, shape index: {}]   ;;  %s666_s2 = inlined_call_operand.vmem [shape: f32[128,128], index: 2, kind: output, shape index: {}]  }
   0x1   :  { %v465_v0 = vld [vmem:[%s664_s1 + $0x40] sm:$0xff]   ;;  %v467_v2 = vld [vmem:[%s664_s1 + $0x48] sm:$0xff]   ;;  %v469_v4 = vld [vmem:[%s664_s1 + $0x50] sm:$0xff]  }
   0x2   :  { %v466_v1 = vld [vmem:[%s664_s1] sm:$0xff]   ;;  %385 = vmatprep.subr.bf16.mxu0 %v465_v0  ;;  %449 = vmatprep.subr.bf16.mxu1 %v465_v0  ;;  %v468_v3 = vld [vmem:[%s664_s1 + $0x8] sm:$0xff]   ;;  %v470_v5 = vld [vmem:[%s664_s1 + $0x10] sm:$0xff]  }
   0x3   :  { %386 = vmatpush3.bf16.msra.mxu0 %v466_v1  ;;  %457 = vmatpush3.bf16.msra.mxu1 %v466_v1  ;;  %v471_v6 = vld [vmem:[%s664_s1 + $0x58] sm:$0xff]   ;;  %v473_v8 = vld [vmem:[%s664_s1 + $0x60] sm:$0xff]   ;;  %v475_v10 = vld [vmem:[%s664_s1 + $0x68] sm:$0xff]  }
   0x4   :  { %387 = vmatprep.subr.bf16.mxu0 %v467_v2  ;;  %450 = vmatprep.subr.bf16.mxu1 %v467_v2  ;;  %v472_v7 = vld [vmem:[%s664_s1 + $0x18] sm:$0xff]   ;;  %v474_v9 = vld [vmem:[%s664_s1 + $0x20] sm:$0xff]   ;;  %v476_v13 = vld [vmem:[%s664_s1 + $0x28] sm:$0xff]  }
   0x5   :  { %v483_v11 = vld [vmem:[%s665_s0 + $0x4] ss:$8 sps:$4 sm:$0xff]   ;;  %v477_v14 = vld [vmem:[%s664_s1 + $0x70] sm:$0xff]   ;;  %v479_v16 = vld [vmem:[%s664_s1 + $0x78] sm:$0xff]  }
   0x6   :  { %v486_v12 = vld [vmem:[%s665_s0 + $0x44] ss:$8 sps:$4 sm:$0xff]   ;;  %268 = vmatprep.mubr.bf16.mxu0 %v483_v11  ;;  %v478_v15 = vld [vmem:[%s664_s1 + $0x30] sm:$0xff]   ;;  %v480_v17 = vld [vmem:[%s664_s1 + $0x38] sm:$0xff]  }
   0x7   :  { %388 = vmatpush3.bf16.msra.mxu0 %v468_v3  ;;  %458 = vmatpush3.bf16.msra.mxu1 %v468_v3  ;;  %v481_v18 = vld [vmem:[%s665_s0] ss:$8 sps:$4 sm:$0xff]   ;;  %v487_v20 = vld [vmem:[%s665_s0 + $0x14] ss:$8 sps:$4 sm:$0xff]   ;;  %v491_v22 = vld [vmem:[%s665_s0 + $0x10] ss:$8 sps:$4 sm:$0xff]  }
   0x8   :  { %389 = vmatprep.subr.bf16.mxu0 %v469_v4  ;;  %451 = vmatprep.subr.bf16.mxu1 %v469_v4  ;;  %v484_v19 = vld [vmem:[%s665_s0 + $0x40] ss:$8 sps:$4 sm:$0xff]   ;;  %v489_v21 = vld [vmem:[%s665_s0 + $0x54] ss:$8 sps:$4 sm:$0xff]   ;;  %v492_v23 = vld [vmem:[%s665_s0 + $0x50] ss:$8 sps:$4 sm:$0xff]  }
   0x9   :  { %300 = vmatprep.mubr.bf16.mxu1 %v486_v12  ;;  %v493_v24 = vld [vmem:[%s665_s0 + $0x24] ss:$8 sps:$4 sm:$0xff]   ;;  %v497_v26 = vld [vmem:[%s665_s0 + $0x20] ss:$8 sps:$4 sm:$0xff]   ;;  %v499_v28 = vld [vmem:[%s665_s0 + $0x34] ss:$8 sps:$4 sm:$0xff]  }
   0xa   :  { %v495_v25 = vld [vmem:[%s665_s0 + $0x64] ss:$8 sps:$4 sm:$0xff]   ;;  %v498_v27 = vld [vmem:[%s665_s0 + $0x60] ss:$8 sps:$4 sm:$0xff]   ;;  %v501_v29 = vld [vmem:[%s665_s0 + $0x74] ss:$8 sps:$4 sm:$0xff]  }
   0xb   :  { %390 = vmatpush3.bf16.msra.mxu0 %v470_v5  ;;  %459 = vmatpush3.bf16.msra.mxu1 %v470_v5  ;;  %v503_v30 = vld [vmem:[%s665_s0 + $0x30] ss:$8 sps:$4 sm:$0xff]  }
   0xc   :  { %391 = vmatprep.subr.bf16.mxu0 %v471_v6  ;;  %452 = vmatprep.subr.bf16.mxu1 %v471_v6  ;;  %v504_v31 = vld [vmem:[%s665_s0 + $0x70] ss:$8 sps:$4 sm:$0xff]  }
   0xf   :  { %392 = vmatpush3.bf16.msra.mxu0 %v472_v7  ;;  %460 = vmatpush3.bf16.msra.mxu1 %v472_v7 }
  0x10   :  { %393 = vmatprep.subr.bf16.mxu0 %v473_v8  ;;  %453 = vmatprep.subr.bf16.mxu1 %v473_v8 }
  0x13   :  { %394 = vmatpush3.bf16.msra.mxu0 %v474_v9  ;;  %461 = vmatpush3.bf16.msra.mxu1 %v474_v9 }
  0x14   :  { %395 = vmatprep.subr.bf16.mxu0 %v475_v10  ;;  %454 = vmatprep.subr.bf16.mxu1 %v475_v10 }
  0x17   :  { %396 = vmatpush3.bf16.msra.mxu0 %v476_v13  ;;  %462 = vmatpush3.bf16.msra.mxu1 %v476_v13 }
  0x18   :  { %397 = vmatprep.subr.bf16.mxu0 %v477_v14  ;;  %455 = vmatprep.subr.bf16.mxu1 %v477_v14 }
  0x1b   :  { %398 = vmatpush3.bf16.msra.mxu0 %v478_v15  ;;  %463 = vmatpush3.bf16.msra.mxu1 %v478_v15 }
  0x1c   :  { %399 = vmatprep.subr.bf16.mxu0 %v479_v16  ;;  %456 = vmatprep.subr.bf16.mxu1 %v479_v16 }
  0x1f   :  { %400 = vmatpush3.bf16.msra.mxu0 %v480_v17  ;;  %464 = vmatpush3.bf16.msra.mxu1 %v480_v17 }
  0x22   :  { %269 = vmatmul.mubr.bf16.vlgmr.msra.gmra.mrb[0].mxu0 %v481_v18  ;;  %301 = vmatmul.mubr.bf16.vlgmr.msra.gmra.mrb[0].mxu1 %v484_v19 }
  0x23   :  { %276 = vmatprep.mubr.bf16.mxu0 %v487_v20  ;;  %308 = vmatprep.mubr.bf16.mxu1 %v489_v21 }
  0x2a   :  { %277 = vmatmul.mubr.bf16.gmra.mrb[4].mxu0 %v491_v22  ;;  %309 = vmatmul.mubr.bf16.gmra.mrb[4].mxu1 %v492_v23 }
  0x2b   :  { %284 = vmatprep.mubr.bf16.mxu0 %v493_v24  ;;  %316 = vmatprep.mubr.bf16.mxu1 %v495_v25 }
  0x32   :  { %285 = vmatmul.mubr.bf16.gmra.mrb[8].mxu0 %v497_v26  ;;  %317 = vmatmul.mubr.bf16.gmra.mrb[8].mxu1 %v498_v27 }
  0x33   :  { %292 = vmatprep.mubr.bf16.mxu0 %v499_v28  ;;  %324 = vmatprep.mubr.bf16.mxu1 %v501_v29 }
  0x3a   :  { %293 = vmatmul.mubr.bf16.gmra.mrb[12].mxu0 %v503_v30  ;;  %325 = vmatmul.mubr.bf16.gmra.mrb[12].mxu1 %v504_v31 }
  0xf5   :  { %v401_v32 = vpop.f32.mrb[0].mxu0  ;;  %v425_v33 = vpop.f32.mrb[0].mxu1 }
  0xf6   :  { %v402_v34 = vpop.f32.mrb[1].mxu0  ;;  %v426_v35 = vpop.f32.mrb[1].mxu1 }
  0xf7   :  { %v403_v36 = vadd.f32 %v402_v34, %v401_v32  ;;  %v427_v37 = vadd.f32 %v426_v35, %v425_v33  ;;  %v404_v38 = vpop.f32.mrb[2].mxu0  ;;  %v428_v39 = vpop.f32.mrb[2].mxu1 }
  0xf8   :  { %v405_v40 = vpop.f32.mrb[3].mxu0  ;;  %v429_v41 = vpop.f32.mrb[3].mxu1 }
  0xf9   :  { %333 = vst [vmem:[%s666_s2] sm:$0xff] %v403_v36  ;;  %341 = vst [vmem:[%s666_s2 + $0x40] sm:$0xff] %v427_v37  ;;  %v406_v42 = vadd.f32 %v405_v40, %v404_v38  ;;  %v430_v43 = vadd.f32 %v429_v41, %v428_v39 }
  0xfb   :  { %334 = vst [vmem:[%s666_s2 + $0x8] sm:$0xff] %v406_v42  ;;  %342 = vst [vmem:[%s666_s2 + $0x48] sm:$0xff] %v430_v43 }
  0xfd   :  { %v407_v44 = vpop.f32.mrb[4].mxu0  ;;  %v431_v45 = vpop.f32.mrb[4].mxu1 }
  0xfe   :  { %v408_v46 = vpop.f32.mrb[5].mxu0  ;;  %v432_v47 = vpop.f32.mrb[5].mxu1 }
  0xff   :  { %v409_v48 = vadd.f32 %v408_v46, %v407_v44  ;;  %v433_v49 = vadd.f32 %v432_v47, %v431_v45  ;;  %v410_v50 = vpop.f32.mrb[6].mxu0  ;;  %v434_v51 = vpop.f32.mrb[6].mxu1 }
 0x100   :  { %v411_v52 = vpop.f32.mrb[7].mxu0  ;;  %v435_v53 = vpop.f32.mrb[7].mxu1 }
 0x101   :  { %335 = vst [vmem:[%s666_s2 + $0x10] sm:$0xff] %v409_v48  ;;  %343 = vst [vmem:[%s666_s2 + $0x50] sm:$0xff] %v433_v49  ;;  %v412_v54 = vadd.f32 %v411_v52, %v410_v50  ;;  %v436_v55 = vadd.f32 %v435_v53, %v434_v51 }
 0x103   :  { %336 = vst [vmem:[%s666_s2 + $0x18] sm:$0xff] %v412_v54  ;;  %344 = vst [vmem:[%s666_s2 + $0x58] sm:$0xff] %v436_v55 }
 0x105   :  { %v413_v56 = vpop.f32.mrb[8].mxu0  ;;  %v437_v57 = vpop.f32.mrb[8].mxu1 }
 0x106   :  { %v414_v58 = vpop.f32.mrb[9].mxu0  ;;  %v438_v59 = vpop.f32.mrb[9].mxu1 }
 0x107   :  { %v415_v60 = vadd.f32 %v414_v58, %v413_v56  ;;  %v439_v61 = vadd.f32 %v438_v59, %v437_v57  ;;  %v416_v62 = vpop.f32.mrb[10].mxu0  ;;  %v440_v63 = vpop.f32.mrb[10].mxu1 }
 0x108   :  { %v417_v0 = vpop.f32.mrb[11].mxu0  ;;  %v441_v1 = vpop.f32.mrb[11].mxu1 }
 0x109   :  { %337 = vst [vmem:[%s666_s2 + $0x20] sm:$0xff] %v415_v60  ;;  %345 = vst [vmem:[%s666_s2 + $0x60] sm:$0xff] %v439_v61  ;;  %v418_v2 = vadd.f32 %v417_v0, %v416_v62  ;;  %v442_v3 = vadd.f32 %v441_v1, %v440_v63 }
 0x10b   :  { %338 = vst [vmem:[%s666_s2 + $0x28] sm:$0xff] %v418_v2  ;;  %346 = vst [vmem:[%s666_s2 + $0x68] sm:$0xff] %v442_v3 }
 0x10d   :  { %v419_v4 = vpop.f32.mrb[12].mxu0  ;;  %v443_v5 = vpop.f32.mrb[12].mxu1 }
 0x10e   :  { %v420_v6 = vpop.f32.mrb[13].mxu0  ;;  %v444_v7 = vpop.f32.mrb[13].mxu1 }
 0x10f   :  { %v421_v8 = vadd.f32 %v420_v6, %v419_v4  ;;  %v445_v9 = vadd.f32 %v444_v7, %v443_v5  ;;  %v422_v10 = vpop.f32.mrb[14].mxu0  ;;  %v446_v11 = vpop.f32.mrb[14].mxu1 }
 0x110   :  { %v423_v12 = vpop.f32.mrb[15].mxu0  ;;  %v447_v13 = vpop.f32.mrb[15].mxu1 }
 0x111   :  { %339 = vst [vmem:[%s666_s2 + $0x30] sm:$0xff] %v421_v8  ;;  %347 = vst [vmem:[%s666_s2 + $0x70] sm:$0xff] %v445_v9  ;;  %v424_v14 = vadd.f32 %v423_v12, %v422_v10  ;;  %v448_v15 = vadd.f32 %v447_v13, %v446_v11 }
 0x113   :  { %340 = vst [vmem:[%s666_s2 + $0x38] sm:$0xff] %v424_v14  ;;  %348 = vst [vmem:[%s666_s2 + $0x78] sm:$0xff] %v448_v15 }

// kernel: hourglass_bev_neck_forward.41
= control target key start
LH: loop header
LB: loop body
LE: loop exit
PB: predicated region body
PF: predicated region fallthrough
CT: control target
= control target key end

     0   :  { %s482_s12 = smov 0   ;;  %s484_s13 = smov 0   ;;  %s521_s0 = inlined_call_operand.vmem [shape: f32[2,64,128], index: 0, kind: input, shape index: {}]   ;;  %s522_s1 = inlined_call_operand.vmem [shape: f32[2,8,128], index: 1, kind: input, shape index: {}]   ;;  %s523_s2 = inlined_call_operand.vmem [shape: f32[2,8,128], index: 2, kind: input, shape index: {}]   ;;  %s524_s3 = inlined_call_operand.vmem [shape: f32[2,64,128], index: 3, kind: output, shape index: {}]  }
   0x1   :  { %s486_s14 = smov 0  }
   0x2 LB: > { %s25_s15 = sadd.s32 1, %s456_s13  ;;  %p401_p0 = scmp.ge.s32.totalorder %s460_s14, 1  ;;  %s460_s14 = sphi %s486_s14, %s13_s14   ;;  %s456_s13 = sphi %s484_s13, %s526_s13   ;;  %s452_s12 = sphi %s482_s12, %s525_s12  }
   0x3   : > { %p27_p1 = scmp.ge.s32.totalorder %s25_s15, 2  ;;  %p176_p2 = scmp.lt.s32.totalorder %s460_s14, 3 }
   0x5   : > { %s528_s15 = smov (%p27_p1, %s25_s15), 0  ;;  %p177_p3 = pnand %p401_p0, %p176_p2 }
   0x6   : > { %p217_p4 = scmp.lt.s32.totalorder (!%p177_p3), %s452_s12, 1 }
   0x7   : > { %180 = sbr.rel (%p177_p3) target bundleno = 27 (0x1b), region = 32 }
   0xe   : > { %s530_s12 = smov (!%p217_p4, %s452_s12), 1 }
   0xf   : > { %s412_s16 = sshll.u32 %s530_s12, 6  ;;  %s404_s17 = sshll.u32 %s530_s12, 3 }
  0x10   : > { %s224_s20 = scalar_lea.vmem %s521_s0, %s412_s16  ;;  %s229_s23 = scalar_lea.vmem %s522_s1, %s404_s17 }
  0x11   : > { %s233_s26 = scalar_lea.vmem %s523_s2, %s404_s17  ;;  %v244_v0 = vld [vmem:[%s224_s20] sm:$0xff]  ;;  %v245_v2 = vld [vmem:[%s224_s20 + $0x8] sm:$0xff]  ;;  %v246_v6 = vld [vmem:[%s224_s20 + $0x10] sm:$0xff]  ;;  %s242_s29 = scalar_lea.vmem %s524_s3, %s412_s16 }
  0x12   : > { %v408_v1 = vld [vmem:[%s229_s23] ss:$0 sm:$0xff]  ;;  %v247_v7 = vld [vmem:[%s224_s20 + $0x18] sm:$0xff]  ;;  %v249_v11 = vld [vmem:[%s224_s20 + $0x28] sm:$0xff] }
  0x13   : > { %v257_v3 = vmul.f32 %v408_v1, %v244_v0  ;;  %v409_v4 = vld [vmem:[%s233_s26] ss:$0 sm:$0xff]  ;;  %v258_v5 = vmul.f32 %v408_v1, %v245_v2  ;;  %v259_v8 = vmul.f32 %v408_v1, %v246_v6  ;;  %v260_v9 = vmul.f32 %v408_v1, %v247_v7  ;;  %v250_v12 = vld [vmem:[%s224_s20 + $0x30] sm:$0xff]  ;;  %v251_v17 = vld [vmem:[%s224_s20 + $0x38] sm:$0xff] }
  0x14   : > { %v248_v10 = vld [vmem:[%s224_s20 + $0x20] sm:$0xff]  ;;  %v262_v16 = vmul.f32 %v408_v1, %v249_v11  ;;  %v263_v20 = vmul.f32 %v408_v1, %v250_v12  ;;  %v264_v21 = vmul.f32 %v408_v1, %v251_v17 }
  0x15   : > { %v270_v13 = vadd.f32 %v409_v4, %v257_v3  ;;  %v271_v14 = vadd.f32 %v409_v4, %v258_v5  ;;  %v261_v15 = vmul.f32 %v408_v1, %v248_v10  ;;  %v272_v18 = vadd.f32 %v409_v4, %v259_v8 }
  0x16   : > { %v273_v19 = vadd.f32 %v409_v4, %v260_v9  ;;  %v275_v23 = vadd.f32 %v409_v4, %v262_v16  ;;  %v276_v24 = vadd.f32 %v409_v4, %v263_v20  ;;  %v277_v25 = vadd.f32 %v409_v4, %v264_v21 }
  0x17   : > { %278 = vst [vmem:[%s242_s29] sm:$0xff] %v270_v13  ;;  %279 = vst [vmem:[%s242_s29 + $0x8] sm:$0xff] %v271_v14  ;;  %v274_v22 = vadd.f32 %v409_v4, %v261_v15 }
  0x18   : > { %280 = vst [vmem:[%s242_s29 + $0x10] sm:$0xff] %v272_v18  ;;  %281 = vst [vmem:[%s242_s29 + $0x18] sm:$0xff] %v273_v19 }
  0x19   : > { %282 = vst [vmem:[%s242_s29 + $0x20] sm:$0xff] %v274_v22  ;;  %283 = vst [vmem:[%s242_s29 + $0x28] sm:$0xff] %v275_v23 }
  0x1a   : > { %284 = vst [vmem:[%s242_s29 + $0x30] sm:$0xff] %v276_v24  ;;  %285 = vst [vmem:[%s242_s29 + $0x38] sm:$0xff] %v277_v25 }
  0x1b PF: > { %s13_s14 = sadd.s32 1, %s460_s14   ;;  %s525_s12 = smov %s456_s13 }
  0x1c   : > { %p10_p5 = scmp.ge.s32.totalorder %s13_s14, 4   ;;  %s526_s13 = smov %s528_s15 }
  0x1e   :  { %12 = sbr.rel (!%p10_p5) target bundleno = 2 (0x2), region = 68 }

</bundles_post_ra>
